<compile_context>
chip_gen: v7x
topology: tpu7x:2x2x1
jax: 0.10.0
libtpu: 0.0.40
codegen_flags: <defaults>
</compile_context>

<pallas_src>
import functools

import numpy as np
import jax
import jax.numpy as jnp
from jax.experimental import pallas as pl
from jax.experimental.pallas import tpu as pltpu

NEG_SLOPE = 0.01  # nn.LeakyReLU() default negative_slope


def leaky_relu(v):
    return jnp.where(v >= 0, v, v * NEG_SLOPE)


# -------------------- conv-as-matmul selection ("gather") matrices --------------------

def _conv_tap_selectors(hi, wi, kh, kw, stride, pad):
    """0/1 matrices T[k] (P_in, P_out): T[k][p_in, p_out] = 1 iff input position p_in
    feeds output position p_out for kernel tap k.  Zero rows encode zero padding."""
    ho = (hi + 2 * pad - kh) // stride + 1
    wo = (wi + 2 * pad - kw) // stride + 1
    sel = np.zeros((kh * kw, hi * wi, ho * wo), np.float32)
    for ki in range(kh):
        for kj in range(kw):
            k = ki * kw + kj
            for oy in range(ho):
                for ox in range(wo):
                    iy = oy * stride + ki - pad
                    ix = ox * stride + kj - pad
                    if 0 <= iy < hi and 0 <= ix < wi:
                        sel[k, iy * wi + ix, oy * wo + ox] = 1.0
    return sel, ho, wo


# ----------------------------- parameter init (PyTorch layouts) -----------------------------

def xavier_uniform(key, shape, fan_in, fan_out):
    bound = float(np.sqrt(6.0 / (fan_in + fan_out)))
    return jax.random.uniform(key, shape, jnp.float32, -bound, bound)


def init_conv(key, in_c, out_c, kh, kw):
    w = xavier_uniform(key, (out_c, in_c, kh, kw), in_c * kh * kw, out_c * kh * kw)
    b = jnp.full((out_c,), 0.01, jnp.float32)
    return w, b


def init_linear(key, in_f, out_f):
    w = xavier_uniform(key, (out_f, in_f), in_f, out_f)  # PyTorch (out, in) layout
    b = jnp.full((out_f,), 0.01, jnp.float32)
    return w, b


class Cfg:
    f_dim = 8
    fc_dim = 32
    z_dim = 16
    input_shape = (16, 16, 4)  # (H, W, C): image_size=16, image_channels=4
    predict_pose = True


def init_encoder_params(cfg, key):
    target_spatial_size = 4
    image_size = cfg.input_shape[0]
    image_channels = cfg.input_shape[2]
    num_blocks = int(np.log2(image_size / target_spatial_size) - 1)

    keys = iter(jax.random.split(key, 16))
    f_dim = cfg.f_dim

    convs = []  # list of (w_oihw, b, stride, pad)
    w, b = init_conv(next(keys), image_channels, f_dim, 5, 5)
    convs.append((w, b, 2, 2))
    for _ in range(num_blocks):
        f_dim = f_dim * 2
        w, b = init_conv(next(keys), f_dim // 2, f_dim, 3, 3)
        convs.append((w, b, 2, 1))
        w, b = init_conv(next(keys), f_dim, f_dim, 3, 3)
        convs.append((w, b, 1, 1))

    params = {
        "convs": convs,
        "fc1": init_linear(next(keys), f_dim * target_spatial_size * target_spatial_size, cfg.fc_dim),
        "fc2": init_linear(next(keys), cfg.fc_dim, cfg.fc_dim),
        "fc3": init_linear(next(keys), cfg.fc_dim, cfg.z_dim),
    }
    if cfg.predict_pose:
        params["pose_fc"] = init_linear(next(keys), cfg.fc_dim, cfg.z_dim)
    return params


# ----------------------------- pack params into kernel operands -----------------------------

def pack_params(cfg, params):
    """One-time repacking: stacked per-tap conv weights, selection matrices, pre-transposed
    FC weights, and merged fc3/pose head.  Done once at init, never on the hot path."""
    H, W, C0 = cfg.input_shape[0], cfg.input_shape[1], cfg.input_shape[2]
    conv_meta = []
    arrays = []
    hi, wi = H, W
    for (w, b, stride, pad) in params["convs"]:
        out_c, in_c, kh, kw = w.shape
        sel, ho, wo = _conv_tap_selectors(hi, wi, kh, kw, stride, pad)
        # rows [k*out_c : (k+1)*out_c] = w[:, :, ki, kj] for tap k = ki*kw + kj
        w_stacked = jnp.transpose(w, (2, 3, 0, 1)).reshape(kh * kw * out_c, in_c)
        arrays += [w_stacked, b.reshape(out_c, 1), jnp.asarray(sel)]
        conv_meta.append({"ntaps": kh * kw, "cout": out_c, "pout": ho * wo})
        hi, wi = ho, wo

    c_last = conv_meta[-1]["cout"]
    p_last = conv_meta[-1]["pout"]

    w1, b1 = params["fc1"]
    fc_dim = w1.shape[0]
    # (256, 32) -> (C_last, P_last, fc_dim): [c, p, n] multiplies feature index c*P+p
    arrays += [jnp.transpose(w1).reshape(c_last, p_last, fc_dim), b1.reshape(1, fc_dim)]

    w2, b2 = params["fc2"]
    arrays += [jnp.transpose(w2), b2.reshape(1, fc_dim)]

    w3, b3 = params["fc3"]
    z_dim = w3.shape[0]
    if cfg.predict_pose:
        wp, bp = params["pose_fc"]
        whead = jnp.concatenate([jnp.transpose(w3), jnp.transpose(wp)], axis=1)  # (fc_dim, 2*z_dim)
        bhead = jnp.concatenate([b3, bp]).reshape(1, 2 * z_dim)
        head_w = 2 * z_dim
    else:
        whead = jnp.transpose(w3)
        bhead = b3.reshape(1, z_dim)
        head_w = z_dim
    arrays += [whead, bhead]

    meta = {"cin0": C0, "pin0": H * W, "convs": conv_meta,
            "c_last": c_last, "p_last": p_last,
            "fc_dim": fc_dim, "z_dim": z_dim, "head_w": head_w,
            "predict_pose": bool(cfg.predict_pose)}
    return meta, arrays


# ----------------------------- fused forward pass (single pallas_call) -----------------------------

def encoder_forward(meta, arrays, x_nchw):
    B = x_nchw.shape[0]
    c0, p0 = meta["cin0"], meta["pin0"]
    conv_meta = meta["convs"]
    n_conv = len(conv_meta)
    c_last, p_last = meta["c_last"], meta["p_last"]
    fc_dim, z_dim, head_w = meta["fc_dim"], meta["z_dim"], meta["head_w"]
    predict_pose = meta["predict_pose"]

    x = x_nchw.reshape(B, c0, p0)  # NCHW -> (B, C, H*W), free reshape

    def kernel(*refs):
        x_ref = refs[0]
        pos = 1
        conv_refs = []
        for _ in range(n_conv):
            conv_refs.append((refs[pos], refs[pos + 1], refs[pos + 2]))
            pos += 3
        (w1fc_ref, b1fc_ref, w2fc_ref, b2fc_ref, whead_ref, bhead_ref) = refs[pos:pos + 6]
        pos += 6
        feat_ref, z_ref, head_ref = refs[pos:pos + 3]

        # Preprocess fused into the kernel.  The selection matrices have zero rows for
        # padded taps, so zero padding is applied AFTER x*2-1 — exactly like PyTorch.
        y = x_ref[0].astype(jnp.float32) * 2.0 - 1.0            # (C_in, P_in)

        # Conv stack, all on the MXU: one stacked-weight matmul per layer, then one
        # gather-matmul per tap, accumulate, bias, LeakyReLU.  No HBM round trips.
        for l, (w_ref, b_ref, t_ref) in enumerate(conv_refs):
            cm = conv_meta[l]
            cout, ntaps = cm["cout"], cm["ntaps"]
            z = jnp.dot(w_ref[...], y, preferred_element_type=jnp.float32)   # (ntaps*cout, P_in)
            acc = None
            for k in range(ntaps):
                zk = z[k * cout:(k + 1) * cout, :]                           # aligned row slice
                term = jnp.dot(zk, t_ref[k], preferred_element_type=jnp.float32)
                acc = term if acc is None else acc + term
            y = leaky_relu(acc + b_ref[...])                                  # (cout, P_out)

        # Last conv activation in (C, P) layout == PyTorch NCHW flatten order.
        feat_ref[0] = y                                                       # (C_last, P_last)

        # fc1: sum_c y[c, :] @ W1[c] with W1 pre-reshaped to (C, P, fc_dim).
        # Row extraction via masked reduce (only well-supported ops: dot/where/sum).
        row_ids = jax.lax.broadcasted_iota(jnp.int32, (c_last, fc_dim), 0)
        s = jnp.zeros((c_last, fc_dim), jnp.float32)
        for c in range(c_last):
            prod = jnp.dot(y, w1fc_ref[c], preferred_element_type=jnp.float32)  # (C_last, fc_dim)
            s = s + jnp.where(row_ids == c, prod, 0.0)
        fc1_out = leaky_relu(jnp.sum(s, axis=0, keepdims=True) + b1fc_ref[...])  # (1, fc_dim)
        z_ref[0] = fc1_out  # z_latent is the post-activation fc1 output (matches PyTorch)

        fc2_out = leaky_relu(
            jnp.dot(fc1_out, w2fc_ref[...], preferred_element_type=jnp.float32) + b2fc_ref[...])

        # Merged fc3 + pose_fc head: single matmul, LeakyReLU only on the fc3 half.
        head_val = jnp.dot(fc2_out, whead_ref[...],
                           preferred_element_type=jnp.float32) + bhead_ref[...]
        if predict_pose:
            lane = jax.lax.broadcasted_iota(jnp.int32, (1, head_w), 1)
            head_val = jnp.where(lane < z_dim, leaky_relu(head_val), head_val)
        else:
            head_val = leaky_relu(head_val)
        head_ref[0] = head_val

    def _const_spec(a):
        nd = a.ndim
        return pl.BlockSpec(a.shape, lambda b, _nd=nd: (0,) * _nd)

    in_specs = [pl.BlockSpec((1, c0, p0), lambda b: (b, 0, 0))]
    in_specs += [_const_spec(a) for a in arrays]

    out_shape = (jax.ShapeDtypeStruct((B, c_last, p_last), jnp.float32),
                 jax.ShapeDtypeStruct((B, 1, fc_dim), jnp.float32),
                 jax.ShapeDtypeStruct((B, 1, head_w), jnp.float32))
    out_specs = (pl.BlockSpec((1, c_last, p_last), lambda b: (b, 0, 0)),
                 pl.BlockSpec((1, 1, fc_dim), lambda b: (b, 0, 0)),
                 pl.BlockSpec((1, 1, head_w), lambda b: (b, 0, 0)))

    feat, z_latent, head = pl.pallas_call(
        kernel,
        out_shape=out_shape,
        grid=(B,),
        in_specs=in_specs,
        out_specs=out_specs,
        compiler_params=pltpu.CompilerParams(
            dimension_semantics=("parallel",),      # shards batch across TCs on v7x
            vmem_limit_bytes=32 * 1024 * 1024),
    )(x, *arrays)

    outputs = {"conv_features": feat.reshape(B, c_last * p_last),
               "z_latent": z_latent.reshape(B, fc_dim)}
    head = head.reshape(B, head_w)
    if predict_pose:
        outputs["ids"] = head[:, :z_dim]     # LeakyReLU already applied in-kernel
        outputs["poses"] = head[:, z_dim:]   # no activation (plain Linear)
    else:
        outputs["ids"] = head
    return outputs


# ----------------------------- pure-JAX reference (for verification) -----------------------------

def reference_forward(params, x, cfg):
    y = x * 2.0 - 1.0
    for (w, b, stride, pad) in params["convs"]:
        y = jax.lax.conv_general_dilated(
            y, w, (stride, stride), [(pad, pad), (pad, pad)],
            dimension_numbers=("NCHW", "OIHW", "NCHW"),
            precision=jax.lax.Precision.HIGHEST)
        y = leaky_relu(y + b[None, :, None, None])
    B = y.shape[0]
    feat = y.reshape(B, -1)

    def linear(p, v):
        w, b = p
        return jnp.matmul(v, w.T, precision=jax.lax.Precision.HIGHEST) + b

    fc1 = leaky_relu(linear(params["fc1"], feat))
    fc2 = leaky_relu(linear(params["fc2"], fc1))
    fc3 = leaky_relu(linear(params["fc3"], fc2))
    out = {"conv_features": feat, "z_latent": fc1, "ids": fc3}
    if cfg.predict_pose:
        out["poses"] = linear(params["pose_fc"], fc2)
    return out


# ----------------------------- main -----------------------------

if __name__ == "__main__":
    cfg = Cfg()
    key = jax.random.PRNGKey(0)
    pkey, xkey = jax.random.split(key)

    params = init_encoder_params(cfg, pkey)
    meta, arrays = pack_params(cfg, params)

    # NCHW input, matching the PyTorch module's conv input convention.
    x = jax.random.normal(
        xkey, (2, cfg.input_shape[2], cfg.input_shape[0], cfg.input_shape[1]),
        dtype=jnp.float32)

    fwd = jax.jit(functools.partial(encoder_forward, meta))
    outputs = fwd(arrays, x)
    outputs = jax.block_until_ready(outputs)

    # Shape checks implied by the module.
    assert outputs["conv_features"].shape == (2, 16 * 4 * 4)
    assert outputs["z_latent"].shape == (2, cfg.fc_dim)
    assert outputs["ids"].shape == (2, cfg.z_dim)
    assert outputs["poses"].shape == (2, cfg.z_dim)

    # Numerical check against a plain-JAX reference of the PyTorch module.
    ref = reference_forward(params, x, cfg)
    for name in ("conv_features", "z_latent", "ids", "poses"):
        assert jnp.allclose(outputs[name], ref[name], rtol=1e-2, atol=1e-2), name

    print("KERNEL_OK")
</pallas_src>

<mosaic_0001>
module attributes {stable_mosaic.version = 11 : i64} {
  func.func @kernel(%arg0: i32, %arg1: memref<1x4x256xf32, #tpu.memory_space<vmem>>, %arg2: memref<200x4xf32, #tpu.memory_space<vmem>>, %arg3: memref<8x1xf32, #tpu.memory_space<vmem>>, %arg4: memref<25x256x64xf32, #tpu.memory_space<vmem>>, %arg5: memref<144x8xf32, #tpu.memory_space<vmem>>, %arg6: memref<16x1xf32, #tpu.memory_space<vmem>>, %arg7: memref<9x64x16xf32, #tpu.memory_space<vmem>>, %arg8: memref<144x16xf32, #tpu.memory_space<vmem>>, %arg9: memref<16x1xf32, #tpu.memory_space<vmem>>, %arg10: memref<9x16x16xf32, #tpu.memory_space<vmem>>, %arg11: memref<16x16x32xf32, #tpu.memory_space<vmem>>, %arg12: memref<1x32xf32, #tpu.memory_space<vmem>>, %arg13: memref<32x32xf32, #tpu.memory_space<vmem>>, %arg14: memref<1x32xf32, #tpu.memory_space<vmem>>, %arg15: memref<32x32xf32, #tpu.memory_space<vmem>>, %arg16: memref<1x32xf32, #tpu.memory_space<vmem>>, %arg17: memref<1x16x16xf32, #tpu.memory_space<vmem>>, %arg18: memref<1x1x32xf32, #tpu.memory_space<vmem>>, %arg19: memref<1x1x32xf32, #tpu.memory_space<vmem>>) attributes {dimension_semantics = [#tpu.dimension_semantics<parallel>], iteration_bounds = array<i64: 2>, scalar_prefetch = 0 : i64, scratch_operands = 0 : i64, tpu.core_type = #tpu.core_type<tc>, window_params = [{transform_indices = @transform_0, window_bounds = array<i64: 1, 4, 256>}, {pipeline_mode = #tpu.pipeline_mode<synchronous>, transform_indices = @transform_1, window_bounds = array<i64: 200, 4>}, {pipeline_mode = #tpu.pipeline_mode<synchronous>, transform_indices = @transform_2, window_bounds = array<i64: 8, 1>}, {pipeline_mode = #tpu.pipeline_mode<synchronous>, transform_indices = @transform_3, window_bounds = array<i64: 25, 256, 64>}, {pipeline_mode = #tpu.pipeline_mode<synchronous>, transform_indices = @transform_4, window_bounds = array<i64: 144, 8>}, {pipeline_mode = #tpu.pipeline_mode<synchronous>, transform_indices = @transform_5, window_bounds = array<i64: 16, 1>}, {pipeline_mode = #tpu.pipeline_mode<synchronous>, transform_indices = @transform_6, window_bounds = array<i64: 9, 64, 16>}, {pipeline_mode = #tpu.pipeline_mode<synchronous>, transform_indices = @transform_7, window_bounds = array<i64: 144, 16>}, {pipeline_mode = #tpu.pipeline_mode<synchronous>, transform_indices = @transform_8, window_bounds = array<i64: 16, 1>}, {pipeline_mode = #tpu.pipeline_mode<synchronous>, transform_indices = @transform_9, window_bounds = array<i64: 9, 16, 16>}, {pipeline_mode = #tpu.pipeline_mode<synchronous>, transform_indices = @transform_10, window_bounds = array<i64: 16, 16, 32>}, {pipeline_mode = #tpu.pipeline_mode<synchronous>, transform_indices = @transform_11, window_bounds = array<i64: 1, 32>}, {pipeline_mode = #tpu.pipeline_mode<synchronous>, transform_indices = @transform_12, window_bounds = array<i64: 32, 32>}, {pipeline_mode = #tpu.pipeline_mode<synchronous>, transform_indices = @transform_13, window_bounds = array<i64: 1, 32>}, {pipeline_mode = #tpu.pipeline_mode<synchronous>, transform_indices = @transform_14, window_bounds = array<i64: 32, 32>}, {pipeline_mode = #tpu.pipeline_mode<synchronous>, transform_indices = @transform_15, window_bounds = array<i64: 1, 32>}, {transform_indices = @transform_16, window_bounds = array<i64: 1, 16, 16>}, {transform_indices = @transform_17, window_bounds = array<i64: 1, 1, 32>}, {transform_indices = @transform_18, window_bounds = array<i64: 1, 1, 32>}]} {
    %c0 = arith.constant 0 : index
    %c0_0 = arith.constant 0 : index
    %c0_1 = arith.constant 0 : index
    %0 = vector.load %arg1[%c0, %c0_0, %c0_1] : memref<1x4x256xf32, #tpu.memory_space<vmem>>, vector<1x4x256xf32>
    %1 = vector.shape_cast %0 : vector<1x4x256xf32> to vector<4x256xf32>
    %cst = arith.constant 2.000000e+00 : f32
    %2 = vector.broadcast %cst : f32 to vector<4x256xf32>
    %3 = arith.mulf %1, %2 : vector<4x256xf32>
    %cst_2 = arith.constant 1.000000e+00 : f32
    %4 = vector.broadcast %cst_2 : f32 to vector<4x256xf32>
    %5 = arith.subf %3, %4 : vector<4x256xf32>
    %c0_3 = arith.constant 0 : index
    %c0_4 = arith.constant 0 : index
    %6 = vector.load %arg2[%c0_3, %c0_4] : memref<200x4xf32, #tpu.memory_space<vmem>>, vector<200x4xf32>
    %cst_5 = arith.constant dense<0.000000e+00> : vector<200x256xf32>
    %7 = tpu.matmul %6, %5, %cst_5 {dimension_numbers = #tpu.dot_dimension_numbers<[1], [0], [0], [1], [0, 0, 1, 1], [], []>} : vector<200x4xf32>, vector<4x256xf32>, vector<200x256xf32> -> vector<200x256xf32>
    %8 = vector.extract_strided_slice %7 {offsets = [0, 0], sizes = [8, 256], strides = [1, 1]} : vector<200x256xf32> to vector<8x256xf32>
    %c0_6 = arith.constant 0 : index
    %c0_7 = arith.constant 0 : index
    %c0_8 = arith.constant 0 : index
    %9 = vector.load %arg4[%c0_6, %c0_7, %c0_8] : memref<25x256x64xf32, #tpu.memory_space<vmem>>, vector<1x256x64xf32>
    %10 = vector.shape_cast %9 : vector<1x256x64xf32> to vector<256x64xf32>
    %cst_9 = arith.constant dense<0.000000e+00> : vector<8x64xf32>
    %11 = tpu.matmul %8, %10, %cst_9 {dimension_numbers = #tpu.dot_dimension_numbers<[1], [0], [0], [1], [0, 0, 1, 1], [], []>} : vector<8x256xf32>, vector<256x64xf32>, vector<8x64xf32> -> vector<8x64xf32>
    %12 = vector.extract_strided_slice %7 {offsets = [8, 0], sizes = [8, 256], strides = [1, 1]} : vector<200x256xf32> to vector<8x256xf32>
    %c1 = arith.constant 1 : index
    %c0_10 = arith.constant 0 : index
    %c0_11 = arith.constant 0 : index
    %13 = vector.load %arg4[%c1, %c0_10, %c0_11] : memref<25x256x64xf32, #tpu.memory_space<vmem>>, vector<1x256x64xf32>
    %14 = vector.shape_cast %13 : vector<1x256x64xf32> to vector<256x64xf32>
    %cst_12 = arith.constant dense<0.000000e+00> : vector<8x64xf32>
    %15 = tpu.matmul %12, %14, %cst_12 {dimension_numbers = #tpu.dot_dimension_numbers<[1], [0], [0], [1], [0, 0, 1, 1], [], []>} : vector<8x256xf32>, vector<256x64xf32>, vector<8x64xf32> -> vector<8x64xf32>
    %16 = arith.addf %11, %15 : vector<8x64xf32>
    %17 = vector.extract_strided_slice %7 {offsets = [16, 0], sizes = [8, 256], strides = [1, 1]} : vector<200x256xf32> to vector<8x256xf32>
    %c2 = arith.constant 2 : index
    %c0_13 = arith.constant 0 : index
    %c0_14 = arith.constant 0 : index
    %18 = vector.load %arg4[%c2, %c0_13, %c0_14] : memref<25x256x64xf32, #tpu.memory_space<vmem>>, vector<1x256x64xf32>
    %19 = vector.shape_cast %18 : vector<1x256x64xf32> to vector<256x64xf32>
    %cst_15 = arith.constant dense<0.000000e+00> : vector<8x64xf32>
    %20 = tpu.matmul %17, %19, %cst_15 {dimension_numbers = #tpu.dot_dimension_numbers<[1], [0], [0], [1], [0, 0, 1, 1], [], []>} : vector<8x256xf32>, vector<256x64xf32>, vector<8x64xf32> -> vector<8x64xf32>
    %21 = arith.addf %16, %20 : vector<8x64xf32>
    %22 = vector.extract_strided_slice %7 {offsets = [24, 0], sizes = [8, 256], strides = [1, 1]} : vector<200x256xf32> to vector<8x256xf32>
    %c3 = arith.constant 3 : index
    %c0_16 = arith.constant 0 : index
    %c0_17 = arith.constant 0 : index
    %23 = vector.load %arg4[%c3, %c0_16, %c0_17] : memref<25x256x64xf32, #tpu.memory_space<vmem>>, vector<1x256x64xf32>
    %24 = vector.shape_cast %23 : vector<1x256x64xf32> to vector<256x64xf32>
    %cst_18 = arith.constant dense<0.000000e+00> : vector<8x64xf32>
    %25 = tpu.matmul %22, %24, %cst_18 {dimension_numbers = #tpu.dot_dimension_numbers<[1], [0], [0], [1], [0, 0, 1, 1], [], []>} : vector<8x256xf32>, vector<256x64xf32>, vector<8x64xf32> -> vector<8x64xf32>
    %26 = arith.addf %21, %25 : vector<8x64xf32>
    %27 = vector.extract_strided_slice %7 {offsets = [32, 0], sizes = [8, 256], strides = [1, 1]} : vector<200x256xf32> to vector<8x256xf32>
    %c4 = arith.constant 4 : index
    %c0_19 = arith.constant 0 : index
    %c0_20 = arith.constant 0 : index
    %28 = vector.load %arg4[%c4, %c0_19, %c0_20] : memref<25x256x64xf32, #tpu.memory_space<vmem>>, vector<1x256x64xf32>
    %29 = vector.shape_cast %28 : vector<1x256x64xf32> to vector<256x64xf32>
    %cst_21 = arith.constant dense<0.000000e+00> : vector<8x64xf32>
    %30 = tpu.matmul %27, %29, %cst_21 {dimension_numbers = #tpu.dot_dimension_numbers<[1], [0], [0], [1], [0, 0, 1, 1], [], []>} : vector<8x256xf32>, vector<256x64xf32>, vector<8x64xf32> -> vector<8x64xf32>
    %31 = arith.addf %26, %30 : vector<8x64xf32>
    %32 = vector.extract_strided_slice %7 {offsets = [40, 0], sizes = [8, 256], strides = [1, 1]} : vector<200x256xf32> to vector<8x256xf32>
    %c5 = arith.constant 5 : index
    %c0_22 = arith.constant 0 : index
    %c0_23 = arith.constant 0 : index
    %33 = vector.load %arg4[%c5, %c0_22, %c0_23] : memref<25x256x64xf32, #tpu.memory_space<vmem>>, vector<1x256x64xf32>
    %34 = vector.shape_cast %33 : vector<1x256x64xf32> to vector<256x64xf32>
    %cst_24 = arith.constant dense<0.000000e+00> : vector<8x64xf32>
    %35 = tpu.matmul %32, %34, %cst_24 {dimension_numbers = #tpu.dot_dimension_numbers<[1], [0], [0], [1], [0, 0, 1, 1], [], []>} : vector<8x256xf32>, vector<256x64xf32>, vector<8x64xf32> -> vector<8x64xf32>
    %36 = arith.addf %31, %35 : vector<8x64xf32>
    %37 = vector.extract_strided_slice %7 {offsets = [48, 0], sizes = [8, 256], strides = [1, 1]} : vector<200x256xf32> to vector<8x256xf32>
    %c6 = arith.constant 6 : index
    %c0_25 = arith.constant 0 : index
    %c0_26 = arith.constant 0 : index
    %38 = vector.load %arg4[%c6, %c0_25, %c0_26] : memref<25x256x64xf32, #tpu.memory_space<vmem>>, vector<1x256x64xf32>
    %39 = vector.shape_cast %38 : vector<1x256x64xf32> to vector<256x64xf32>
    %cst_27 = arith.constant dense<0.000000e+00> : vector<8x64xf32>
    %40 = tpu.matmul %37, %39, %cst_27 {dimension_numbers = #tpu.dot_dimension_numbers<[1], [0], [0], [1], [0, 0, 1, 1], [], []>} : vector<8x256xf32>, vector<256x64xf32>, vector<8x64xf32> -> vector<8x64xf32>
    %41 = arith.addf %36, %40 : vector<8x64xf32>
    %42 = vector.extract_strided_slice %7 {offsets = [56, 0], sizes = [8, 256], strides = [1, 1]} : vector<200x256xf32> to vector<8x256xf32>
    %c7 = arith.constant 7 : index
    %c0_28 = arith.constant 0 : index
    %c0_29 = arith.constant 0 : index
    %43 = vector.load %arg4[%c7, %c0_28, %c0_29] : memref<25x256x64xf32, #tpu.memory_space<vmem>>, vector<1x256x64xf32>
    %44 = vector.shape_cast %43 : vector<1x256x64xf32> to vector<256x64xf32>
    %cst_30 = arith.constant dense<0.000000e+00> : vector<8x64xf32>
    %45 = tpu.matmul %42, %44, %cst_30 {dimension_numbers = #tpu.dot_dimension_numbers<[1], [0], [0], [1], [0, 0, 1, 1], [], []>} : vector<8x256xf32>, vector<256x64xf32>, vector<8x64xf32> -> vector<8x64xf32>
    %46 = arith.addf %41, %45 : vector<8x64xf32>
    %47 = vector.extract_strided_slice %7 {offsets = [64, 0], sizes = [8, 256], strides = [1, 1]} : vector<200x256xf32> to vector<8x256xf32>
    %c8 = arith.constant 8 : index
    %c0_31 = arith.constant 0 : index
    %c0_32 = arith.constant 0 : index
    %48 = vector.load %arg4[%c8, %c0_31, %c0_32] : memref<25x256x64xf32, #tpu.memory_space<vmem>>, vector<1x256x64xf32>
    %49 = vector.shape_cast %48 : vector<1x256x64xf32> to vector<256x64xf32>
    %cst_33 = arith.constant dense<0.000000e+00> : vector<8x64xf32>
    %50 = tpu.matmul %47, %49, %cst_33 {dimension_numbers = #tpu.dot_dimension_numbers<[1], [0], [0], [1], [0, 0, 1, 1], [], []>} : vector<8x256xf32>, vector<256x64xf32>, vector<8x64xf32> -> vector<8x64xf32>
    %51 = arith.addf %46, %50 : vector<8x64xf32>
    %52 = vector.extract_strided_slice %7 {offsets = [72, 0], sizes = [8, 256], strides = [1, 1]} : vector<200x256xf32> to vector<8x256xf32>
    %c9 = arith.constant 9 : index
    %c0_34 = arith.constant 0 : index
    %c0_35 = arith.constant 0 : index
    %53 = vector.load %arg4[%c9, %c0_34, %c0_35] : memref<25x256x64xf32, #tpu.memory_space<vmem>>, vector<1x256x64xf32>
    %54 = vector.shape_cast %53 : vector<1x256x64xf32> to vector<256x64xf32>
    %cst_36 = arith.constant dense<0.000000e+00> : vector<8x64xf32>
    %55 = tpu.matmul %52, %54, %cst_36 {dimension_numbers = #tpu.dot_dimension_numbers<[1], [0], [0], [1], [0, 0, 1, 1], [], []>} : vector<8x256xf32>, vector<256x64xf32>, vector<8x64xf32> -> vector<8x64xf32>
    %56 = arith.addf %51, %55 : vector<8x64xf32>
    %57 = vector.extract_strided_slice %7 {offsets = [80, 0], sizes = [8, 256], strides = [1, 1]} : vector<200x256xf32> to vector<8x256xf32>
    %c10 = arith.constant 10 : index
    %c0_37 = arith.constant 0 : index
    %c0_38 = arith.constant 0 : index
    %58 = vector.load %arg4[%c10, %c0_37, %c0_38] : memref<25x256x64xf32, #tpu.memory_space<vmem>>, vector<1x256x64xf32>
    %59 = vector.shape_cast %58 : vector<1x256x64xf32> to vector<256x64xf32>
    %cst_39 = arith.constant dense<0.000000e+00> : vector<8x64xf32>
    %60 = tpu.matmul %57, %59, %cst_39 {dimension_numbers = #tpu.dot_dimension_numbers<[1], [0], [0], [1], [0, 0, 1, 1], [], []>} : vector<8x256xf32>, vector<256x64xf32>, vector<8x64xf32> -> vector<8x64xf32>
    %61 = arith.addf %56, %60 : vector<8x64xf32>
    %62 = vector.extract_strided_slice %7 {offsets = [88, 0], sizes = [8, 256], strides = [1, 1]} : vector<200x256xf32> to vector<8x256xf32>
    %c11 = arith.constant 11 : index
    %c0_40 = arith.constant 0 : index
    %c0_41 = arith.constant 0 : index
    %63 = vector.load %arg4[%c11, %c0_40, %c0_41] : memref<25x256x64xf32, #tpu.memory_space<vmem>>, vector<1x256x64xf32>
    %64 = vector.shape_cast %63 : vector<1x256x64xf32> to vector<256x64xf32>
    %cst_42 = arith.constant dense<0.000000e+00> : vector<8x64xf32>
    %65 = tpu.matmul %62, %64, %cst_42 {dimension_numbers = #tpu.dot_dimension_numbers<[1], [0], [0], [1], [0, 0, 1, 1], [], []>} : vector<8x256xf32>, vector<256x64xf32>, vector<8x64xf32> -> vector<8x64xf32>
    %66 = arith.addf %61, %65 : vector<8x64xf32>
    %67 = vector.extract_strided_slice %7 {offsets = [96, 0], sizes = [8, 256], strides = [1, 1]} : vector<200x256xf32> to vector<8x256xf32>
    %c12 = arith.constant 12 : index
    %c0_43 = arith.constant 0 : index
    %c0_44 = arith.constant 0 : index
    %68 = vector.load %arg4[%c12, %c0_43, %c0_44] : memref<25x256x64xf32, #tpu.memory_space<vmem>>, vector<1x256x64xf32>
    %69 = vector.shape_cast %68 : vector<1x256x64xf32> to vector<256x64xf32>
    %cst_45 = arith.constant dense<0.000000e+00> : vector<8x64xf32>
    %70 = tpu.matmul %67, %69, %cst_45 {dimension_numbers = #tpu.dot_dimension_numbers<[1], [0], [0], [1], [0, 0, 1, 1], [], []>} : vector<8x256xf32>, vector<256x64xf32>, vector<8x64xf32> -> vector<8x64xf32>
    %71 = arith.addf %66, %70 : vector<8x64xf32>
    %72 = vector.extract_strided_slice %7 {offsets = [104, 0], sizes = [8, 256], strides = [1, 1]} : vector<200x256xf32> to vector<8x256xf32>
    %c13 = arith.constant 13 : index
    %c0_46 = arith.constant 0 : index
    %c0_47 = arith.constant 0 : index
    %73 = vector.load %arg4[%c13, %c0_46, %c0_47] : memref<25x256x64xf32, #tpu.memory_space<vmem>>, vector<1x256x64xf32>
    %74 = vector.shape_cast %73 : vector<1x256x64xf32> to vector<256x64xf32>
    %cst_48 = arith.constant dense<0.000000e+00> : vector<8x64xf32>
    %75 = tpu.matmul %72, %74, %cst_48 {dimension_numbers = #tpu.dot_dimension_numbers<[1], [0], [0], [1], [0, 0, 1, 1], [], []>} : vector<8x256xf32>, vector<256x64xf32>, vector<8x64xf32> -> vector<8x64xf32>
    %76 = arith.addf %71, %75 : vector<8x64xf32>
    %77 = vector.extract_strided_slice %7 {offsets = [112, 0], sizes = [8, 256], strides = [1, 1]} : vector<200x256xf32> to vector<8x256xf32>
    %c14 = arith.constant 14 : index
    %c0_49 = arith.constant 0 : index
    %c0_50 = arith.constant 0 : index
    %78 = vector.load %arg4[%c14, %c0_49, %c0_50] : memref<25x256x64xf32, #tpu.memory_space<vmem>>, vector<1x256x64xf32>
    %79 = vector.shape_cast %78 : vector<1x256x64xf32> to vector<256x64xf32>
    %cst_51 = arith.constant dense<0.000000e+00> : vector<8x64xf32>
    %80 = tpu.matmul %77, %79, %cst_51 {dimension_numbers = #tpu.dot_dimension_numbers<[1], [0], [0], [1], [0, 0, 1, 1], [], []>} : vector<8x256xf32>, vector<256x64xf32>, vector<8x64xf32> -> vector<8x64xf32>
    %81 = arith.addf %76, %80 : vector<8x64xf32>
    %82 = vector.extract_strided_slice %7 {offsets = [120, 0], sizes = [8, 256], strides = [1, 1]} : vector<200x256xf32> to vector<8x256xf32>
    %c15 = arith.constant 15 : index
    %c0_52 = arith.constant 0 : index
    %c0_53 = arith.constant 0 : index
    %83 = vector.load %arg4[%c15, %c0_52, %c0_53] : memref<25x256x64xf32, #tpu.memory_space<vmem>>, vector<1x256x64xf32>
    %84 = vector.shape_cast %83 : vector<1x256x64xf32> to vector<256x64xf32>
    %cst_54 = arith.constant dense<0.000000e+00> : vector<8x64xf32>
    %85 = tpu.matmul %82, %84, %cst_54 {dimension_numbers = #tpu.dot_dimension_numbers<[1], [0], [0], [1], [0, 0, 1, 1], [], []>} : vector<8x256xf32>, vector<256x64xf32>, vector<8x64xf32> -> vector<8x64xf32>
    %86 = arith.addf %81, %85 : vector<8x64xf32>
    %87 = vector.extract_strided_slice %7 {offsets = [128, 0], sizes = [8, 256], strides = [1, 1]} : vector<200x256xf32> to vector<8x256xf32>
    %c16 = arith.constant 16 : index
    %c0_55 = arith.constant 0 : index
    %c0_56 = arith.constant 0 : index
    %88 = vector.load %arg4[%c16, %c0_55, %c0_56] : memref<25x256x64xf32, #tpu.memory_space<vmem>>, vector<1x256x64xf32>
    %89 = vector.shape_cast %88 : vector<1x256x64xf32> to vector<256x64xf32>
    %cst_57 = arith.constant dense<0.000000e+00> : vector<8x64xf32>
    %90 = tpu.matmul %87, %89, %cst_57 {dimension_numbers = #tpu.dot_dimension_numbers<[1], [0], [0], [1], [0, 0, 1, 1], [], []>} : vector<8x256xf32>, vector<256x64xf32>, vector<8x64xf32> -> vector<8x64xf32>
    %91 = arith.addf %86, %90 : vector<8x64xf32>
    %92 = vector.extract_strided_slice %7 {offsets = [136, 0], sizes = [8, 256], strides = [1, 1]} : vector<200x256xf32> to vector<8x256xf32>
    %c17 = arith.constant 17 : index
    %c0_58 = arith.constant 0 : index
    %c0_59 = arith.constant 0 : index
    %93 = vector.load %arg4[%c17, %c0_58, %c0_59] : memref<25x256x64xf32, #tpu.memory_space<vmem>>, vector<1x256x64xf32>
    %94 = vector.shape_cast %93 : vector<1x256x64xf32> to vector<256x64xf32>
    %cst_60 = arith.constant dense<0.000000e+00> : vector<8x64xf32>
    %95 = tpu.matmul %92, %94, %cst_60 {dimension_numbers = #tpu.dot_dimension_numbers<[1], [0], [0], [1], [0, 0, 1, 1], [], []>} : vector<8x256xf32>, vector<256x64xf32>, vector<8x64xf32> -> vector<8x64xf32>
    %96 = arith.addf %91, %95 : vector<8x64xf32>
    %97 = vector.extract_strided_slice %7 {offsets = [144, 0], sizes = [8, 256], strides = [1, 1]} : vector<200x256xf32> to vector<8x256xf32>
    %c18 = arith.constant 18 : index
    %c0_61 = arith.constant 0 : index
    %c0_62 = arith.constant 0 : index
    %98 = vector.load %arg4[%c18, %c0_61, %c0_62] : memref<25x256x64xf32, #tpu.memory_space<vmem>>, vector<1x256x64xf32>
    %99 = vector.shape_cast %98 : vector<1x256x64xf32> to vector<256x64xf32>
    %cst_63 = arith.constant dense<0.000000e+00> : vector<8x64xf32>
    %100 = tpu.matmul %97, %99, %cst_63 {dimension_numbers = #tpu.dot_dimension_numbers<[1], [0], [0], [1], [0, 0, 1, 1], [], []>} : vector<8x256xf32>, vector<256x64xf32>, vector<8x64xf32> -> vector<8x64xf32>
    %101 = arith.addf %96, %100 : vector<8x64xf32>
    %102 = vector.extract_strided_slice %7 {offsets = [152, 0], sizes = [8, 256], strides = [1, 1]} : vector<200x256xf32> to vector<8x256xf32>
    %c19 = arith.constant 19 : index
    %c0_64 = arith.constant 0 : index
    %c0_65 = arith.constant 0 : index
    %103 = vector.load %arg4[%c19, %c0_64, %c0_65] : memref<25x256x64xf32, #tpu.memory_space<vmem>>, vector<1x256x64xf32>
    %104 = vector.shape_cast %103 : vector<1x256x64xf32> to vector<256x64xf32>
    %cst_66 = arith.constant dense<0.000000e+00> : vector<8x64xf32>
    %105 = tpu.matmul %102, %104, %cst_66 {dimension_numbers = #tpu.dot_dimension_numbers<[1], [0], [0], [1], [0, 0, 1, 1], [], []>} : vector<8x256xf32>, vector<256x64xf32>, vector<8x64xf32> -> vector<8x64xf32>
    %106 = arith.addf %101, %105 : vector<8x64xf32>
    %107 = vector.extract_strided_slice %7 {offsets = [160, 0], sizes = [8, 256], strides = [1, 1]} : vector<200x256xf32> to vector<8x256xf32>
    %c20 = arith.constant 20 : index
    %c0_67 = arith.constant 0 : index
    %c0_68 = arith.constant 0 : index
    %108 = vector.load %arg4[%c20, %c0_67, %c0_68] : memref<25x256x64xf32, #tpu.memory_space<vmem>>, vector<1x256x64xf32>
    %109 = vector.shape_cast %108 : vector<1x256x64xf32> to vector<256x64xf32>
    %cst_69 = arith.constant dense<0.000000e+00> : vector<8x64xf32>
    %110 = tpu.matmul %107, %109, %cst_69 {dimension_numbers = #tpu.dot_dimension_numbers<[1], [0], [0], [1], [0, 0, 1, 1], [], []>} : vector<8x256xf32>, vector<256x64xf32>, vector<8x64xf32> -> vector<8x64xf32>
    %111 = arith.addf %106, %110 : vector<8x64xf32>
    %112 = vector.extract_strided_slice %7 {offsets = [168, 0], sizes = [8, 256], strides = [1, 1]} : vector<200x256xf32> to vector<8x256xf32>
    %c21 = arith.constant 21 : index
    %c0_70 = arith.constant 0 : index
    %c0_71 = arith.constant 0 : index
    %113 = vector.load %arg4[%c21, %c0_70, %c0_71] : memref<25x256x64xf32, #tpu.memory_space<vmem>>, vector<1x256x64xf32>
    %114 = vector.shape_cast %113 : vector<1x256x64xf32> to vector<256x64xf32>
    %cst_72 = arith.constant dense<0.000000e+00> : vector<8x64xf32>
    %115 = tpu.matmul %112, %114, %cst_72 {dimension_numbers = #tpu.dot_dimension_numbers<[1], [0], [0], [1], [0, 0, 1, 1], [], []>} : vector<8x256xf32>, vector<256x64xf32>, vector<8x64xf32> -> vector<8x64xf32>
    %116 = arith.addf %111, %115 : vector<8x64xf32>
    %117 = vector.extract_strided_slice %7 {offsets = [176, 0], sizes = [8, 256], strides = [1, 1]} : vector<200x256xf32> to vector<8x256xf32>
    %c22 = arith.constant 22 : index
    %c0_73 = arith.constant 0 : index
    %c0_74 = arith.constant 0 : index
    %118 = vector.load %arg4[%c22, %c0_73, %c0_74] : memref<25x256x64xf32, #tpu.memory_space<vmem>>, vector<1x256x64xf32>
    %119 = vector.shape_cast %118 : vector<1x256x64xf32> to vector<256x64xf32>
    %cst_75 = arith.constant dense<0.000000e+00> : vector<8x64xf32>
    %120 = tpu.matmul %117, %119, %cst_75 {dimension_numbers = #tpu.dot_dimension_numbers<[1], [0], [0], [1], [0, 0, 1, 1], [], []>} : vector<8x256xf32>, vector<256x64xf32>, vector<8x64xf32> -> vector<8x64xf32>
    %121 = arith.addf %116, %120 : vector<8x64xf32>
    %122 = vector.extract_strided_slice %7 {offsets = [184, 0], sizes = [8, 256], strides = [1, 1]} : vector<200x256xf32> to vector<8x256xf32>
    %c23 = arith.constant 23 : index
    %c0_76 = arith.constant 0 : index
    %c0_77 = arith.constant 0 : index
    %123 = vector.load %arg4[%c23, %c0_76, %c0_77] : memref<25x256x64xf32, #tpu.memory_space<vmem>>, vector<1x256x64xf32>
    %124 = vector.shape_cast %123 : vector<1x256x64xf32> to vector<256x64xf32>
    %cst_78 = arith.constant dense<0.000000e+00> : vector<8x64xf32>
    %125 = tpu.matmul %122, %124, %cst_78 {dimension_numbers = #tpu.dot_dimension_numbers<[1], [0], [0], [1], [0, 0, 1, 1], [], []>} : vector<8x256xf32>, vector<256x64xf32>, vector<8x64xf32> -> vector<8x64xf32>
    %126 = arith.addf %121, %125 : vector<8x64xf32>
    %127 = vector.extract_strided_slice %7 {offsets = [192, 0], sizes = [8, 256], strides = [1, 1]} : vector<200x256xf32> to vector<8x256xf32>
    %c24 = arith.constant 24 : index
    %c0_79 = arith.constant 0 : index
    %c0_80 = arith.constant 0 : index
    %128 = vector.load %arg4[%c24, %c0_79, %c0_80] : memref<25x256x64xf32, #tpu.memory_space<vmem>>, vector<1x256x64xf32>
    %129 = vector.shape_cast %128 : vector<1x256x64xf32> to vector<256x64xf32>
    %cst_81 = arith.constant dense<0.000000e+00> : vector<8x64xf32>
    %130 = tpu.matmul %127, %129, %cst_81 {dimension_numbers = #tpu.dot_dimension_numbers<[1], [0], [0], [1], [0, 0, 1, 1], [], []>} : vector<8x256xf32>, vector<256x64xf32>, vector<8x64xf32> -> vector<8x64xf32>
    %131 = arith.addf %126, %130 : vector<8x64xf32>
    %c0_82 = arith.constant 0 : index
    %c0_83 = arith.constant 0 : index
    %132 = vector.load %arg3[%c0_82, %c0_83] : memref<8x1xf32, #tpu.memory_space<vmem>>, vector<8x1xf32>
    %133 = vector.broadcast %132 : vector<8x1xf32> to vector<8x64xf32>
    %134 = arith.addf %131, %133 : vector<8x64xf32>
    %cst_84 = arith.constant 0.000000e+00 : f32
    %135 = vector.broadcast %cst_84 : f32 to vector<8x64xf32>
    %136 = arith.cmpf oge, %134, %135 : vector<8x64xf32>
    %cst_85 = arith.constant 0.00999999977 : f32
    %137 = vector.broadcast %cst_85 : f32 to vector<8x64xf32>
    %138 = arith.mulf %134, %137 : vector<8x64xf32>
    %139 = arith.select %136, %134, %138 : vector<8x64xi1>, vector<8x64xf32>
    %c0_86 = arith.constant 0 : index
    %c0_87 = arith.constant 0 : index
    %140 = vector.load %arg5[%c0_86, %c0_87] : memref<144x8xf32, #tpu.memory_space<vmem>>, vector<144x8xf32>
    %cst_88 = arith.constant dense<0.000000e+00> : vector<144x64xf32>
    %141 = tpu.matmul %140, %139, %cst_88 {dimension_numbers = #tpu.dot_dimension_numbers<[1], [0], [0], [1], [0, 0, 1, 1], [], []>} : vector<144x8xf32>, vector<8x64xf32>, vector<144x64xf32> -> vector<144x64xf32>
    %142 = vector.extract_strided_slice %141 {offsets = [0, 0], sizes = [16, 64], strides = [1, 1]} : vector<144x64xf32> to vector<16x64xf32>
    %c0_89 = arith.constant 0 : index
    %c0_90 = arith.constant 0 : index
    %c0_91 = arith.constant 0 : index
    %143 = vector.load %arg7[%c0_89, %c0_90, %c0_91] : memref<9x64x16xf32, #tpu.memory_space<vmem>>, vector<1x64x16xf32>
    %144 = vector.shape_cast %143 : vector<1x64x16xf32> to vector<64x16xf32>
    %cst_92 = arith.constant dense<0.000000e+00> : vector<16x16xf32>
    %145 = tpu.matmul %142, %144, %cst_92 {dimension_numbers = #tpu.dot_dimension_numbers<[1], [0], [0], [1], [0, 0, 1, 1], [], []>} : vector<16x64xf32>, vector<64x16xf32>, vector<16x16xf32> -> vector<16x16xf32>
    %146 = vector.extract_strided_slice %141 {offsets = [16, 0], sizes = [16, 64], strides = [1, 1]} : vector<144x64xf32> to vector<16x64xf32>
    %c1_93 = arith.constant 1 : index
    %c0_94 = arith.constant 0 : index
    %c0_95 = arith.constant 0 : index
    %147 = vector.load %arg7[%c1_93, %c0_94, %c0_95] : memref<9x64x16xf32, #tpu.memory_space<vmem>>, vector<1x64x16xf32>
    %148 = vector.shape_cast %147 : vector<1x64x16xf32> to vector<64x16xf32>
    %cst_96 = arith.constant dense<0.000000e+00> : vector<16x16xf32>
    %149 = tpu.matmul %146, %148, %cst_96 {dimension_numbers = #tpu.dot_dimension_numbers<[1], [0], [0], [1], [0, 0, 1, 1], [], []>} : vector<16x64xf32>, vector<64x16xf32>, vector<16x16xf32> -> vector<16x16xf32>
    %150 = arith.addf %145, %149 : vector<16x16xf32>
    %151 = vector.extract_strided_slice %141 {offsets = [32, 0], sizes = [16, 64], strides = [1, 1]} : vector<144x64xf32> to vector<16x64xf32>
    %c2_97 = arith.constant 2 : index
    %c0_98 = arith.constant 0 : index
    %c0_99 = arith.constant 0 : index
    %152 = vector.load %arg7[%c2_97, %c0_98, %c0_99] : memref<9x64x16xf32, #tpu.memory_space<vmem>>, vector<1x64x16xf32>
    %153 = vector.shape_cast %152 : vector<1x64x16xf32> to vector<64x16xf32>
    %cst_100 = arith.constant dense<0.000000e+00> : vector<16x16xf32>
    %154 = tpu.matmul %151, %153, %cst_100 {dimension_numbers = #tpu.dot_dimension_numbers<[1], [0], [0], [1], [0, 0, 1, 1], [], []>} : vector<16x64xf32>, vector<64x16xf32>, vector<16x16xf32> -> vector<16x16xf32>
    %155 = arith.addf %150, %154 : vector<16x16xf32>
    %156 = vector.extract_strided_slice %141 {offsets = [48, 0], sizes = [16, 64], strides = [1, 1]} : vector<144x64xf32> to vector<16x64xf32>
    %c3_101 = arith.constant 3 : index
    %c0_102 = arith.constant 0 : index
    %c0_103 = arith.constant 0 : index
    %157 = vector.load %arg7[%c3_101, %c0_102, %c0_103] : memref<9x64x16xf32, #tpu.memory_space<vmem>>, vector<1x64x16xf32>
    %158 = vector.shape_cast %157 : vector<1x64x16xf32> to vector<64x16xf32>
    %cst_104 = arith.constant dense<0.000000e+00> : vector<16x16xf32>
    %159 = tpu.matmul %156, %158, %cst_104 {dimension_numbers = #tpu.dot_dimension_numbers<[1], [0], [0], [1], [0, 0, 1, 1], [], []>} : vector<16x64xf32>, vector<64x16xf32>, vector<16x16xf32> -> vector<16x16xf32>
    %160 = arith.addf %155, %159 : vector<16x16xf32>
    %161 = vector.extract_strided_slice %141 {offsets = [64, 0], sizes = [16, 64], strides = [1, 1]} : vector<144x64xf32> to vector<16x64xf32>
    %c4_105 = arith.constant 4 : index
    %c0_106 = arith.constant 0 : index
    %c0_107 = arith.constant 0 : index
    %162 = vector.load %arg7[%c4_105, %c0_106, %c0_107] : memref<9x64x16xf32, #tpu.memory_space<vmem>>, vector<1x64x16xf32>
    %163 = vector.shape_cast %162 : vector<1x64x16xf32> to vector<64x16xf32>
    %cst_108 = arith.constant dense<0.000000e+00> : vector<16x16xf32>
    %164 = tpu.matmul %161, %163, %cst_108 {dimension_numbers = #tpu.dot_dimension_numbers<[1], [0], [0], [1], [0, 0, 1, 1], [], []>} : vector<16x64xf32>, vector<64x16xf32>, vector<16x16xf32> -> vector<16x16xf32>
    %165 = arith.addf %160, %164 : vector<16x16xf32>
    %166 = vector.extract_strided_slice %141 {offsets = [80, 0], sizes = [16, 64], strides = [1, 1]} : vector<144x64xf32> to vector<16x64xf32>
    %c5_109 = arith.constant 5 : index
    %c0_110 = arith.constant 0 : index
    %c0_111 = arith.constant 0 : index
    %167 = vector.load %arg7[%c5_109, %c0_110, %c0_111] : memref<9x64x16xf32, #tpu.memory_space<vmem>>, vector<1x64x16xf32>
    %168 = vector.shape_cast %167 : vector<1x64x16xf32> to vector<64x16xf32>
    %cst_112 = arith.constant dense<0.000000e+00> : vector<16x16xf32>
    %169 = tpu.matmul %166, %168, %cst_112 {dimension_numbers = #tpu.dot_dimension_numbers<[1], [0], [0], [1], [0, 0, 1, 1], [], []>} : vector<16x64xf32>, vector<64x16xf32>, vector<16x16xf32> -> vector<16x16xf32>
    %170 = arith.addf %165, %169 : vector<16x16xf32>
    %171 = vector.extract_strided_slice %141 {offsets = [96, 0], sizes = [16, 64], strides = [1, 1]} : vector<144x64xf32> to vector<16x64xf32>
    %c6_113 = arith.constant 6 : index
    %c0_114 = arith.constant 0 : index
    %c0_115 = arith.constant 0 : index
    %172 = vector.load %arg7[%c6_113, %c0_114, %c0_115] : memref<9x64x16xf32, #tpu.memory_space<vmem>>, vector<1x64x16xf32>
    %173 = vector.shape_cast %172 : vector<1x64x16xf32> to vector<64x16xf32>
    %cst_116 = arith.constant dense<0.000000e+00> : vector<16x16xf32>
    %174 = tpu.matmul %171, %173, %cst_116 {dimension_numbers = #tpu.dot_dimension_numbers<[1], [0], [0], [1], [0, 0, 1, 1], [], []>} : vector<16x64xf32>, vector<64x16xf32>, vector<16x16xf32> -> vector<16x16xf32>
    %175 = arith.addf %170, %174 : vector<16x16xf32>
    %176 = vector.extract_strided_slice %141 {offsets = [112, 0], sizes = [16, 64], strides = [1, 1]} : vector<144x64xf32> to vector<16x64xf32>
    %c7_117 = arith.constant 7 : index
    %c0_118 = arith.constant 0 : index
    %c0_119 = arith.constant 0 : index
    %177 = vector.load %arg7[%c7_117, %c0_118, %c0_119] : memref<9x64x16xf32, #tpu.memory_space<vmem>>, vector<1x64x16xf32>
    %178 = vector.shape_cast %177 : vector<1x64x16xf32> to vector<64x16xf32>
    %cst_120 = arith.constant dense<0.000000e+00> : vector<16x16xf32>
    %179 = tpu.matmul %176, %178, %cst_120 {dimension_numbers = #tpu.dot_dimension_numbers<[1], [0], [0], [1], [0, 0, 1, 1], [], []>} : vector<16x64xf32>, vector<64x16xf32>, vector<16x16xf32> -> vector<16x16xf32>
    %180 = arith.addf %175, %179 : vector<16x16xf32>
    %181 = vector.extract_strided_slice %141 {offsets = [128, 0], sizes = [16, 64], strides = [1, 1]} : vector<144x64xf32> to vector<16x64xf32>
    %c8_121 = arith.constant 8 : index
    %c0_122 = arith.constant 0 : index
    %c0_123 = arith.constant 0 : index
    %182 = vector.load %arg7[%c8_121, %c0_122, %c0_123] : memref<9x64x16xf32, #tpu.memory_space<vmem>>, vector<1x64x16xf32>
    %183 = vector.shape_cast %182 : vector<1x64x16xf32> to vector<64x16xf32>
    %cst_124 = arith.constant dense<0.000000e+00> : vector<16x16xf32>
    %184 = tpu.matmul %181, %183, %cst_124 {dimension_numbers = #tpu.dot_dimension_numbers<[1], [0], [0], [1], [0, 0, 1, 1], [], []>} : vector<16x64xf32>, vector<64x16xf32>, vector<16x16xf32> -> vector<16x16xf32>
    %185 = arith.addf %180, %184 : vector<16x16xf32>
    %c0_125 = arith.constant 0 : index
    %c0_126 = arith.constant 0 : index
    %186 = vector.load %arg6[%c0_125, %c0_126] : memref<16x1xf32, #tpu.memory_space<vmem>>, vector<16x1xf32>
    %187 = vector.broadcast %186 : vector<16x1xf32> to vector<16x16xf32>
    %188 = arith.addf %185, %187 : vector<16x16xf32>
    %cst_127 = arith.constant 0.000000e+00 : f32
    %189 = vector.broadcast %cst_127 : f32 to vector<16x16xf32>
    %190 = arith.cmpf oge, %188, %189 : vector<16x16xf32>
    %cst_128 = arith.constant 0.00999999977 : f32
    %191 = vector.broadcast %cst_128 : f32 to vector<16x16xf32>
    %192 = arith.mulf %188, %191 : vector<16x16xf32>
    %193 = arith.select %190, %188, %192 : vector<16x16xi1>, vector<16x16xf32>
    %c0_129 = arith.constant 0 : index
    %c0_130 = arith.constant 0 : index
    %194 = vector.load %arg8[%c0_129, %c0_130] : memref<144x16xf32, #tpu.memory_space<vmem>>, vector<144x16xf32>
    %cst_131 = arith.constant dense<0.000000e+00> : vector<144x16xf32>
    %195 = tpu.matmul %194, %193, %cst_131 {dimension_numbers = #tpu.dot_dimension_numbers<[1], [0], [0], [1], [0, 0, 1, 1], [], []>} : vector<144x16xf32>, vector<16x16xf32>, vector<144x16xf32> -> vector<144x16xf32>
    %196 = vector.extract_strided_slice %195 {offsets = [0, 0], sizes = [16, 16], strides = [1, 1]} : vector<144x16xf32> to vector<16x16xf32>
    %c0_132 = arith.constant 0 : index
    %c0_133 = arith.constant 0 : index
    %c0_134 = arith.constant 0 : index
    %197 = vector.load %arg10[%c0_132, %c0_133, %c0_134] : memref<9x16x16xf32, #tpu.memory_space<vmem>>, vector<1x16x16xf32>
    %198 = vector.shape_cast %197 : vector<1x16x16xf32> to vector<16x16xf32>
    %cst_135 = arith.constant dense<0.000000e+00> : vector<16x16xf32>
    %199 = tpu.matmul %196, %198, %cst_135 {dimension_numbers = #tpu.dot_dimension_numbers<[1], [0], [0], [1], [0, 0, 1, 1], [], []>} : vector<16x16xf32>, vector<16x16xf32>, vector<16x16xf32> -> vector<16x16xf32>
    %200 = vector.extract_strided_slice %195 {offsets = [16, 0], sizes = [16, 16], strides = [1, 1]} : vector<144x16xf32> to vector<16x16xf32>
    %c1_136 = arith.constant 1 : index
    %c0_137 = arith.constant 0 : index
    %c0_138 = arith.constant 0 : index
    %201 = vector.load %arg10[%c1_136, %c0_137, %c0_138] : memref<9x16x16xf32, #tpu.memory_space<vmem>>, vector<1x16x16xf32>
    %202 = vector.shape_cast %201 : vector<1x16x16xf32> to vector<16x16xf32>
    %cst_139 = arith.constant dense<0.000000e+00> : vector<16x16xf32>
    %203 = tpu.matmul %200, %202, %cst_139 {dimension_numbers = #tpu.dot_dimension_numbers<[1], [0], [0], [1], [0, 0, 1, 1], [], []>} : vector<16x16xf32>, vector<16x16xf32>, vector<16x16xf32> -> vector<16x16xf32>
    %204 = arith.addf %199, %203 : vector<16x16xf32>
    %205 = vector.extract_strided_slice %195 {offsets = [32, 0], sizes = [16, 16], strides = [1, 1]} : vector<144x16xf32> to vector<16x16xf32>
    %c2_140 = arith.constant 2 : index
    %c0_141 = arith.constant 0 : index
    %c0_142 = arith.constant 0 : index
    %206 = vector.load %arg10[%c2_140, %c0_141, %c0_142] : memref<9x16x16xf32, #tpu.memory_space<vmem>>, vector<1x16x16xf32>
    %207 = vector.shape_cast %206 : vector<1x16x16xf32> to vector<16x16xf32>
    %cst_143 = arith.constant dense<0.000000e+00> : vector<16x16xf32>
    %208 = tpu.matmul %205, %207, %cst_143 {dimension_numbers = #tpu.dot_dimension_numbers<[1], [0], [0], [1], [0, 0, 1, 1], [], []>} : vector<16x16xf32>, vector<16x16xf32>, vector<16x16xf32> -> vector<16x16xf32>
    %209 = arith.addf %204, %208 : vector<16x16xf32>
    %210 = vector.extract_strided_slice %195 {offsets = [48, 0], sizes = [16, 16], strides = [1, 1]} : vector<144x16xf32> to vector<16x16xf32>
    %c3_144 = arith.constant 3 : index
    %c0_145 = arith.constant 0 : index
    %c0_146 = arith.constant 0 : index
    %211 = vector.load %arg10[%c3_144, %c0_145, %c0_146] : memref<9x16x16xf32, #tpu.memory_space<vmem>>, vector<1x16x16xf32>
    %212 = vector.shape_cast %211 : vector<1x16x16xf32> to vector<16x16xf32>
    %cst_147 = arith.constant dense<0.000000e+00> : vector<16x16xf32>
    %213 = tpu.matmul %210, %212, %cst_147 {dimension_numbers = #tpu.dot_dimension_numbers<[1], [0], [0], [1], [0, 0, 1, 1], [], []>} : vector<16x16xf32>, vector<16x16xf32>, vector<16x16xf32> -> vector<16x16xf32>
    %214 = arith.addf %209, %213 : vector<16x16xf32>
    %215 = vector.extract_strided_slice %195 {offsets = [64, 0], sizes = [16, 16], strides = [1, 1]} : vector<144x16xf32> to vector<16x16xf32>
    %c4_148 = arith.constant 4 : index
    %c0_149 = arith.constant 0 : index
    %c0_150 = arith.constant 0 : index
    %216 = vector.load %arg10[%c4_148, %c0_149, %c0_150] : memref<9x16x16xf32, #tpu.memory_space<vmem>>, vector<1x16x16xf32>
    %217 = vector.shape_cast %216 : vector<1x16x16xf32> to vector<16x16xf32>
    %cst_151 = arith.constant dense<0.000000e+00> : vector<16x16xf32>
    %218 = tpu.matmul %215, %217, %cst_151 {dimension_numbers = #tpu.dot_dimension_numbers<[1], [0], [0], [1], [0, 0, 1, 1], [], []>} : vector<16x16xf32>, vector<16x16xf32>, vector<16x16xf32> -> vector<16x16xf32>
    %219 = arith.addf %214, %218 : vector<16x16xf32>
    %220 = vector.extract_strided_slice %195 {offsets = [80, 0], sizes = [16, 16], strides = [1, 1]} : vector<144x16xf32> to vector<16x16xf32>
    %c5_152 = arith.constant 5 : index
    %c0_153 = arith.constant 0 : index
    %c0_154 = arith.constant 0 : index
    %221 = vector.load %arg10[%c5_152, %c0_153, %c0_154] : memref<9x16x16xf32, #tpu.memory_space<vmem>>, vector<1x16x16xf32>
    %222 = vector.shape_cast %221 : vector<1x16x16xf32> to vector<16x16xf32>
    %cst_155 = arith.constant dense<0.000000e+00> : vector<16x16xf32>
    %223 = tpu.matmul %220, %222, %cst_155 {dimension_numbers = #tpu.dot_dimension_numbers<[1], [0], [0], [1], [0, 0, 1, 1], [], []>} : vector<16x16xf32>, vector<16x16xf32>, vector<16x16xf32> -> vector<16x16xf32>
    %224 = arith.addf %219, %223 : vector<16x16xf32>
    %225 = vector.extract_strided_slice %195 {offsets = [96, 0], sizes = [16, 16], strides = [1, 1]} : vector<144x16xf32> to vector<16x16xf32>
    %c6_156 = arith.constant 6 : index
    %c0_157 = arith.constant 0 : index
    %c0_158 = arith.constant 0 : index
    %226 = vector.load %arg10[%c6_156, %c0_157, %c0_158] : memref<9x16x16xf32, #tpu.memory_space<vmem>>, vector<1x16x16xf32>
    %227 = vector.shape_cast %226 : vector<1x16x16xf32> to vector<16x16xf32>
    %cst_159 = arith.constant dense<0.000000e+00> : vector<16x16xf32>
    %228 = tpu.matmul %225, %227, %cst_159 {dimension_numbers = #tpu.dot_dimension_numbers<[1], [0], [0], [1], [0, 0, 1, 1], [], []>} : vector<16x16xf32>, vector<16x16xf32>, vector<16x16xf32> -> vector<16x16xf32>
    %229 = arith.addf %224, %228 : vector<16x16xf32>
    %230 = vector.extract_strided_slice %195 {offsets = [112, 0], sizes = [16, 16], strides = [1, 1]} : vector<144x16xf32> to vector<16x16xf32>
    %c7_160 = arith.constant 7 : index
    %c0_161 = arith.constant 0 : index
    %c0_162 = arith.constant 0 : index
    %231 = vector.load %arg10[%c7_160, %c0_161, %c0_162] : memref<9x16x16xf32, #tpu.memory_space<vmem>>, vector<1x16x16xf32>
    %232 = vector.shape_cast %231 : vector<1x16x16xf32> to vector<16x16xf32>
    %cst_163 = arith.constant dense<0.000000e+00> : vector<16x16xf32>
    %233 = tpu.matmul %230, %232, %cst_163 {dimension_numbers = #tpu.dot_dimension_numbers<[1], [0], [0], [1], [0, 0, 1, 1], [], []>} : vector<16x16xf32>, vector<16x16xf32>, vector<16x16xf32> -> vector<16x16xf32>
    %234 = arith.addf %229, %233 : vector<16x16xf32>
    %235 = vector.extract_strided_slice %195 {offsets = [128, 0], sizes = [16, 16], strides = [1, 1]} : vector<144x16xf32> to vector<16x16xf32>
    %c8_164 = arith.constant 8 : index
    %c0_165 = arith.constant 0 : index
    %c0_166 = arith.constant 0 : index
    %236 = vector.load %arg10[%c8_164, %c0_165, %c0_166] : memref<9x16x16xf32, #tpu.memory_space<vmem>>, vector<1x16x16xf32>
    %237 = vector.shape_cast %236 : vector<1x16x16xf32> to vector<16x16xf32>
    %cst_167 = arith.constant dense<0.000000e+00> : vector<16x16xf32>
    %238 = tpu.matmul %235, %237, %cst_167 {dimension_numbers = #tpu.dot_dimension_numbers<[1], [0], [0], [1], [0, 0, 1, 1], [], []>} : vector<16x16xf32>, vector<16x16xf32>, vector<16x16xf32> -> vector<16x16xf32>
    %239 = arith.addf %234, %238 : vector<16x16xf32>
    %c0_168 = arith.constant 0 : index
    %c0_169 = arith.constant 0 : index
    %240 = vector.load %arg9[%c0_168, %c0_169] : memref<16x1xf32, #tpu.memory_space<vmem>>, vector<16x1xf32>
    %241 = vector.broadcast %240 : vector<16x1xf32> to vector<16x16xf32>
    %242 = arith.addf %239, %241 : vector<16x16xf32>
    %cst_170 = arith.constant 0.000000e+00 : f32
    %243 = vector.broadcast %cst_170 : f32 to vector<16x16xf32>
    %244 = arith.cmpf oge, %242, %243 : vector<16x16xf32>
    %cst_171 = arith.constant 0.00999999977 : f32
    %245 = vector.broadcast %cst_171 : f32 to vector<16x16xf32>
    %246 = arith.mulf %242, %245 : vector<16x16xf32>
    %247 = arith.select %244, %242, %246 : vector<16x16xi1>, vector<16x16xf32>
    %c0_172 = arith.constant 0 : index
    %c0_173 = arith.constant 0 : index
    %c0_174 = arith.constant 0 : index
    %248 = vector.load %arg17[%c0_172, %c0_173, %c0_174] : memref<1x16x16xf32, #tpu.memory_space<vmem>>, vector<1x16x16xf32>
    %249 = vector.shape_cast %248 : vector<1x16x16xf32> to vector<16x16xf32>
    %250 = vector.shape_cast %247 : vector<16x16xf32> to vector<1x16x16xf32>
    tpu.vector_store %arg17[%c0_172, %c0_173, %c0_174], %250 {strides = array<i32>} : memref<1x16x16xf32, #tpu.memory_space<vmem>>, vector<1x16x16xf32>,
    %251 = tpu.iota {dimensions = array<i32: 0>} : vector<16x32xi32>
    %cst_175 = arith.constant 0.000000e+00 : f32
    %252 = vector.broadcast %cst_175 : f32 to vector<16x32xf32>
    %c0_176 = arith.constant 0 : index
    %c0_177 = arith.constant 0 : index
    %c0_178 = arith.constant 0 : index
    %253 = vector.load %arg11[%c0_176, %c0_177, %c0_178] : memref<16x16x32xf32, #tpu.memory_space<vmem>>, vector<1x16x32xf32>
    %254 = vector.shape_cast %253 : vector<1x16x32xf32> to vector<16x32xf32>
    %cst_179 = arith.constant dense<0.000000e+00> : vector<16x32xf32>
    %255 = tpu.matmul %247, %254, %cst_179 {dimension_numbers = #tpu.dot_dimension_numbers<[1], [0], [0], [1], [0, 0, 1, 1], [], []>} : vector<16x16xf32>, vector<16x32xf32>, vector<16x32xf32> -> vector<16x32xf32>
    %c0_i32 = arith.constant 0 : i32
    %256 = vector.broadcast %c0_i32 : i32 to vector<16x32xi32>
    %257 = arith.cmpi eq, %251, %256 : vector<16x32xi32>
    %cst_180 = arith.constant 0.000000e+00 : f32
    %258 = vector.broadcast %cst_180 : f32 to vector<16x32xf32>
    %259 = arith.select %257, %255, %258 : vector<16x32xi1>, vector<16x32xf32>
    %260 = arith.addf %252, %259 : vector<16x32xf32>
    %c1_181 = arith.constant 1 : index
    %c0_182 = arith.constant 0 : index
    %c0_183 = arith.constant 0 : index
    %261 = vector.load %arg11[%c1_181, %c0_182, %c0_183] : memref<16x16x32xf32, #tpu.memory_space<vmem>>, vector<1x16x32xf32>
    %262 = vector.shape_cast %261 : vector<1x16x32xf32> to vector<16x32xf32>
    %cst_184 = arith.constant dense<0.000000e+00> : vector<16x32xf32>
    %263 = tpu.matmul %247, %262, %cst_184 {dimension_numbers = #tpu.dot_dimension_numbers<[1], [0], [0], [1], [0, 0, 1, 1], [], []>} : vector<16x16xf32>, vector<16x32xf32>, vector<16x32xf32> -> vector<16x32xf32>
    %c1_i32 = arith.constant 1 : i32
    %264 = vector.broadcast %c1_i32 : i32 to vector<16x32xi32>
    %265 = arith.cmpi eq, %251, %264 : vector<16x32xi32>
    %cst_185 = arith.constant 0.000000e+00 : f32
    %266 = vector.broadcast %cst_185 : f32 to vector<16x32xf32>
    %267 = arith.select %265, %263, %266 : vector<16x32xi1>, vector<16x32xf32>
    %268 = arith.addf %260, %267 : vector<16x32xf32>
    %c2_186 = arith.constant 2 : index
    %c0_187 = arith.constant 0 : index
    %c0_188 = arith.constant 0 : index
    %269 = vector.load %arg11[%c2_186, %c0_187, %c0_188] : memref<16x16x32xf32, #tpu.memory_space<vmem>>, vector<1x16x32xf32>
    %270 = vector.shape_cast %269 : vector<1x16x32xf32> to vector<16x32xf32>
    %cst_189 = arith.constant dense<0.000000e+00> : vector<16x32xf32>
    %271 = tpu.matmul %247, %270, %cst_189 {dimension_numbers = #tpu.dot_dimension_numbers<[1], [0], [0], [1], [0, 0, 1, 1], [], []>} : vector<16x16xf32>, vector<16x32xf32>, vector<16x32xf32> -> vector<16x32xf32>
    %c2_i32 = arith.constant 2 : i32
    %272 = vector.broadcast %c2_i32 : i32 to vector<16x32xi32>
    %273 = arith.cmpi eq, %251, %272 : vector<16x32xi32>
    %cst_190 = arith.constant 0.000000e+00 : f32
    %274 = vector.broadcast %cst_190 : f32 to vector<16x32xf32>
    %275 = arith.select %273, %271, %274 : vector<16x32xi1>, vector<16x32xf32>
    %276 = arith.addf %268, %275 : vector<16x32xf32>
    %c3_191 = arith.constant 3 : index
    %c0_192 = arith.constant 0 : index
    %c0_193 = arith.constant 0 : index
    %277 = vector.load %arg11[%c3_191, %c0_192, %c0_193] : memref<16x16x32xf32, #tpu.memory_space<vmem>>, vector<1x16x32xf32>
    %278 = vector.shape_cast %277 : vector<1x16x32xf32> to vector<16x32xf32>
    %cst_194 = arith.constant dense<0.000000e+00> : vector<16x32xf32>
    %279 = tpu.matmul %247, %278, %cst_194 {dimension_numbers = #tpu.dot_dimension_numbers<[1], [0], [0], [1], [0, 0, 1, 1], [], []>} : vector<16x16xf32>, vector<16x32xf32>, vector<16x32xf32> -> vector<16x32xf32>
    %c3_i32 = arith.constant 3 : i32
    %280 = vector.broadcast %c3_i32 : i32 to vector<16x32xi32>
    %281 = arith.cmpi eq, %251, %280 : vector<16x32xi32>
    %cst_195 = arith.constant 0.000000e+00 : f32
    %282 = vector.broadcast %cst_195 : f32 to vector<16x32xf32>
    %283 = arith.select %281, %279, %282 : vector<16x32xi1>, vector<16x32xf32>
    %284 = arith.addf %276, %283 : vector<16x32xf32>
    %c4_196 = arith.constant 4 : index
    %c0_197 = arith.constant 0 : index
    %c0_198 = arith.constant 0 : index
    %285 = vector.load %arg11[%c4_196, %c0_197, %c0_198] : memref<16x16x32xf32, #tpu.memory_space<vmem>>, vector<1x16x32xf32>
    %286 = vector.shape_cast %285 : vector<1x16x32xf32> to vector<16x32xf32>
    %cst_199 = arith.constant dense<0.000000e+00> : vector<16x32xf32>
    %287 = tpu.matmul %247, %286, %cst_199 {dimension_numbers = #tpu.dot_dimension_numbers<[1], [0], [0], [1], [0, 0, 1, 1], [], []>} : vector<16x16xf32>, vector<16x32xf32>, vector<16x32xf32> -> vector<16x32xf32>
    %c4_i32 = arith.constant 4 : i32
    %288 = vector.broadcast %c4_i32 : i32 to vector<16x32xi32>
    %289 = arith.cmpi eq, %251, %288 : vector<16x32xi32>
    %cst_200 = arith.constant 0.000000e+00 : f32
    %290 = vector.broadcast %cst_200 : f32 to vector<16x32xf32>
    %291 = arith.select %289, %287, %290 : vector<16x32xi1>, vector<16x32xf32>
    %292 = arith.addf %284, %291 : vector<16x32xf32>
    %c5_201 = arith.constant 5 : index
    %c0_202 = arith.constant 0 : index
    %c0_203 = arith.constant 0 : index
    %293 = vector.load %arg11[%c5_201, %c0_202, %c0_203] : memref<16x16x32xf32, #tpu.memory_space<vmem>>, vector<1x16x32xf32>
    %294 = vector.shape_cast %293 : vector<1x16x32xf32> to vector<16x32xf32>
    %cst_204 = arith.constant dense<0.000000e+00> : vector<16x32xf32>
    %295 = tpu.matmul %247, %294, %cst_204 {dimension_numbers = #tpu.dot_dimension_numbers<[1], [0], [0], [1], [0, 0, 1, 1], [], []>} : vector<16x16xf32>, vector<16x32xf32>, vector<16x32xf32> -> vector<16x32xf32>
    %c5_i32 = arith.constant 5 : i32
    %296 = vector.broadcast %c5_i32 : i32 to vector<16x32xi32>
    %297 = arith.cmpi eq, %251, %296 : vector<16x32xi32>
    %cst_205 = arith.constant 0.000000e+00 : f32
    %298 = vector.broadcast %cst_205 : f32 to vector<16x32xf32>
    %299 = arith.select %297, %295, %298 : vector<16x32xi1>, vector<16x32xf32>
    %300 = arith.addf %292, %299 : vector<16x32xf32>
    %c6_206 = arith.constant 6 : index
    %c0_207 = arith.constant 0 : index
    %c0_208 = arith.constant 0 : index
    %301 = vector.load %arg11[%c6_206, %c0_207, %c0_208] : memref<16x16x32xf32, #tpu.memory_space<vmem>>, vector<1x16x32xf32>
    %302 = vector.shape_cast %301 : vector<1x16x32xf32> to vector<16x32xf32>
    %cst_209 = arith.constant dense<0.000000e+00> : vector<16x32xf32>
    %303 = tpu.matmul %247, %302, %cst_209 {dimension_numbers = #tpu.dot_dimension_numbers<[1], [0], [0], [1], [0, 0, 1, 1], [], []>} : vector<16x16xf32>, vector<16x32xf32>, vector<16x32xf32> -> vector<16x32xf32>
    %c6_i32 = arith.constant 6 : i32
    %304 = vector.broadcast %c6_i32 : i32 to vector<16x32xi32>
    %305 = arith.cmpi eq, %251, %304 : vector<16x32xi32>
    %cst_210 = arith.constant 0.000000e+00 : f32
    %306 = vector.broadcast %cst_210 : f32 to vector<16x32xf32>
    %307 = arith.select %305, %303, %306 : vector<16x32xi1>, vector<16x32xf32>
    %308 = arith.addf %300, %307 : vector<16x32xf32>
    %c7_211 = arith.constant 7 : index
    %c0_212 = arith.constant 0 : index
    %c0_213 = arith.constant 0 : index
    %309 = vector.load %arg11[%c7_211, %c0_212, %c0_213] : memref<16x16x32xf32, #tpu.memory_space<vmem>>, vector<1x16x32xf32>
    %310 = vector.shape_cast %309 : vector<1x16x32xf32> to vector<16x32xf32>
    %cst_214 = arith.constant dense<0.000000e+00> : vector<16x32xf32>
    %311 = tpu.matmul %247, %310, %cst_214 {dimension_numbers = #tpu.dot_dimension_numbers<[1], [0], [0], [1], [0, 0, 1, 1], [], []>} : vector<16x16xf32>, vector<16x32xf32>, vector<16x32xf32> -> vector<16x32xf32>
    %c7_i32 = arith.constant 7 : i32
    %312 = vector.broadcast %c7_i32 : i32 to vector<16x32xi32>
    %313 = arith.cmpi eq, %251, %312 : vector<16x32xi32>
    %cst_215 = arith.constant 0.000000e+00 : f32
    %314 = vector.broadcast %cst_215 : f32 to vector<16x32xf32>
    %315 = arith.select %313, %311, %314 : vector<16x32xi1>, vector<16x32xf32>
    %316 = arith.addf %308, %315 : vector<16x32xf32>
    %c8_216 = arith.constant 8 : index
    %c0_217 = arith.constant 0 : index
    %c0_218 = arith.constant 0 : index
    %317 = vector.load %arg11[%c8_216, %c0_217, %c0_218] : memref<16x16x32xf32, #tpu.memory_space<vmem>>, vector<1x16x32xf32>
    %318 = vector.shape_cast %317 : vector<1x16x32xf32> to vector<16x32xf32>
    %cst_219 = arith.constant dense<0.000000e+00> : vector<16x32xf32>
    %319 = tpu.matmul %247, %318, %cst_219 {dimension_numbers = #tpu.dot_dimension_numbers<[1], [0], [0], [1], [0, 0, 1, 1], [], []>} : vector<16x16xf32>, vector<16x32xf32>, vector<16x32xf32> -> vector<16x32xf32>
    %c8_i32 = arith.constant 8 : i32
    %320 = vector.broadcast %c8_i32 : i32 to vector<16x32xi32>
    %321 = arith.cmpi eq, %251, %320 : vector<16x32xi32>
    %cst_220 = arith.constant 0.000000e+00 : f32
    %322 = vector.broadcast %cst_220 : f32 to vector<16x32xf32>
    %323 = arith.select %321, %319, %322 : vector<16x32xi1>, vector<16x32xf32>
    %324 = arith.addf %316, %323 : vector<16x32xf32>
    %c9_221 = arith.constant 9 : index
    %c0_222 = arith.constant 0 : index
    %c0_223 = arith.constant 0 : index
    %325 = vector.load %arg11[%c9_221, %c0_222, %c0_223] : memref<16x16x32xf32, #tpu.memory_space<vmem>>, vector<1x16x32xf32>
    %326 = vector.shape_cast %325 : vector<1x16x32xf32> to vector<16x32xf32>
    %cst_224 = arith.constant dense<0.000000e+00> : vector<16x32xf32>
    %327 = tpu.matmul %247, %326, %cst_224 {dimension_numbers = #tpu.dot_dimension_numbers<[1], [0], [0], [1], [0, 0, 1, 1], [], []>} : vector<16x16xf32>, vector<16x32xf32>, vector<16x32xf32> -> vector<16x32xf32>
    %c9_i32 = arith.constant 9 : i32
    %328 = vector.broadcast %c9_i32 : i32 to vector<16x32xi32>
    %329 = arith.cmpi eq, %251, %328 : vector<16x32xi32>
    %cst_225 = arith.constant 0.000000e+00 : f32
    %330 = vector.broadcast %cst_225 : f32 to vector<16x32xf32>
    %331 = arith.select %329, %327, %330 : vector<16x32xi1>, vector<16x32xf32>
    %332 = arith.addf %324, %331 : vector<16x32xf32>
    %c10_226 = arith.constant 10 : index
    %c0_227 = arith.constant 0 : index
    %c0_228 = arith.constant 0 : index
    %333 = vector.load %arg11[%c10_226, %c0_227, %c0_228] : memref<16x16x32xf32, #tpu.memory_space<vmem>>, vector<1x16x32xf32>
    %334 = vector.shape_cast %333 : vector<1x16x32xf32> to vector<16x32xf32>
    %cst_229 = arith.constant dense<0.000000e+00> : vector<16x32xf32>
    %335 = tpu.matmul %247, %334, %cst_229 {dimension_numbers = #tpu.dot_dimension_numbers<[1], [0], [0], [1], [0, 0, 1, 1], [], []>} : vector<16x16xf32>, vector<16x32xf32>, vector<16x32xf32> -> vector<16x32xf32>
    %c10_i32 = arith.constant 10 : i32
    %336 = vector.broadcast %c10_i32 : i32 to vector<16x32xi32>
    %337 = arith.cmpi eq, %251, %336 : vector<16x32xi32>
    %cst_230 = arith.constant 0.000000e+00 : f32
    %338 = vector.broadcast %cst_230 : f32 to vector<16x32xf32>
    %339 = arith.select %337, %335, %338 : vector<16x32xi1>, vector<16x32xf32>
    %340 = arith.addf %332, %339 : vector<16x32xf32>
    %c11_231 = arith.constant 11 : index
    %c0_232 = arith.constant 0 : index
    %c0_233 = arith.constant 0 : index
    %341 = vector.load %arg11[%c11_231, %c0_232, %c0_233] : memref<16x16x32xf32, #tpu.memory_space<vmem>>, vector<1x16x32xf32>
    %342 = vector.shape_cast %341 : vector<1x16x32xf32> to vector<16x32xf32>
    %cst_234 = arith.constant dense<0.000000e+00> : vector<16x32xf32>
    %343 = tpu.matmul %247, %342, %cst_234 {dimension_numbers = #tpu.dot_dimension_numbers<[1], [0], [0], [1], [0, 0, 1, 1], [], []>} : vector<16x16xf32>, vector<16x32xf32>, vector<16x32xf32> -> vector<16x32xf32>
    %c11_i32 = arith.constant 11 : i32
    %344 = vector.broadcast %c11_i32 : i32 to vector<16x32xi32>
    %345 = arith.cmpi eq, %251, %344 : vector<16x32xi32>
    %cst_235 = arith.constant 0.000000e+00 : f32
    %346 = vector.broadcast %cst_235 : f32 to vector<16x32xf32>
    %347 = arith.select %345, %343, %346 : vector<16x32xi1>, vector<16x32xf32>
    %348 = arith.addf %340, %347 : vector<16x32xf32>
    %c12_236 = arith.constant 12 : index
    %c0_237 = arith.constant 0 : index
    %c0_238 = arith.constant 0 : index
    %349 = vector.load %arg11[%c12_236, %c0_237, %c0_238] : memref<16x16x32xf32, #tpu.memory_space<vmem>>, vector<1x16x32xf32>
    %350 = vector.shape_cast %349 : vector<1x16x32xf32> to vector<16x32xf32>
    %cst_239 = arith.constant dense<0.000000e+00> : vector<16x32xf32>
    %351 = tpu.matmul %247, %350, %cst_239 {dimension_numbers = #tpu.dot_dimension_numbers<[1], [0], [0], [1], [0, 0, 1, 1], [], []>} : vector<16x16xf32>, vector<16x32xf32>, vector<16x32xf32> -> vector<16x32xf32>
    %c12_i32 = arith.constant 12 : i32
    %352 = vector.broadcast %c12_i32 : i32 to vector<16x32xi32>
    %353 = arith.cmpi eq, %251, %352 : vector<16x32xi32>
    %cst_240 = arith.constant 0.000000e+00 : f32
    %354 = vector.broadcast %cst_240 : f32 to vector<16x32xf32>
    %355 = arith.select %353, %351, %354 : vector<16x32xi1>, vector<16x32xf32>
    %356 = arith.addf %348, %355 : vector<16x32xf32>
    %c13_241 = arith.constant 13 : index
    %c0_242 = arith.constant 0 : index
    %c0_243 = arith.constant 0 : index
    %357 = vector.load %arg11[%c13_241, %c0_242, %c0_243] : memref<16x16x32xf32, #tpu.memory_space<vmem>>, vector<1x16x32xf32>
    %358 = vector.shape_cast %357 : vector<1x16x32xf32> to vector<16x32xf32>
    %cst_244 = arith.constant dense<0.000000e+00> : vector<16x32xf32>
    %359 = tpu.matmul %247, %358, %cst_244 {dimension_numbers = #tpu.dot_dimension_numbers<[1], [0], [0], [1], [0, 0, 1, 1], [], []>} : vector<16x16xf32>, vector<16x32xf32>, vector<16x32xf32> -> vector<16x32xf32>
    %c13_i32 = arith.constant 13 : i32
    %360 = vector.broadcast %c13_i32 : i32 to vector<16x32xi32>
    %361 = arith.cmpi eq, %251, %360 : vector<16x32xi32>
    %cst_245 = arith.constant 0.000000e+00 : f32
    %362 = vector.broadcast %cst_245 : f32 to vector<16x32xf32>
    %363 = arith.select %361, %359, %362 : vector<16x32xi1>, vector<16x32xf32>
    %364 = arith.addf %356, %363 : vector<16x32xf32>
    %c14_246 = arith.constant 14 : index
    %c0_247 = arith.constant 0 : index
    %c0_248 = arith.constant 0 : index
    %365 = vector.load %arg11[%c14_246, %c0_247, %c0_248] : memref<16x16x32xf32, #tpu.memory_space<vmem>>, vector<1x16x32xf32>
    %366 = vector.shape_cast %365 : vector<1x16x32xf32> to vector<16x32xf32>
    %cst_249 = arith.constant dense<0.000000e+00> : vector<16x32xf32>
    %367 = tpu.matmul %247, %366, %cst_249 {dimension_numbers = #tpu.dot_dimension_numbers<[1], [0], [0], [1], [0, 0, 1, 1], [], []>} : vector<16x16xf32>, vector<16x32xf32>, vector<16x32xf32> -> vector<16x32xf32>
    %c14_i32 = arith.constant 14 : i32
    %368 = vector.broadcast %c14_i32 : i32 to vector<16x32xi32>
    %369 = arith.cmpi eq, %251, %368 : vector<16x32xi32>
    %cst_250 = arith.constant 0.000000e+00 : f32
    %370 = vector.broadcast %cst_250 : f32 to vector<16x32xf32>
    %371 = arith.select %369, %367, %370 : vector<16x32xi1>, vector<16x32xf32>
    %372 = arith.addf %364, %371 : vector<16x32xf32>
    %c15_251 = arith.constant 15 : index
    %c0_252 = arith.constant 0 : index
    %c0_253 = arith.constant 0 : index
    %373 = vector.load %arg11[%c15_251, %c0_252, %c0_253] : memref<16x16x32xf32, #tpu.memory_space<vmem>>, vector<1x16x32xf32>
    %374 = vector.shape_cast %373 : vector<1x16x32xf32> to vector<16x32xf32>
    %cst_254 = arith.constant dense<0.000000e+00> : vector<16x32xf32>
    %375 = tpu.matmul %247, %374, %cst_254 {dimension_numbers = #tpu.dot_dimension_numbers<[1], [0], [0], [1], [0, 0, 1, 1], [], []>} : vector<16x16xf32>, vector<16x32xf32>, vector<16x32xf32> -> vector<16x32xf32>
    %c15_i32 = arith.constant 15 : i32
    %376 = vector.broadcast %c15_i32 : i32 to vector<16x32xi32>
    %377 = arith.cmpi eq, %251, %376 : vector<16x32xi32>
    %cst_255 = arith.constant 0.000000e+00 : f32
    %378 = vector.broadcast %cst_255 : f32 to vector<16x32xf32>
    %379 = arith.select %377, %375, %378 : vector<16x32xi1>, vector<16x32xf32>
    %380 = arith.addf %372, %379 : vector<16x32xf32>
    %cst_256 = arith.constant dense<0.000000e+00> : vector<32xf32>
    %381 = vector.multi_reduction <add>, %380, %cst_256 [0] : vector<16x32xf32> to vector<32xf32>
    %382 = vector.shape_cast %381 : vector<32xf32> to vector<1x32xf32>
    %c0_257 = arith.constant 0 : index
    %c0_258 = arith.constant 0 : index
    %383 = vector.load %arg12[%c0_257, %c0_258] : memref<1x32xf32, #tpu.memory_space<vmem>>, vector<1x32xf32>
    %384 = arith.addf %382, %383 : vector<1x32xf32>
    %cst_259 = arith.constant 0.000000e+00 : f32
    %385 = vector.broadcast %cst_259 : f32 to vector<1x32xf32>
    %386 = arith.cmpf oge, %384, %385 : vector<1x32xf32>
    %cst_260 = arith.constant 0.00999999977 : f32
    %387 = vector.broadcast %cst_260 : f32 to vector<1x32xf32>
    %388 = arith.mulf %384, %387 : vector<1x32xf32>
    %389 = arith.select %386, %384, %388 : vector<1x32xi1>, vector<1x32xf32>
    %c0_261 = arith.constant 0 : index
    %c0_262 = arith.constant 0 : index
    %c0_263 = arith.constant 0 : index
    %390 = vector.load %arg18[%c0_261, %c0_262, %c0_263] : memref<1x1x32xf32, #tpu.memory_space<vmem>>, vector<1x1x32xf32>
    %391 = vector.shape_cast %390 : vector<1x1x32xf32> to vector<1x32xf32>
    %392 = vector.shape_cast %389 : vector<1x32xf32> to vector<1x1x32xf32>
    tpu.vector_store %arg18[%c0_261, %c0_262, %c0_263], %392 {strides = array<i32>} : memref<1x1x32xf32, #tpu.memory_space<vmem>>, vector<1x1x32xf32>,
    %c0_264 = arith.constant 0 : index
    %c0_265 = arith.constant 0 : index
    %393 = vector.load %arg13[%c0_264, %c0_265] : memref<32x32xf32, #tpu.memory_space<vmem>>, vector<32x32xf32>
    %cst_266 = arith.constant dense<0.000000e+00> : vector<1x32xf32>
    %394 = tpu.matmul %389, %393, %cst_266 {dimension_numbers = #tpu.dot_dimension_numbers<[1], [0], [0], [1], [0, 0, 1, 1], [], []>} : vector<1x32xf32>, vector<32x32xf32>, vector<1x32xf32> -> vector<1x32xf32>
    %c0_267 = arith.constant 0 : index
    %c0_268 = arith.constant 0 : index
    %395 = vector.load %arg14[%c0_267, %c0_268] : memref<1x32xf32, #tpu.memory_space<vmem>>, vector<1x32xf32>
    %396 = arith.addf %394, %395 : vector<1x32xf32>
    %cst_269 = arith.constant 0.000000e+00 : f32
    %397 = vector.broadcast %cst_269 : f32 to vector<1x32xf32>
    %398 = arith.cmpf oge, %396, %397 : vector<1x32xf32>
    %cst_270 = arith.constant 0.00999999977 : f32
    %399 = vector.broadcast %cst_270 : f32 to vector<1x32xf32>
    %400 = arith.mulf %396, %399 : vector<1x32xf32>
    %401 = arith.select %398, %396, %400 : vector<1x32xi1>, vector<1x32xf32>
    %c0_271 = arith.constant 0 : index
    %c0_272 = arith.constant 0 : index
    %402 = vector.load %arg15[%c0_271, %c0_272] : memref<32x32xf32, #tpu.memory_space<vmem>>, vector<32x32xf32>
    %cst_273 = arith.constant dense<0.000000e+00> : vector<1x32xf32>
    %403 = tpu.matmul %401, %402, %cst_273 {dimension_numbers = #tpu.dot_dimension_numbers<[1], [0], [0], [1], [0, 0, 1, 1], [], []>} : vector<1x32xf32>, vector<32x32xf32>, vector<1x32xf32> -> vector<1x32xf32>
    %c0_274 = arith.constant 0 : index
    %c0_275 = arith.constant 0 : index
    %404 = vector.load %arg16[%c0_274, %c0_275] : memref<1x32xf32, #tpu.memory_space<vmem>>, vector<1x32xf32>
    %405 = arith.addf %403, %404 : vector<1x32xf32>
    %406 = tpu.iota {dimensions = array<i32: 1>} : vector<1x32xi32>
    %c16_i32 = arith.constant 16 : i32
    %407 = vector.broadcast %c16_i32 : i32 to vector<1x32xi32>
    %408 = arith.cmpi slt, %406, %407 : vector<1x32xi32>
    %cst_276 = arith.constant 0.000000e+00 : f32
    %409 = vector.broadcast %cst_276 : f32 to vector<1x32xf32>
    %410 = arith.cmpf oge, %405, %409 : vector<1x32xf32>
    %cst_277 = arith.constant 0.00999999977 : f32
    %411 = vector.broadcast %cst_277 : f32 to vector<1x32xf32>
    %412 = arith.mulf %405, %411 : vector<1x32xf32>
    %413 = arith.select %410, %405, %412 : vector<1x32xi1>, vector<1x32xf32>
    %414 = arith.select %408, %413, %405 : vector<1x32xi1>, vector<1x32xf32>
    %c0_278 = arith.constant 0 : index
    %c0_279 = arith.constant 0 : index
    %c0_280 = arith.constant 0 : index
    %415 = vector.load %arg19[%c0_278, %c0_279, %c0_280] : memref<1x1x32xf32, #tpu.memory_space<vmem>>, vector<1x1x32xf32>
    %416 = vector.shape_cast %415 : vector<1x1x32xf32> to vector<1x32xf32>
    %417 = vector.shape_cast %414 : vector<1x32xf32> to vector<1x1x32xf32>
    tpu.vector_store %arg19[%c0_278, %c0_279, %c0_280], %417 {strides = array<i32>} : memref<1x1x32xf32, #tpu.memory_space<vmem>>, vector<1x1x32xf32>,
    return
  }
  func.func @transform_0(%arg0: i32) -> (i32, i32, i32) {
    %c0_i32 = arith.constant 0 : i32
    %c0_i32_0 = arith.constant 0 : i32
    %c0_i32_1 = arith.constant 0 : i32
    return %arg0, %c0_i32, %c0_i32_0 : i32, i32, i32
  }
  func.func @transform_1(%arg0: i32) -> (i32, i32) {
    %c0_i32 = arith.constant 0 : i32
    %c0_i32_0 = arith.constant 0 : i32
    %c0_i32_1 = arith.constant 0 : i32
    return %c0_i32, %c0_i32_0 : i32, i32
  }
  func.func @transform_2(%arg0: i32) -> (i32, i32) {
    %c0_i32 = arith.constant 0 : i32
    %c0_i32_0 = arith.constant 0 : i32
    %c0_i32_1 = arith.constant 0 : i32
    return %c0_i32, %c0_i32_0 : i32, i32
  }
  func.func @transform_3(%arg0: i32) -> (i32, i32, i32) {
    %c0_i32 = arith.constant 0 : i32
    %c0_i32_0 = arith.constant 0 : i32
    %c0_i32_1 = arith.constant 0 : i32
    %c0_i32_2 = arith.constant 0 : i32
    return %c0_i32, %c0_i32_0, %c0_i32_1 : i32, i32, i32
  }
  func.func @transform_4(%arg0: i32) -> (i32, i32) {
    %c0_i32 = arith.constant 0 : i32
    %c0_i32_0 = arith.constant 0 : i32
    %c0_i32_1 = arith.constant 0 : i32
    return %c0_i32, %c0_i32_0 : i32, i32
  }
  func.func @transform_5(%arg0: i32) -> (i32, i32) {
    %c0_i32 = arith.constant 0 : i32
    %c0_i32_0 = arith.constant 0 : i32
    %c0_i32_1 = arith.constant 0 : i32
    return %c0_i32, %c0_i32_0 : i32, i32
  }
  func.func @transform_6(%arg0: i32) -> (i32, i32, i32) {
    %c0_i32 = arith.constant 0 : i32
    %c0_i32_0 = arith.constant 0 : i32
    %c0_i32_1 = arith.constant 0 : i32
    %c0_i32_2 = arith.constant 0 : i32
    return %c0_i32, %c0_i32_0, %c0_i32_1 : i32, i32, i32
  }
  func.func @transform_7(%arg0: i32) -> (i32, i32) {
    %c0_i32 = arith.constant 0 : i32
    %c0_i32_0 = arith.constant 0 : i32
    %c0_i32_1 = arith.constant 0 : i32
    return %c0_i32, %c0_i32_0 : i32, i32
  }
  func.func @transform_8(%arg0: i32) -> (i32, i32) {
    %c0_i32 = arith.constant 0 : i32
    %c0_i32_0 = arith.constant 0 : i32
    %c0_i32_1 = arith.constant 0 : i32
    return %c0_i32, %c0_i32_0 : i32, i32
  }
  func.func @transform_9(%arg0: i32) -> (i32, i32, i32) {
    %c0_i32 = arith.constant 0 : i32
    %c0_i32_0 = arith.constant 0 : i32
    %c0_i32_1 = arith.constant 0 : i32
    %c0_i32_2 = arith.constant 0 : i32
    return %c0_i32, %c0_i32_0, %c0_i32_1 : i32, i32, i32
  }
  func.func @transform_10(%arg0: i32) -> (i32, i32, i32) {
    %c0_i32 = arith.constant 0 : i32
    %c0_i32_0 = arith.constant 0 : i32
    %c0_i32_1 = arith.constant 0 : i32
    %c0_i32_2 = arith.constant 0 : i32
    return %c0_i32, %c0_i32_0, %c0_i32_1 : i32, i32, i32
  }
  func.func @transform_11(%arg0: i32) -> (i32, i32) {
    %c0_i32 = arith.constant 0 : i32
    %c0_i32_0 = arith.constant 0 : i32
    %c0_i32_1 = arith.constant 0 : i32
    return %c0_i32, %c0_i32_0 : i32, i32
  }
  func.func @transform_12(%arg0: i32) -> (i32, i32) {
    %c0_i32 = arith.constant 0 : i32
    %c0_i32_0 = arith.constant 0 : i32
    %c0_i32_1 = arith.constant 0 : i32
    return %c0_i32, %c0_i32_0 : i32, i32
  }
  func.func @transform_13(%arg0: i32) -> (i32, i32) {
    %c0_i32 = arith.constant 0 : i32
    %c0_i32_0 = arith.constant 0 : i32
    %c0_i32_1 = arith.constant 0 : i32
    return %c0_i32, %c0_i32_0 : i32, i32
  }
  func.func @transform_14(%arg0: i32) -> (i32, i32) {
    %c0_i32 = arith.constant 0 : i32
    %c0_i32_0 = arith.constant 0 : i32
    %c0_i32_1 = arith.constant 0 : i32
    return %c0_i32, %c0_i32_0 : i32, i32
  }
  func.func @transform_15(%arg0: i32) -> (i32, i32) {
    %c0_i32 = arith.constant 0 : i32
    %c0_i32_0 = arith.constant 0 : i32
    %c0_i32_1 = arith.constant 0 : i32
    return %c0_i32, %c0_i32_0 : i32, i32
  }
  func.func @transform_16(%arg0: i32) -> (i32, i32, i32) {
    %c0_i32 = arith.constant 0 : i32
    %c0_i32_0 = arith.constant 0 : i32
    %c0_i32_1 = arith.constant 0 : i32
    return %arg0, %c0_i32, %c0_i32_0 : i32, i32, i32
  }
  func.func @transform_17(%arg0: i32) -> (i32, i32, i32) {
    %c0_i32 = arith.constant 0 : i32
    %c0_i32_0 = arith.constant 0 : i32
    %c0_i32_1 = arith.constant 0 : i32
    return %arg0, %c0_i32, %c0_i32_0 : i32, i32, i32
  }
  func.func @transform_18(%arg0: i32) -> (i32, i32, i32) {
    %c0_i32 = arith.constant 0 : i32
    %c0_i32_0 = arith.constant 0 : i32
    %c0_i32_1 = arith.constant 0 : i32
    return %arg0, %c0_i32, %c0_i32_0 : i32, i32, i32
  }
}

</mosaic_0001>

<bundles_post_ra>
// kernel: encoder_forward.1
= control target key start
LH: loop header
LB: loop body
LE: loop exit
PB: predicated region body
PF: predicated region fallthrough
CT: control target
= control target key end

     0   :  { %s14654_s0 = inlined_call_operand.vmem [shape: f32[2,4,256], index: 0, kind: input, shape index: {}]   ;;  %s14655_s1 = inlined_call_operand.vmem [shape: f32[200,4], index: 1, kind: input, shape index: {}]   ;;  %s14656_s2 = inlined_call_operand.vmem [shape: f32[8,1], index: 2, kind: input, shape index: {}]   ;;  %s14657_s3 = inlined_call_operand.vmem [shape: f32[25,256,64], index: 3, kind: input, shape index: {}]   ;;  %s14658_s4 = inlined_call_operand.vmem [shape: f32[144,8], index: 4, kind: input, shape index: {}]   ;;  %s14659_s5 = inlined_call_operand.vmem [shape: f32[16,1], index: 5, kind: input, shape index: {}]   ;;  %s14660_s6 = inlined_call_operand.vmem [shape: f32[9,64,16], index: 6, kind: input, shape index: {}]   ;;  %s14661_s7 = inlined_call_operand.vmem [shape: f32[144,16], index: 7, kind: input, shape index: {}]   ;;  %s14662_s8 = inlined_call_operand.vmem [shape: f32[16,1], index: 8, kind: input, shape index: {}]   ;;  %s14663_s9 = inlined_call_operand.vmem [shape: f32[9,16,16], index: 9, kind: input, shape index: {}]   ;;  %s14664_s10 = inlined_call_operand.vmem [shape: f32[16,16,32], index: 10, kind: input, shape index: {}]   ;;  %s14665_s11 = inlined_call_operand.vmem [shape: f32[1,32], index: 11, kind: input, shape index: {}]   ;;  %s14666_s12 = inlined_call_operand.vmem [shape: f32[32,32], index: 12, kind: input, shape index: {}]   ;;  %s14667_s13 = inlined_call_operand.vmem [shape: f32[1,32], index: 13, kind: input, shape index: {}]   ;;  %s14668_s14 = inlined_call_operand.vmem [shape: f32[32,32], index: 14, kind: input, shape index: {}]   ;;  %s14669_s15 = inlined_call_operand.vmem [shape: f32[1,32], index: 15, kind: input, shape index: {}]   ;;  %s14670_s16 = inlined_call_operand.vmem [shape: f32[2,16,16], index: 16, kind: output, shape index: {0}]   ;;  %s14671_s17 = inlined_call_operand.hbm [shape: f32[2,1,32], index: 17, kind: output, shape index: {1}]   ;;  %s14672_s18 = inlined_call_operand.vmem [shape: f32[2,1,32], index: 18, kind: output, shape index: {2}]  }
   0x1   :  { %14680 = sst [smem:[#allocation11_spill]] %s14654_s0 }
   0x2   :  { %14681 = sst [smem:[#allocation12_spill]] %s14655_s1 }
   0x3   :  { %14682 = sst [smem:[#allocation13_spill]] %s14656_s2 }
   0x4   :  { %14683 = sst [smem:[#allocation14_spill]] %s14669_s15 }
   0x5   :  { %14684 = sst [smem:[#allocation15_spill]] %s14672_s18 }
   0x6   :  { %24 = vsyncpa [#allocation3], 0 }
   0x7   :  { %26 = vsyncpa [#allocation3 + $0x1], 0  ;;  %s11148_s27 = smov 0   ;;  %s11150_s28 = smov 0  }
   0x8   :  { %s11152_s29 = smov 0   ;;  %s11154_s30 = smov 0  }
   0x9 LB: > { %14685 = sst [smem:[#allocation5_spill]] %s11034_s27  ;;  %s11169_s0 = sadd.s32 4294967295, %s11046_s30   ;;  %s11046_s30 = sphi %s11154_s30, %s14701_s30   ;;  %s11042_s29 = sphi %s11152_s29, %s14703_s29   ;;  %s11038_s28 = sphi %s11150_s28, %s14705_s28   ;;  %s11034_s27 = sphi %s11148_s27, %s14704_s27  }
   0xa   : > { %14686 = sst [smem:[#allocation6_spill]] %s11042_s29  ;;  %s7280_s19 = sadd.s32 4294967294, %s11046_s30  }
   0xb   : > { %14687 = sst [smem:[#allocation7_spill]] %s11046_s30  ;;  %s11173_s1 = sadd.s32 1, %s11046_s30  }
   0xc   : > { %14688 = sst [smem:[#allocation8_spill]] %s11173_s1  ;;  %s406_s20 = sadd.s32 1, %s11042_s29 }
   0xd   : > { %s403_s21 = ssub.s32 %s11046_s30, %s11173_s1  ;;  %p416_p0 = scmp.ne.s32.totalorder %s11042_s29, %s11038_s28 }
   0xe   : > { %p404_p1 = scmp.eq.s32.totalorder %s403_s21, 0  ;;  %p417_p2 = scmp.eq.s32.totalorder %s11169_s0, 1 }
   0xf   : > { %p422_p3 = scmp.ne.s32.totalorder %s11038_s28, %s11034_s27  ;;  %p423_p4 = scmp.eq.s32.totalorder %s7280_s19, 1 }
  0x10   : > { %s11184_s22 = scalar_select %p404_p1, %s11042_s29, %s406_s20  }
  0x11   : > { %p11186_p5 = por %p417_p2, %p416_p0  ;;  %p11190_p6 = por %p423_p4, %p422_p3 }
  0x12   : > { %14689 = sst [smem:[#allocation9_spill]] %s11184_s22  ;;  %p7283_p7 = scmp.ge.s32.totalorder %s11046_s30, 1 }
  0x13   : > { %s14691_s23 = scalar_select %p11190_p6, 1, 0 }
  0x14   : > { %p520_p8 = scmp.lt.s32.totalorder %s11046_s30, 3 }
  0x15   : > { %14692 = sst [smem:[#allocation10_spill]] %s14691_s23 }
  0x16   : > { %p521_p9 = pnand %p7283_p7, %p520_p8 }
  0x17   : > { %p581_p10 = scmp.lt.s32.totalorder (!%p521_p9), %s11169_s0, 1  ;;  %v11048_v0 = vmov (!%p521_p9), 0.0   ;;  %s14693_s20 = sld [smem:[#allocation11_spill]] (!%p521_p9)  ;;  %v7332_v1 = vld [vmem:[%s14657_s3 + $0x180] sm:$0xff] (!%p521_p9)  ;;  %v7333_v2 = vld [vmem:[%s14657_s3 + $0x188] sm:$0xff] (!%p521_p9)  ;;  %v7334_v8 = vld [vmem:[%s14657_s3 + $0x190] sm:$0xff] (!%p521_p9) }
  0x18   : > { %524 = sbr.rel (%p521_p9) target bundleno = 2704 (0xa90), region = 84  ;;  %769 = vmatprep.mubr.f32.mxu0 (!%p521_p9), %v11048_v0  ;;  %v9847_v4 = vpack.c.bf16 (!%p521_p9), %v7333_v2, %v7332_v1  ;;  %v7316_v5 = vld [vmem:[%s14657_s3 + $0x100] sm:$0xff] (!%p521_p9)  ;;  %v7317_v7 = vld [vmem:[%s14657_s3 + $0x108] sm:$0xff] (!%p521_p9)  ;;  %v7335_v9 = vld [vmem:[%s14657_s3 + $0x198] sm:$0xff] (!%p521_p9)  ;;  %vm700_vm0 = vcmask (!%p521_p9), 1043456   ;;  %s14694_s22 = sld [smem:[#allocation12_spill]] (!%p521_p9) }
  0x19   : > { %v9849_v10 = vpack.c.bf16 (!%p521_p9), %v7317_v7, %v7316_v5  ;;  %v9851_v11 = vpack.c.bf16 (!%p521_p9), %v7335_v9, %v7334_v8  ;;  %v7318_v12 = vld [vmem:[%s14657_s3 + $0x110] sm:$0xff] (!%p521_p9)  ;;  %v7319_v13 = vld [vmem:[%s14657_s3 + $0x118] sm:$0xff] (!%p521_p9)  ;;  %v7336_v15 = vld [vmem:[%s14657_s3 + $0x1a0] sm:$0xff] (!%p521_p9)  ;;  %vm624_vm1 = vcmask (!%p521_p9), 31744   ;;  %s14695_s1 = sld [smem:[#allocation13_spill]] (!%p521_p9)  ;;  %vm3545_vm2 = vcmask (!%p521_p9), 64512  }
  0x1a   : > { %9848 = vmatprep.subr.bf16.mxu1 (!%p521_p9), %v9847_v4  ;;  %v7337_v16 = vld [vmem:[%s14657_s3 + $0x1a8] sm:$0xff] (!%p521_p9)  ;;  %v7396_v17 = vld [vmem:[%s14657_s3 + $0x380] sm:$0xff] (!%p521_p9)  ;;  %v9853_v19 = vpack.c.bf16 (!%p521_p9), %v7319_v13, %v7318_v12  ;;  %v7338_v28 = vld [vmem:[%s14657_s3 + $0x1b0] sm:$0xff] (!%p521_p9)  ;;  %vm3772_vm4 = vcmask (!%p521_p9), 523264   ;;  %vm4617_vm5 = vcmask (!%p521_p9), 130048   ;;  %vm11051_vm10 = vmmov (!%p521_p9), 0  }
  0x1b   : > { %9850 = vmatpush3.bf16.msra.mxu1 (!%p521_p9), %v9849_v10  ;;  %v7397_v20 = vld [vmem:[%s14657_s3 + $0x388] sm:$0xff] (!%p521_p9)  ;;  %v7320_v21 = vld [vmem:[%s14657_s3 + $0x120] sm:$0xff] (!%p521_p9)  ;;  %v9855_v23 = vpack.c.bf16 (!%p521_p9), %v7337_v16, %v7336_v15  ;;  %v7339_v29 = vld [vmem:[%s14657_s3 + $0x1b8] sm:$0xff] (!%p521_p9)  ;;  %s574_s30 = sand.u32 (!%p521_p9), 1, %s11038_s28   ;;  %s8300_s29 = sshll.u32 (!%p521_p9), %s11169_s0, 4 }
  0x1c   : > { %9852 = vmatprep.subr.bf16.mxu1 (!%p521_p9), %v9851_v11  ;;  %v7321_v24 = vld [vmem:[%s14657_s3 + $0x128] sm:$0xff] (!%p521_p9)  ;;  %v7380_v25 = vld [vmem:[%s14657_s3 + $0x300] sm:$0xff] (!%p521_p9)  ;;  %v9943_v27 = vpack.c.bf16 (!%p521_p9), %v7397_v20, %v7396_v17  ;;  %v7398_v30 = vld [vmem:[%s14657_s3 + $0x390] sm:$0xff] (!%p521_p9)  ;;  %v9859_v38 = vpack.c.bf16 (!%p521_p9), %v7339_v29, %v7338_v28  ;;  %s14609_s18 = scalar_lea.hbm (!%p521_p9), %s14671_s17, %s8300_s29  ;;  %s7160_s19 = scalar_lea.sflag (!%p521_p9), [#allocation3], %s574_s30 }
  0x1d   : > { %v7381_v26 = vld [vmem:[%s14657_s3 + $0x308] sm:$0xff] (!%p521_p9)  ;;  %v7399_v32 = vld [vmem:[%s14657_s3 + $0x398] sm:$0xff] (!%p521_p9)  ;;  %v9857_v34 = vpack.c.bf16 (!%p521_p9), %v7321_v24, %v7320_v21  ;;  %v7382_v36 = vld [vmem:[%s14657_s3 + $0x310] sm:$0xff] (!%p521_p9) }
  0x1e   : > { %v597_v18 = vld [vmem:[%s14694_s22] sm:$0xff] (!%p521_p9)  ;;  %v9945_v31 = vpack.c.bf16 (!%p521_p9), %v7381_v26, %v7380_v25  ;;  %v598_v33 = vld [vmem:[%s14694_s22 + $0x8] sm:$0xff] (!%p521_p9)  ;;  %v9947_v35 = vpack.c.bf16 (!%p521_p9), %v7399_v32, %v7398_v30  ;;  %v7383_v37 = vld [vmem:[%s14657_s3 + $0x318] sm:$0xff] (!%p521_p9) }
  0x1f   : > { %s11199_s24 = scalar_select %p581_p10, %s11169_s0, 1  ;;  %9854 = vmatpush3.bf16.msra.mxu1 %v9853_v19  ;;  %v7322_v39 = vld [vmem:[%s14657_s3 + $0x130] sm:$0xff]  ;;  %v7323_v40 = vld [vmem:[%s14657_s3 + $0x138] sm:$0xff]  ;;  %v7400_v41 = vld [vmem:[%s14657_s3 + $0x3a0] sm:$0xff]  ;;  %v9949_v45 = vpack.c.bf16 %v7383_v37, %v7382_v36 }
  0x20   : > { %9856 = vmatprep.subr.bf16.mxu1 %v9855_v23  ;;  %v7340_v42 = vld [vmem:[%s14657_s3 + $0x1c0] sm:$0xff]  ;;  %v7341_v43 = vld [vmem:[%s14657_s3 + $0x1c8] sm:$0xff]  ;;  %v9861_v46 = vpack.c.bf16 %v7323_v40, %v7322_v39  ;;  %v7402_v53 = vld [vmem:[%s14657_s3 + $0x3b0] sm:$0xff] }
  0x21   : > { %s8303_s25 = sshll.u32 %s11199_s24, 3  ;;  %v7401_v44 = vld [vmem:[%s14657_s3 + $0x3a8] sm:$0xff]  ;;  %v7324_v48 = vld [vmem:[%s14657_s3 + $0x140] sm:$0xff]  ;;  %v9863_v51 = vpack.c.bf16 %v7341_v43, %v7340_v42  ;;  %v7403_v54 = vld [vmem:[%s14657_s3 + $0x3b8] sm:$0xff]  ;;  %s8304_s23 = sshll.u32 %s11199_s24, 4 }
  0x22   : > { %s585_s21 = scalar_lea.vmem %s14693_s20, %s8303_s25  ;;  %v9951_v47 = vpack.c.bf16 %v7401_v44, %v7400_v41  ;;  %v7384_v49 = vld [vmem:[%s14657_s3 + $0x320] sm:$0xff]  ;;  %v7385_v50 = vld [vmem:[%s14657_s3 + $0x328] sm:$0xff]  ;;  %v599_v55 = vld [vmem:[%s14694_s22 + $0x10] sm:$0xff]  ;;  %v9955_v60 = vpack.c.bf16 %v7403_v54, %v7402_v53  ;;  %s590_s15 = scalar_lea.vmem %s14670_s16, %s8304_s23 }
  0x23   : > { %v594_v3 = vld [vmem:[%s585_s21] sm:$0xff]  ;;  %9858 = vmatpush3.bf16.msra.mxu1 %v9857_v34  ;;  %v7325_v52 = vld [vmem:[%s14657_s3 + $0x148] sm:$0xff]  ;;  %v7342_v56 = vld [vmem:[%s14657_s3 + $0x1d0] sm:$0xff]  ;;  %v9953_v58 = vpack.c.bf16 %v7385_v50, %v7384_v49  ;;  %s11052_s21 = smov [#allocation2]  }
  0x24   : > { %v595_v6 = vmul.f32 2.0, %v594_v3  ;;  %9860 = vmatprep.subr.bf16.mxu1 %v9859_v38  ;;  %v7343_v57 = vld [vmem:[%s14657_s3 + $0x1d8] sm:$0xff]  ;;  %v9865_v59 = vpack.c.bf16 %v7325_v52, %v7324_v48  ;;  %v7326_v61 = vld [vmem:[%s14657_s3 + $0x150] sm:$0xff]  ;;  %v7404_v3 = vld [vmem:[%s14657_s3 + $0x3c0] sm:$0xff]  ;;  %s10988_s25 = sshll.u32 %s11052_s21, 4  ;;  %s10989_s25 = int_to_ptr.vmem [resolvable:$false] %s10988_s25 }
  0x25   : > { %v7386_v62 = vld [vmem:[%s14657_s3 + $0x330] sm:$0xff]  ;;  %v7387_v63 = vld [vmem:[%s14657_s3 + $0x338] sm:$0xff]  ;;  %v9867_v1 = vpack.c.bf16 %v7343_v57, %v7342_v56  ;;  %v7405_v4 = vld [vmem:[%s14657_s3 + $0x3c8] sm:$0xff]  ;;  %s10990_s26 = scalar_lea.vmem %s10989_s25, 32 }
  0x26   : > { %v7288_v14 = vadd.f32 -1.0, %v595_v6  ;;  %v7327_v2 = vld [vmem:[%s14657_s3 + $0x158] sm:$0xff]  ;;  %v7344_v6 = vld [vmem:[%s14657_s3 + $0x1e0] sm:$0xff]  ;;  %v7345_v7 = vld [vmem:[%s14657_s3 + $0x1e8] sm:$0xff]  ;;  %v9957_v8 = vpack.c.bf16 %v7387_v63, %v7386_v62  ;;  %v9959_v10 = vpack.c.bf16 %v7405_v4, %v7404_v3 }
  0x27   : > { %9862 = vmatpush3.bf16.msra.mxu1 %v9861_v46  ;;  %v600_v5 = vld [vmem:[%s14694_s22 + $0x18] sm:$0xff]  ;;  %v9869_v9 = vpack.c.bf16 %v7327_v2, %v7326_v61  ;;  %v7388_v11 = vld [vmem:[%s14657_s3 + $0x340] sm:$0xff]  ;;  %v7389_v12 = vld [vmem:[%s14657_s3 + $0x348] sm:$0xff]  ;;  %v9871_v13 = vpack.c.bf16 %v7345_v7, %v7344_v6 }
  0x28   : > { %v623_v22 = vcombine.high %v7288_v14, %v7288_v14  ;;  %9864 = vmatprep.subr.bf16.mxu1 %v9863_v51  ;;  %v7329_v15 = vld [vmem:[%s14657_s3 + $0x168] sm:$0xff]  ;;  %v601_v16 = vld [vmem:[%s14694_s22 + $0x20] sm:$0xff]  ;;  %v9961_v17 = vpack.c.bf16 %v7389_v12, %v7388_v11  ;;  %v603_v20 = vld [vmem:[%s14694_s22 + $0x30] sm:$0xff] }
  0x29   : > { %v602_v19 = vld [vmem:[%s14694_s22 + $0x28] sm:$0xff]  ;;  %v604_v21 = vld [vmem:[%s14694_s22 + $0x38] sm:$0xff]  ;;  %v607_v24 = vld [vmem:[%s14694_s22 + $0x50] sm:$0xff] }
  0x2a   : > { %7289 = vmatprep.subr.msk.mxu0 %vm700_vm0, %v623_v22  ;;  %v605_v22 = vld [vmem:[%s14694_s22 + $0x40] sm:$0xff]  ;;  %v606_v23 = vld [vmem:[%s14694_s22 + $0x48] sm:$0xff]  ;;  %v608_v25 = vld [vmem:[%s14694_s22 + $0x58] sm:$0xff] }
  0x2b   : > { %7290 = vmatpush1.msk.msra.mxu0 %vm700_vm0, %v7288_v14  ;;  %9866 = vmatpush3.bf16.msra.mxu1 %v9865_v59  ;;  %v7328_v14 = vld [vmem:[%s14657_s3 + $0x160] sm:$0xff]  ;;  %v611_v28 = vld [vmem:[%s14694_s22 + $0x70] sm:$0xff]  ;;  %v612_v29 = vld [vmem:[%s14694_s22 + $0x78] sm:$0xff] }
  0x2c   : > { %7291 = vmatmul.mubr.msk.f32.vlgmr.msra.gmra.mrb[0].mxu0 %vm624_vm1, %v597_v18  ;;  %9944 = vmatprep.subr.bf16.mxu0 %v9943_v27  ;;  %v9873_v18 = vpack.c.bf16 %v7329_v15, %v7328_v14  ;;  %v609_v26 = vld [vmem:[%s14694_s22 + $0x60] sm:$0xff]  ;;  %v610_v27 = vld [vmem:[%s14694_s22 + $0x68] sm:$0xff]  ;;  %v615_v32 = vld [vmem:[%s14694_s22 + $0x90] sm:$0xff] }
  0x2d   : > { %775 = vmatprep.mubr.f32.mxu0 %v11048_v0  ;;  %9946 = vmatpush3.bf16.msra.mxu0 %v9945_v31  ;;  %v613_v30 = vld [vmem:[%s14694_s22 + $0x80] sm:$0xff]  ;;  %v614_v31 = vld [vmem:[%s14694_s22 + $0x88] sm:$0xff]  ;;  %v7346_v36 = vld [vmem:[%s14657_s3 + $0x1f0] sm:$0xff] }
  0x2e   : > { %9948 = vmatprep.subr.bf16.mxu0 %v9947_v35  ;;  %9868 = vmatprep.subr.bf16.mxu1 %v9867_v1  ;;  %v617_v34 = vld [vmem:[%s14694_s22 + $0xa0] sm:$0xff]  ;;  %v618_v35 = vld [vmem:[%s14694_s22 + $0xa8] sm:$0xff]  ;;  %v7347_v37 = vld [vmem:[%s14657_s3 + $0x1f8] sm:$0xff] }
  0x2f   : > { %9870 = vmatpush3.bf16.msra.mxu1 %v9869_v9  ;;  %v7406_v38 = vld [vmem:[%s14657_s3 + $0x3d0] sm:$0xff]  ;;  %v9875_v39 = vpack.c.bf16 %v7347_v37, %v7346_v36  ;;  %v7407_v40 = vld [vmem:[%s14657_s3 + $0x3d8] sm:$0xff]  ;;  %v936_v49 = vld [vmem:[%s14657_s3 + $0x80] sm:$0xff] }
  0x30   : > { %7292 = vmatmul.mubr.msk.f32.gmra.mrb[2].mxu0 %vm624_vm1, %v598_v33  ;;  %9872 = vmatprep.subr.bf16.mxu1 %v9871_v13  ;;  %v616_v33 = vld [vmem:[%s14694_s22 + $0x98] sm:$0xff]  ;;  %v7330_v41 = vld [vmem:[%s14657_s3 + $0x170] sm:$0xff]  ;;  %v9963_v43 = vpack.c.bf16 %v7407_v40, %v7406_v38  ;;  %v937_v50 = vld [vmem:[%s14657_s3 + $0x88] sm:$0xff] }
  0x31   : > { %781 = vmatprep.mubr.f32.mxu0 %v11048_v0  ;;  %9950 = vmatpush3.bf16.msra.mxu0 %v9949_v45  ;;  %v7331_v42 = vld [vmem:[%s14657_s3 + $0x178] sm:$0xff]  ;;  %v7390_v45 = vld [vmem:[%s14657_s3 + $0x350] sm:$0xff]  ;;  %v7408_v51 = vld [vmem:[%s14657_s3 + $0x3e0] sm:$0xff]  ;;  %v9879_v52 = vpack.c.bf16 %v937_v50, %v936_v49 }
  0x32   : > { %9952 = vmatprep.subr.bf16.mxu0 %v9951_v47  ;;  %v9877_v44 = vpack.c.bf16 %v7331_v42, %v7330_v41  ;;  %v7391_v46 = vld [vmem:[%s14657_s3 + $0x358] sm:$0xff]  ;;  %v619_v47 = vld [vmem:[%s14694_s22 + $0xb0] sm:$0xff]  ;;  %v7409_v53 = vld [vmem:[%s14657_s3 + $0x3e8] sm:$0xff] }
  0x33   : > { %9874 = vmatpush3.bf16.msra.mxu1 %v9873_v18  ;;  %v9965_v48 = vpack.c.bf16 %v7391_v46, %v7390_v45  ;;  %v9967_v54 = vpack.c.bf16 %v7409_v53, %v7408_v51  ;;  %v7393_v56 = vld [vmem:[%s14657_s3 + $0x368] sm:$0xff]  ;;  %v620_v57 = vld [vmem:[%s14694_s22 + $0xb8] sm:$0xff]  ;;  %v7410_v59 = vld [vmem:[%s14657_s3 + $0x3f0] sm:$0xff] }
  0x34   : > { %7293 = vmatmul.mubr.msk.f32.gmra.mrb[4].mxu0 %vm624_vm1, %v599_v55  ;;  %9876 = vmatprep.subr.bf16.mxu1 %v9875_v39  ;;  %v7392_v55 = vld [vmem:[%s14657_s3 + $0x360] sm:$0xff]  ;;  %v7394_v63 = vld [vmem:[%s14657_s3 + $0x370] sm:$0xff]  ;;  %v7395_v1 = vld [vmem:[%s14657_s3 + $0x378] sm:$0xff] }
  0x35   : > { %787 = vmatprep.mubr.f32.mxu0 %v11048_v0  ;;  %9954 = vmatpush3.bf16.msra.mxu0 %v9953_v58  ;;  %v9969_v58 = vpack.c.bf16 %v7393_v56, %v7392_v55  ;;  %v621_v62 = vld [vmem:[%s14694_s22 + $0xc0] sm:$0xff]  ;;  %v9973_v2 = vpack.c.bf16 %v7395_v1, %v7394_v63  ;;  %v7461_v4 = vld [vmem:[%s14657_s3 + $0x588] sm:$0xff]  ;;  %v939_v11 = vld [vmem:[%s14657_s3 + $0x98] sm:$0xff] }
  0x36   : > { %9956 = vmatprep.subr.bf16.mxu0 %v9955_v60  ;;  %v7411_v60 = vld [vmem:[%s14657_s3 + $0x3f8] sm:$0xff]  ;;  %v7460_v3 = vld [vmem:[%s14657_s3 + $0x580] sm:$0xff]  ;;  %v921_v9 = vld [vmem:[%s14657_s3 + $0x8] sm:$0xff] }
  0x37   : > { %9878 = vmatpush3.bf16.msra.mxu1 %v9877_v44  ;;  %v9971_v61 = vpack.c.bf16 %v7411_v60, %v7410_v59  ;;  %v940_v18 = vld [vmem:[%s14657_s3 + $0xa0] sm:$0xff]  ;;  %v927_v36 = vld [vmem:[%s14657_s3 + $0x38] sm:$0xff]  ;;  %v7446_v40 = vld [vmem:[%s14657_s3 + $0x510] sm:$0xff] }
  0x38   : > { %7294 = vmatmul.mubr.msk.f32.gmra.mrb[6].mxu0 %vm624_vm1, %v600_v5  ;;  %9880 = vmatprep.subr.bf16.mxu1 %v9879_v52  ;;  %v10007_v5 = vpack.c.bf16 %v7461_v4, %v7460_v3  ;;  %v7447_v41 = vld [vmem:[%s14657_s3 + $0x518] sm:$0xff]  ;;  %v944_v42 = vld [vmem:[%s14657_s3 + $0xc0] sm:$0xff]  ;;  %v7465_v45 = vld [vmem:[%s14657_s3 + $0x5a8] sm:$0xff] }
  0x39   : > { %793 = vmatprep.mubr.f32.mxu0 %v11048_v0  ;;  %9958 = vmatpush3.bf16.msra.mxu0 %v9957_v8  ;;  %v920_v8 = vld [vmem:[%s14657_s3] sm:$0xff]  ;;  %v929_v49 = vld [vmem:[%s14657_s3 + $0x48] sm:$0xff]  ;;  %v946_v55 = vld [vmem:[%s14657_s3 + $0xd0] sm:$0xff] }
  0x3a   : > { %9960 = vmatprep.subr.bf16.mxu0 %v9959_v10  ;;  %v938_v10 = vld [vmem:[%s14657_s3 + $0x90] sm:$0xff]  ;;  %v9881_v13 = vpack.c.bf16 %v921_v9, %v920_v8  ;;  %v7464_v44 = vld [vmem:[%s14657_s3 + $0x5a0] sm:$0xff]  ;;  %v7467_v59 = vld [vmem:[%s14657_s3 + $0x5b8] sm:$0xff] }
  0x3b   : > { %v9883_v15 = vpack.c.bf16 %v939_v11, %v938_v10  ;;  %v10015_v52 = vpack.c.bf16 %v7465_v45, %v7464_v44  ;;  %v7448_v53 = vld [vmem:[%s14657_s3 + $0x520] sm:$0xff]  ;;  %v931_v63 = vld [vmem:[%s14657_s3 + $0x58] sm:$0xff]  ;;  %v7450_v4 = vld [vmem:[%s14657_s3 + $0x530] sm:$0xff] }
  0x3c   : > { %7295 = vmatmul.mubr.msk.f32.gmra.mrb[8].mxu0 %vm624_vm1, %v601_v16  ;;  %v922_v16 = vld [vmem:[%s14657_s3 + $0x10] sm:$0xff]  ;;  %v949_v9 = vld [vmem:[%s14657_s3 + $0xe8] sm:$0xff]  ;;  %v7468_v10 = vld [vmem:[%s14657_s3 + $0x5c0] sm:$0xff] }
  0x3d   : > { %799 = vmatprep.mubr.f32.mxu0 %v11048_v0  ;;  %9962 = vmatpush3.bf16.msra.mxu0 %v9961_v17  ;;  %v923_v17 = vld [vmem:[%s14657_s3 + $0x18] sm:$0xff]  ;;  %v7469_v11 = vld [vmem:[%s14657_s3 + $0x5c8] sm:$0xff]  ;;  %v7348_v44 = vld [vmem:[%s14657_s3 + $0x200] sm:$0xff] }
  0x3e   : > { %9964 = vmatprep.subr.bf16.mxu0 %v9963_v43  ;;  %v945_v43 = vld [vmem:[%s14657_s3 + $0xc8] sm:$0xff] }
  0x3f   : > { %v9895_v51 = vpack.c.bf16 %v945_v43, %v944_v42  ;;  %v7349_v45 = vld [vmem:[%s14657_s3 + $0x208] sm:$0xff] }
  0x40   : > { %7296 = vmatmul.mubr.msk.f32.gmra.mrb[10].mxu0 %vm624_vm1, %v602_v19  ;;  %v941_v19 = vld [vmem:[%s14657_s3 + $0xa8] sm:$0xff] }
  0x41   : > { %805 = vmatprep.mubr.f32.mxu0 %v11048_v0  ;;  %9966 = vmatpush3.bf16.msra.mxu0 %v9965_v48  ;;  %v928_v48 = vld [vmem:[%s14657_s3 + $0x40] sm:$0xff] }
  0x42   : > { %9968 = vmatprep.subr.bf16.mxu0 %v9967_v54  ;;  %v7449_v54 = vld [vmem:[%s14657_s3 + $0x528] sm:$0xff]  ;;  %v9897_v60 = vpack.c.bf16 %v929_v49, %v928_v48  ;;  %v7456_v49 = vld [vmem:[%s14657_s3 + $0x560] sm:$0xff] }
  0x44   : > { %7297 = vmatmul.mubr.msk.f32.gmra.mrb[12].mxu0 %vm624_vm1, %v603_v20 }
  0x45   : > { %811 = vmatprep.mubr.f32.mxu0 %v11048_v0  ;;  %9970 = vmatpush3.bf16.msra.mxu0 %v9969_v58  ;;  %v7466_v58 = vld [vmem:[%s14657_s3 + $0x5b0] sm:$0xff] }
  0x46   : > { %9972 = vmatprep.subr.bf16.mxu0 %v9971_v61  ;;  %v10017_v61 = vpack.c.bf16 %v7449_v54, %v7448_v53  ;;  %v10019_v3 = vpack.c.bf16 %v7467_v59, %v7466_v58  ;;  %v7367_v54 = vld [vmem:[%s14657_s3 + $0x298] sm:$0xff]  ;;  %v9913_v58 = vpack.c.bf16 %v7349_v45, %v7348_v44  ;;  %v7356_v45 = vld [vmem:[%s14657_s3 + $0x240] sm:$0xff] }
  0x48   : > { %7298 = vmatmul.mubr.msk.f32.gmra.mrb[14].mxu0 %vm624_vm1, %v604_v21  ;;  %v9885_v21 = vpack.c.bf16 %v923_v17, %v922_v16 }
  0x49   : > { %817 = vmatprep.mubr.f32.mxu0 %v11048_v0  ;;  %9974 = vmatpush3.bf16.msra.mxu0 %v9973_v2 }
  0x4a   : > { %10008 = vmatprep.subr.bf16.mxu0 %v10007_v5  ;;  %v7451_v5 = vld [vmem:[%s14657_s3 + $0x538] sm:$0xff] }
  0x4c   : > { %7299 = vmatmul.mubr.msk.f32.gmra.mrb[16].mxu0 %vm624_vm1, %v605_v22  ;;  %v924_v22 = vld [vmem:[%s14657_s3 + $0x20] sm:$0xff] }
  0x4d   : > { %823 = vmatprep.mubr.f32.mxu0 %v11048_v0 }
  0x50   : > { %7300 = vmatmul.mubr.msk.f32.gmra.mrb[18].mxu0 %vm624_vm1, %v606_v23  ;;  %v925_v23 = vld [vmem:[%s14657_s3 + $0x28] sm:$0xff] }
  0x51   : > { %829 = vmatprep.mubr.f32.mxu0 %v11048_v0 }
  0x54   : > { %7301 = vmatmul.mubr.msk.f32.gmra.mrb[20].mxu0 %vm624_vm1, %v607_v24 }
  0x55   : > { %835 = vmatprep.mubr.f32.mxu0 %v11048_v0 }
  0x58   : > { %7302 = vmatmul.mubr.msk.f32.gmra.mrb[22].mxu0 %vm624_vm1, %v608_v25  ;;  %v9887_v25 = vpack.c.bf16 %v941_v19, %v940_v18  ;;  %v10023_v18 = vpack.c.bf16 %v7469_v11, %v7468_v10  ;;  %v7452_v19 = vld [vmem:[%s14657_s3 + $0x540] sm:$0xff]  ;;  %v7525_v10 = vld [vmem:[%s14657_s3 + $0x788] sm:$0xff] }
  0x59   : > { %841 = vmatprep.mubr.f32.mxu0 %v11048_v0 }
  0x5c   : > { %7303 = vmatmul.mubr.msk.f32.gmra.mrb[24].mxu0 %vm624_vm1, %v609_v26  ;;  %v7444_v26 = vld [vmem:[%s14657_s3 + $0x500] sm:$0xff] }
  0x5d   : > { %847 = vmatprep.mubr.f32.mxu0 %v11048_v0 }
  0x60   : > { %7304 = vmatmul.mubr.msk.f32.gmra.mrb[26].mxu0 %vm624_vm1, %v610_v27  ;;  %v7445_v27 = vld [vmem:[%s14657_s3 + $0x508] sm:$0xff] }
  0x61   : > { %853 = vmatprep.mubr.f32.mxu0 %v11048_v0 }
  0x64   : > { %7305 = vmatmul.mubr.msk.f32.gmra.mrb[28].mxu0 %vm624_vm1, %v611_v28  ;;  %v942_v28 = vld [vmem:[%s14657_s3 + $0xb0] sm:$0xff] }
  0x65   : > { %859 = vmatprep.mubr.f32.mxu0 %v11048_v0 }
  0x68   : > { %7306 = vmatmul.mubr.msk.f32.gmra.mrb[30].mxu0 %vm624_vm1, %v612_v29  ;;  %v943_v29 = vld [vmem:[%s14657_s3 + $0xb8] sm:$0xff] }
  0x69   : > { %865 = vmatprep.mubr.f32.mxu0 %v11048_v0  ;;  %v9891_v38 = vpack.c.bf16 %v943_v29, %v942_v28 }
  0x6c   : > { %7307 = vmatmul.mubr.msk.f32.gmra.mrb[32].mxu0 %vm624_vm1, %v613_v30  ;;  %v7462_v30 = vld [vmem:[%s14657_s3 + $0x590] sm:$0xff] }
  0x6d   : > { %871 = vmatprep.mubr.f32.mxu0 %v11048_v0 }
  0x70   : > { %7308 = vmatmul.mubr.msk.f32.gmra.mrb[34].mxu0 %vm624_vm1, %v614_v31  ;;  %v7463_v31 = vld [vmem:[%s14657_s3 + $0x598] sm:$0xff] }
  0x71   : > { %877 = vmatprep.mubr.f32.mxu0 %v11048_v0  ;;  %v10011_v39 = vpack.c.bf16 %v7463_v31, %v7462_v30  ;;  %v934_v30 = vld [vmem:[%s14657_s3 + $0x70] sm:$0xff]  ;;  %v935_v31 = vld [vmem:[%s14657_s3 + $0x78] sm:$0xff] }
  0x72   : > { %v9909_v42 = vpack.c.bf16 %v935_v31, %v934_v30  ;;  %v7354_v30 = vld [vmem:[%s14657_s3 + $0x230] sm:$0xff]  ;;  %v7355_v31 = vld [vmem:[%s14657_s3 + $0x238] sm:$0xff] }
  0x74   : > { %7309 = vmatmul.mubr.msk.f32.gmra.mrb[36].mxu0 %vm624_vm1, %v615_v32 }
  0x75   : > { %883 = vmatprep.mubr.f32.mxu0 %v11048_v0 }
  0x78   : > { %7310 = vmatmul.mubr.msk.f32.gmra.mrb[38].mxu0 %vm624_vm1, %v616_v33  ;;  %v9889_v33 = vpack.c.bf16 %v925_v23, %v924_v22  ;;  %v950_v22 = vld [vmem:[%s14657_s3 + $0xf0] sm:$0xff] }
  0x79   : > { %889 = vmatprep.mubr.f32.mxu0 %v11048_v0 }
  0x7c   : > { %7311 = vmatmul.mubr.msk.f32.gmra.mrb[40].mxu0 %vm624_vm1, %v617_v34  ;;  %v10009_v34 = vpack.c.bf16 %v7445_v27, %v7444_v26  ;;  %v7470_v26 = vld [vmem:[%s14657_s3 + $0x5d0] sm:$0xff]  ;;  %v7471_v27 = vld [vmem:[%s14657_s3 + $0x5d8] sm:$0xff] }
  0x7d   : > { %895 = vmatprep.mubr.f32.mxu0 %v11048_v0 }
  0x80   : > { %7312 = vmatmul.mubr.msk.f32.gmra.mrb[42].mxu0 %vm624_vm1, %v618_v35  ;;  %v926_v35 = vld [vmem:[%s14657_s3 + $0x30] sm:$0xff] }
  0x81   : > { %901 = vmatprep.mubr.f32.mxu0 %v11048_v0  ;;  %v9893_v46 = vpack.c.bf16 %v927_v36, %v926_v35  ;;  %v7454_v35 = vld [vmem:[%s14657_s3 + $0x550] sm:$0xff]  ;;  %v7455_v36 = vld [vmem:[%s14657_s3 + $0x558] sm:$0xff] }
  0x82   : > { %v10029_v43 = vpack.c.bf16 %v7455_v36, %v7454_v35  ;;  %v7511_v36 = vld [vmem:[%s14657_s3 + $0x718] sm:$0xff] }
  0x84   : > { %7313 = vmatmul.mubr.msk.f32.gmra.mrb[44].mxu0 %vm624_vm1, %v619_v47  ;;  %v10013_v47 = vpack.c.bf16 %v7447_v41, %v7446_v40  ;;  %v7472_v40 = vld [vmem:[%s14657_s3 + $0x5e0] sm:$0xff]  ;;  %v7473_v41 = vld [vmem:[%s14657_s3 + $0x5e8] sm:$0xff] }
  0x85   : > { %907 = vmatprep.mubr.f32.mxu0 %v11048_v0  ;;  %v10031_v48 = vpack.c.bf16 %v7473_v41, %v7472_v40  ;;  %v7373_v40 = vld [vmem:[%s14657_s3 + $0x2c8] sm:$0xff]  ;;  %v7528_v41 = vld [vmem:[%s14657_s3 + $0x7a0] sm:$0xff] }
  0x88   : > { %7314 = vmatmul.mubr.msk.f32.gmra.mrb[46].mxu0 %vm624_vm1, %v620_v57  ;;  %v947_v57 = vld [vmem:[%s14657_s3 + $0xd8] sm:$0xff] }
  0x89   : > { %913 = vmatprep.mubr.f32.mxu0 %v11048_v0  ;;  %v9899_v2 = vpack.c.bf16 %v947_v57, %v946_v55  ;;  %v7474_v55 = vld [vmem:[%s14657_s3 + $0x5f0] sm:$0xff]  ;;  %v7475_v57 = vld [vmem:[%s14657_s3 + $0x5f8] sm:$0xff] }
  0x8c   : > { %7315 = vmatmul.mubr.msk.f32.gmra.mrb[48].mxu0 %vm624_vm1, %v621_v62  ;;  %v930_v62 = vld [vmem:[%s14657_s3 + $0x50] sm:$0xff] }
  0xff   : > { %v11535_v6 = vpop.f32.mrb[0].mxu0 }
 0x100   : > { %v773_v7 = vpop.f32.mrb[1].mxu0 }
 0x103   : > { %v777_v12 = vpop.f32.mrb[2].mxu0 }
 0x104   : > { %v779_v14 = vpop.f32.mrb[3].mxu0 }
 0x105   : > { %1049 = vmatprep.mubr.f32.mxu1 %v779_v14  ;;  %v932_v14 = vld [vmem:[%s14657_s3 + $0x60] sm:$0xff] }
 0x106   : > { %1050 = vmatmul.mubr.f32.vlgmr.msra.gmra.mrb[0].mxu1 %v777_v12  ;;  %v9901_v12 = vpack.c.bf16 %v931_v63, %v930_v62 }
 0x107   : > { %9882 = vmatpush3.bf16.msra.mxu1 %v9881_v13  ;;  %1119 = vmatprep.mubr.f32.mxu1 %v773_v7  ;;  %v11561_v20 = vpop.f32.mrb[4].mxu0  ;;  %v948_v7 = vld [vmem:[%s14657_s3 + $0xe0] sm:$0xff]  ;;  %v10021_v13 = vpack.c.bf16 %v7451_v5, %v7450_v4  ;;  %v7459_v4 = vld [vmem:[%s14657_s3 + $0x578] sm:$0xff] }
 0x108   : > { %9884 = vmatprep.subr.bf16.mxu1 %v9883_v15  ;;  %v11569_v24 = vpop.f32.mrb[5].mxu0  ;;  %v933_v15 = vld [vmem:[%s14657_s3 + $0x68] sm:$0xff]  ;;  %v9903_v17 = vpack.c.bf16 %v949_v9, %v948_v7  ;;  %v7368_v5 = vld [vmem:[%s14657_s3 + $0x2a0] sm:$0xff] }
 0x109   : > { %v9905_v28 = vpack.c.bf16 %v933_v15, %v932_v14  ;;  %v7524_v9 = vld [vmem:[%s14657_s3 + $0x780] sm:$0xff]  ;;  %v7353_v14 = vld [vmem:[%s14657_s3 + $0x228] sm:$0xff] }
 0x10b   : > { %9886 = vmatpush3.bf16.msra.mxu1 %v9885_v21  ;;  %v789_v32 = vpop.f32.mrb[6].mxu0  ;;  %v7453_v21 = vld [vmem:[%s14657_s3 + $0x548] sm:$0xff] }
 0x10c   : > { %v791_v37 = vpop.f32.mrb[7].mxu0  ;;  %9888 = vmatprep.subr.bf16.mxu1 %v9887_v25  ;;  %v951_v25 = vld [vmem:[%s14657_s3 + $0xf8] sm:$0xff]  ;;  %v10025_v29 = vpack.c.bf16 %v7453_v21, %v7452_v19  ;;  %v7509_v19 = vld [vmem:[%s14657_s3 + $0x708] sm:$0xff]  ;;  %v7370_v21 = vld [vmem:[%s14657_s3 + $0x2b0] sm:$0xff] }
 0x10d   : > { %1326 = vmatprep.mubr.f32.mxu0 %v791_v37  ;;  %v7364_v37 = vld [vmem:[%s14657_s3 + $0x280] sm:$0xff] }
 0x10e   : > { %1327 = vmatmul.mubr.f32.vlgmr.msra.gmra.mrb[50].mxu0 %v789_v32 }
 0x10f   : > { %9890 = vmatpush3.bf16.msra.mxu1 %v9889_v33  ;;  %10010 = vmatpush3.bf16.msra.mxu0 %v10009_v34  ;;  %v11619_v50 = vpop.f32.mrb[8].mxu0  ;;  %v9907_v33 = vpack.c.bf16 %v951_v25, %v950_v22  ;;  %v10027_v34 = vpack.c.bf16 %v7471_v27, %v7470_v26  ;;  %v7371_v25 = vld [vmem:[%s14657_s3 + $0x2b8] sm:$0xff]  ;;  %v7526_v26 = vld [vmem:[%s14657_s3 + $0x790] sm:$0xff] }
 0x110   : > { %9892 = vmatprep.subr.bf16.mxu1 %v9891_v38  ;;  %10012 = vmatprep.subr.bf16.mxu0 %v10011_v39  ;;  %v11630_v56 = vpop.f32.mrb[9].mxu0  ;;  %v7365_v39 = vld [vmem:[%s14657_s3 + $0x288] sm:$0xff]  ;;  %v7527_v27 = vld [vmem:[%s14657_s3 + $0x798] sm:$0xff] }
 0x111   : > { %v10075_v35 = vpack.c.bf16 %v7527_v27, %v7526_v26  ;;  %v7517_v26 = vld [vmem:[%s14657_s3 + $0x748] sm:$0xff]  ;;  %v7378_v27 = vld [vmem:[%s14657_s3 + $0x2f0] sm:$0xff] }
 0x113   : > { %9894 = vmatpush3.bf16.msra.mxu1 %v9893_v46  ;;  %10014 = vmatpush3.bf16.msra.mxu0 %v10013_v47  ;;  %v11647_v1 = vpop.f32.mrb[10].mxu0  ;;  %v9911_v47 = vpack.c.bf16 %v7365_v39, %v7364_v37  ;;  %v7372_v37 = vld [vmem:[%s14657_s3 + $0x2c0] sm:$0xff] }
 0x114   : > { %9896 = vmatprep.subr.bf16.mxu1 %v9895_v51  ;;  %10016 = vmatprep.subr.bf16.mxu0 %v10015_v52  ;;  %v803_v8 = vpop.f32.mrb[11].mxu0  ;;  %v7457_v51 = vld [vmem:[%s14657_s3 + $0x568] sm:$0xff]  ;;  %v7366_v52 = vld [vmem:[%s14657_s3 + $0x290] sm:$0xff] }
 0x115   : > { %1534 = vmatprep.mubr.f32.mxu0 %v803_v8  ;;  %v10033_v59 = vpack.c.bf16 %v7457_v51, %v7456_v49  ;;  %v9915_v63 = vpack.c.bf16 %v7367_v54, %v7366_v52  ;;  %v7369_v8 = vld [vmem:[%s14657_s3 + $0x2a8] sm:$0xff]  ;;  %v9927_v49 = vpack.c.bf16 %v7373_v40, %v7372_v37  ;;  %v7374_v54 = vld [vmem:[%s14657_s3 + $0x2d0] sm:$0xff] }
 0x116   : > { %v7513_v52 = vld [vmem:[%s14657_s3 + $0x728] sm:$0xff]  ;;  %v7518_v40 = vld [vmem:[%s14657_s3 + $0x750] sm:$0xff] }
 0x117   : > { %9898 = vmatpush3.bf16.msra.mxu1 %v9897_v60  ;;  %10018 = vmatpush3.bf16.msra.mxu0 %v10017_v61  ;;  %v11673_v16 = vpop.f32.mrb[12].mxu0  ;;  %v7350_v60 = vld [vmem:[%s14657_s3 + $0x210] sm:$0xff]  ;;  %v7351_v61 = vld [vmem:[%s14657_s3 + $0x218] sm:$0xff] }
 0x118   : > { %9900 = vmatprep.subr.bf16.mxu1 %v9899_v2  ;;  %10020 = vmatprep.subr.bf16.mxu0 %v10019_v3  ;;  %v11684_v23 = vpop.f32.mrb[13].mxu0  ;;  %v10035_v2 = vpack.c.bf16 %v7475_v57, %v7474_v55  ;;  %v7458_v3 = vld [vmem:[%s14657_s3 + $0x570] sm:$0xff]  ;;  %v9917_v11 = vpack.c.bf16 %v7351_v61, %v7350_v60  ;;  %v7375_v57 = vld [vmem:[%s14657_s3 + $0x2d8] sm:$0xff] }
 0x11b   : > { %9902 = vmatpush3.bf16.msra.mxu1 %v9901_v12  ;;  %10022 = vmatpush3.bf16.msra.mxu0 %v10021_v13  ;;  %v11701_v32 = vpop.f32.mrb[14].mxu0  ;;  %v10037_v12 = vpack.c.bf16 %v7459_v4, %v7458_v3  ;;  %v7352_v13 = vld [vmem:[%s14657_s3 + $0x220] sm:$0xff]  ;;  %v9931_v4 = vpack.c.bf16 %v7375_v57, %v7374_v54 }
 0x11c   : > { %9904 = vmatprep.subr.bf16.mxu1 %v9903_v17  ;;  %10024 = vmatprep.subr.bf16.mxu0 %v10023_v18  ;;  %v11712_v38 = vpop.f32.mrb[15].mxu0  ;;  %v9919_v17 = vpack.c.bf16 %v7369_v8, %v7368_v5  ;;  %v10071_v18 = vpack.c.bf16 %v7525_v10, %v7524_v9  ;;  %v7515_v8 = vld [vmem:[%s14657_s3 + $0x738] sm:$0xff]  ;;  %v7376_v9 = vld [vmem:[%s14657_s3 + $0x2e0] sm:$0xff] }
 0x11d   : > { %v7520_v57 = vld [vmem:[%s14657_s3 + $0x760] sm:$0xff] }
 0x11f   : > { %9906 = vmatpush3.bf16.msra.mxu1 %v9905_v28  ;;  %10026 = vmatpush3.bf16.msra.mxu0 %v10025_v29  ;;  %v11729_v46 = vpop.f32.mrb[16].mxu0  ;;  %v9921_v28 = vpack.c.bf16 %v7353_v14, %v7352_v13  ;;  %v7533_v13 = vld [vmem:[%s14657_s3 + $0x7c8] sm:$0xff] }
 0x120   : > { %9908 = vmatprep.subr.bf16.mxu1 %v9907_v33  ;;  %10028 = vmatprep.subr.bf16.mxu0 %v10027_v34  ;;  %v11740_v53 = vpop.f32.mrb[17].mxu0  ;;  %v9923_v34 = vpack.c.bf16 %v7371_v25, %v7370_v21  ;;  %v7516_v25 = vld [vmem:[%s14657_s3 + $0x740] sm:$0xff] }
 0x123   : > { %9910 = vmatpush3.bf16.msra.mxu1 %v9909_v42  ;;  %10030 = vmatpush3.bf16.msra.mxu0 %v10029_v43  ;;  %v11757_v62 = vpop.f32.mrb[18].mxu0  ;;  %v7529_v42 = vld [vmem:[%s14657_s3 + $0x7a8] sm:$0xff]  ;;  %v9925_v43 = vpack.c.bf16 %v7355_v31, %v7354_v30  ;;  %v7535_v30 = vld [vmem:[%s14657_s3 + $0x7d8] sm:$0xff] }
 0x124   : > { %9912 = vmatprep.subr.bf16.mxu1 %v9911_v47  ;;  %10032 = vmatprep.subr.bf16.mxu0 %v10031_v48  ;;  %v11768_v7 = vpop.f32.mrb[19].mxu0  ;;  %v7357_v47 = vld [vmem:[%s14657_s3 + $0x248] sm:$0xff]  ;;  %v10079_v51 = vpack.c.bf16 %v7529_v42, %v7528_v41  ;;  %v7519_v41 = vld [vmem:[%s14657_s3 + $0x758] sm:$0xff]  ;;  %v7428_v42 = vld [vmem:[%s14657_s3 + $0x480] sm:$0xff] }
 0x125   : > { %v9929_v60 = vpack.c.bf16 %v7357_v47, %v7356_v45  ;;  %v7537_v45 = vld [vmem:[%s14657_s3 + $0x7e8] sm:$0xff] }
 0x126   : > { %1120 = vmatmul.mubr.f32.vlgmr.msra.gmra.mrb[2].mxu1 %v11535_v6  ;;  %v7508_v6 = vld [vmem:[%s14657_s3 + $0x700] sm:$0xff] }
 0x127   : > { %9914 = vmatpush3.bf16.msra.mxu1 %v9913_v58  ;;  %10034 = vmatpush3.bf16.msra.mxu0 %v10033_v59  ;;  %v11786_v15 = vpop.f32.mrb[20].mxu0  ;;  %v10073_v29 = vpack.c.bf16 %v7509_v19, %v7508_v6  ;;  %v7530_v58 = vld [vmem:[%s14657_s3 + $0x7b0] sm:$0xff]  ;;  %v7531_v59 = vld [vmem:[%s14657_s3 + $0x7b8] sm:$0xff]  ;;  %v7361_v6 = vld [vmem:[%s14657_s3 + $0x268] sm:$0xff] }
 0x128   : > { %9916 = vmatprep.subr.bf16.mxu1 %v9915_v63  ;;  %10036 = vmatprep.subr.bf16.mxu0 %v10035_v2  ;;  %v11797_v22 = vpop.f32.mrb[21].mxu0  ;;  %v7358_v63 = vld [vmem:[%s14657_s3 + $0x250] sm:$0xff]  ;;  %v7359_v2 = vld [vmem:[%s14657_s3 + $0x258] sm:$0xff]  ;;  %v10083_v5 = vpack.c.bf16 %v7531_v59, %v7530_v58  ;;  %v7521_v58 = vld [vmem:[%s14657_s3 + $0x768] sm:$0xff] }
 0x129   : > { %1222 = vmatprep.mubr.f32.mxu1 %v11569_v24  ;;  %v7510_v24 = vld [vmem:[%s14657_s3 + $0x710] sm:$0xff]  ;;  %v9933_v14 = vpack.c.bf16 %v7359_v2, %v7358_v63  ;;  %v7539_v63 = vld [vmem:[%s14657_s3 + $0x7f8] sm:$0xff] }
 0x12a   : > { %v10077_v44 = vpack.c.bf16 %v7511_v36, %v7510_v24  ;;  %v7363_v24 = vld [vmem:[%s14657_s3 + $0x278] sm:$0xff]  ;;  %v7430_v59 = vld [vmem:[%s14657_s3 + $0x490] sm:$0xff] }
 0x12b   : > { %9918 = vmatpush3.bf16.msra.mxu1 %v9917_v11  ;;  %10038 = vmatpush3.bf16.msra.mxu0 %v10037_v12  ;;  %v11815_v33 = vpop.f32.mrb[22].mxu0  ;;  %v7377_v11 = vld [vmem:[%s14657_s3 + $0x2e8] sm:$0xff]  ;;  %v7532_v12 = vld [vmem:[%s14657_s3 + $0x7c0] sm:$0xff] }
 0x12c   : > { %9920 = vmatprep.subr.bf16.mxu1 %v9919_v17  ;;  %10072 = vmatprep.subr.bf16.mxu0 %v10071_v18  ;;  %v11826_v39 = vpop.f32.mrb[23].mxu0  ;;  %v7360_v18 = vld [vmem:[%s14657_s3 + $0x260] sm:$0xff]  ;;  %v9935_v19 = vpack.c.bf16 %v7377_v11, %v7376_v9  ;;  %v10087_v21 = vpack.c.bf16 %v7533_v13, %v7532_v12  ;;  %v7522_v11 = vld [vmem:[%s14657_s3 + $0x770] sm:$0xff]  ;;  %v7523_v12 = vld [vmem:[%s14657_s3 + $0x778] sm:$0xff] }
 0x12d   : > { %v9937_v31 = vpack.c.bf16 %v7361_v6, %v7360_v18  ;;  %v7432_v13 = vld [vmem:[%s14657_s3 + $0x4a0] sm:$0xff]  ;;  %v7589_v18 = vld [vmem:[%s14657_s3 + $0x988] sm:$0xff] }
 0x12e   : > { %1535 = vmatmul.mubr.f32.vlgmr.msra.gmra.mrb[52].mxu0 %v11647_v1  ;;  %v7512_v1 = vld [vmem:[%s14657_s3 + $0x720] sm:$0xff] }
 0x12f   : > { %9922 = vmatpush3.bf16.msra.mxu1 %v9921_v28  ;;  %10074 = vmatpush3.bf16.msra.mxu0 %v10073_v29  ;;  %v11844_v48 = vpop.f32.mrb[24].mxu0  ;;  %v10081_v61 = vpack.c.bf16 %v7513_v52, %v7512_v1  ;;  %v7379_v28 = vld [vmem:[%s14657_s3 + $0x2f8] sm:$0xff]  ;;  %v7534_v29 = vld [vmem:[%s14657_s3 + $0x7d0] sm:$0xff]  ;;  %v7413_v1 = vld [vmem:[%s14657_s3 + $0x408] sm:$0xff] }
 0x130   : > { %9924 = vmatprep.subr.bf16.mxu1 %v9923_v34  ;;  %10076 = vmatprep.subr.bf16.mxu0 %v10075_v35  ;;  %v11855_v55 = vpop.f32.mrb[25].mxu0  ;;  %v10089_v34 = vpack.c.bf16 %v7517_v26, %v7516_v25  ;;  %v7362_v35 = vld [vmem:[%s14657_s3 + $0x270] sm:$0xff]  ;;  %v9939_v36 = vpack.c.bf16 %v7379_v28, %v7378_v27  ;;  %v10091_v37 = vpack.c.bf16 %v7535_v30, %v7534_v29  ;;  %v7417_v25 = vld [vmem:[%s14657_s3 + $0x428] sm:$0xff] }
 0x131   : > { %1742 = vmatprep.mubr.f32.mxu0 %v11712_v38  ;;  %v7514_v38 = vld [vmem:[%s14657_s3 + $0x730] sm:$0xff]  ;;  %v9941_v47 = vpack.c.bf16 %v7363_v24, %v7362_v35  ;;  %v7573_v29 = vld [vmem:[%s14657_s3 + $0x908] sm:$0xff]  ;;  %v7591_v24 = vld [vmem:[%s14657_s3 + $0x998] sm:$0xff] }
 0x132   : > { %v10085_v17 = vpack.c.bf16 %v7515_v8, %v7514_v38  ;;  %v7415_v38 = vld [vmem:[%s14657_s3 + $0x418] sm:$0xff]  ;;  %v7434_v30 = vld [vmem:[%s14657_s3 + $0x4b0] sm:$0xff] }
 0x133   : > { %9926 = vmatpush3.bf16.msra.mxu1 %v9925_v43  ;;  %10078 = vmatpush3.bf16.msra.mxu0 %v10077_v44  ;;  %v11873_v3 = vpop.f32.mrb[26].mxu0  ;;  %v7429_v43 = vld [vmem:[%s14657_s3 + $0x488] sm:$0xff]  ;;  %v7536_v44 = vld [vmem:[%s14657_s3 + $0x7e0] sm:$0xff]  ;;  %v7590_v35 = vld [vmem:[%s14657_s3 + $0x990] sm:$0xff] }
 0x134   : > { %9928 = vmatprep.subr.bf16.mxu1 %v9927_v49  ;;  %10080 = vmatprep.subr.bf16.mxu0 %v10079_v51  ;;  %v11884_v10 = vpop.f32.mrb[27].mxu0  ;;  %v10093_v49 = vpack.c.bf16 %v7519_v41, %v7518_v40  ;;  %v7412_v51 = vld [vmem:[%s14657_s3 + $0x400] sm:$0xff]  ;;  %v9975_v52 = vpack.c.bf16 %v7429_v43, %v7428_v42  ;;  %v10095_v54 = vpack.c.bf16 %v7537_v45, %v7536_v44  ;;  %v7418_v40 = vld [vmem:[%s14657_s3 + $0x430] sm:$0xff]  ;;  %v7419_v41 = vld [vmem:[%s14657_s3 + $0x438] sm:$0xff] }
 0x135   : > { %v9977_v2 = vpack.c.bf16 %v7413_v1, %v7412_v51  ;;  %v10139_v44 = vpack.c.bf16 %v7591_v24, %v7590_v35  ;;  %v7575_v45 = vld [vmem:[%s14657_s3 + $0x918] sm:$0xff]  ;;  %v7437_v51 = vld [vmem:[%s14657_s3 + $0x4c8] sm:$0xff]  ;;  %v7592_v1 = vld [vmem:[%s14657_s3 + $0x9a0] sm:$0xff] }
 0x136   : > { %v7581_v35 = vld [vmem:[%s14657_s3 + $0x948] sm:$0xff]  ;;  %v7442_v24 = vld [vmem:[%s14657_s3 + $0x4f0] sm:$0xff] }
 0x137   : > { %9930 = vmatpush3.bf16.msra.mxu1 %v9929_v60  ;;  %10082 = vmatpush3.bf16.msra.mxu0 %v10081_v61  ;;  %v7431_v60 = vld [vmem:[%s14657_s3 + $0x498] sm:$0xff]  ;;  %v7538_v61 = vld [vmem:[%s14657_s3 + $0x7f0] sm:$0xff]  ;;  %v11998_v26 = vpop.f32.mrb[28].mxu0 }
 0x138   : > { %9932 = vmatprep.subr.bf16.mxu1 %v9931_v4  ;;  %10084 = vmatprep.subr.bf16.mxu0 %v10083_v5  ;;  %v10097_v4 = vpack.c.bf16 %v7521_v58, %v7520_v57  ;;  %v7414_v5 = vld [vmem:[%s14657_s3 + $0x410] sm:$0xff]  ;;  %v9979_v8 = vpack.c.bf16 %v7431_v60, %v7430_v59  ;;  %v10099_v9 = vpack.c.bf16 %v7539_v63, %v7538_v61  ;;  %v7420_v58 = vld [vmem:[%s14657_s3 + $0x440] sm:$0xff]  ;;  %v7421_v59 = vld [vmem:[%s14657_s3 + $0x448] sm:$0xff] }
 0x139   : > { %v9981_v6 = vpack.c.bf16 %v7415_v38, %v7414_v5  ;;  %v7577_v63 = vld [vmem:[%s14657_s3 + $0x928] sm:$0xff]  ;;  %v7594_v5 = vld [vmem:[%s14657_s3 + $0x9b0] sm:$0xff]  ;;  %v7595_v38 = vld [vmem:[%s14657_s3 + $0x9b8] sm:$0xff] }
 0x13b   : > { %9934 = vmatpush3.bf16.msra.mxu1 %v9933_v14  ;;  %10086 = vmatpush3.bf16.msra.mxu0 %v10085_v17  ;;  %v7433_v14 = vld [vmem:[%s14657_s3 + $0x4a8] sm:$0xff]  ;;  %v7588_v17 = vld [vmem:[%s14657_s3 + $0x980] sm:$0xff] }
 0x13c   : > { %9936 = vmatprep.subr.bf16.mxu1 %v9935_v19  ;;  %10088 = vmatprep.subr.bf16.mxu0 %v10087_v21  ;;  %v10101_v19 = vpack.c.bf16 %v7523_v12, %v7522_v11  ;;  %v7416_v21 = vld [vmem:[%s14657_s3 + $0x420] sm:$0xff]  ;;  %v9983_v27 = vpack.c.bf16 %v7433_v14, %v7432_v13  ;;  %v10135_v28 = vpack.c.bf16 %v7589_v18, %v7588_v17  ;;  %v7422_v11 = vld [vmem:[%s14657_s3 + $0x450] sm:$0xff]  ;;  %v7423_v12 = vld [vmem:[%s14657_s3 + $0x458] sm:$0xff] }
 0x13d   : > { %v10147_v14 = vpack.c.bf16 %v7595_v38, %v7594_v5  ;;  %v7579_v17 = vld [vmem:[%s14657_s3 + $0x938] sm:$0xff]  ;;  %v7440_v18 = vld [vmem:[%s14657_s3 + $0x4e0] sm:$0xff]  ;;  %v7585_v5 = vld [vmem:[%s14657_s3 + $0x968] sm:$0xff] }
 0x13e   : > { %v7494_v38 = vld [vmem:[%s14657_s3 + $0x690] sm:$0xff] }
 0x13f   : > { %9938 = vmatpush3.bf16.msra.mxu1 %v9937_v31  ;;  %10090 = vmatpush3.bf16.msra.mxu0 %v10089_v34  ;;  %v12009_v31 = vpop.f32.mrb[29].mxu0  ;;  %v7435_v34 = vld [vmem:[%s14657_s3 + $0x4b8] sm:$0xff] }
 0x140   : > { %9940 = vmatprep.subr.bf16.mxu1 %v9939_v36  ;;  %10092 = vmatprep.subr.bf16.mxu0 %v10091_v37  ;;  %v9985_v36 = vpack.c.bf16 %v7417_v25, %v7416_v21  ;;  %v12027_v42 = vpop.f32.mrb[30].mxu0  ;;  %v9987_v43 = vpack.c.bf16 %v7435_v34, %v7434_v30  ;;  %v7597_v21 = vld [vmem:[%s14657_s3 + $0x9c8] sm:$0xff]  ;;  %v9997_v25 = vpack.c.bf16 %v7423_v12, %v7422_v11  ;;  %v7580_v34 = vld [vmem:[%s14657_s3 + $0x940] sm:$0xff]  ;;  %v7603_v11 = vld [vmem:[%s14657_s3 + $0x9f8] sm:$0xff] }
 0x143   : > { %9942 = vmatpush3.bf16.msra.mxu1 %v9941_v47  ;;  %10094 = vmatpush3.bf16.msra.mxu0 %v10093_v49  ;;  %v7436_v47 = vld [vmem:[%s14657_s3 + $0x4c0] sm:$0xff]  ;;  %v12038_v49 = vpop.f32.mrb[31].mxu0 }
 0x144   : > { %9976 = vmatprep.subr.bf16.mxu1 %v9975_v52  ;;  %10096 = vmatprep.subr.bf16.mxu0 %v10095_v54  ;;  %v7593_v52 = vld [vmem:[%s14657_s3 + $0x9a8] sm:$0xff]  ;;  %v9989_v54 = vpack.c.bf16 %v7419_v41, %v7418_v40  ;;  %v9991_v60 = vpack.c.bf16 %v7437_v51, %v7436_v47  ;;  %v7599_v40 = vld [vmem:[%s14657_s3 + $0x9d8] sm:$0xff]  ;;  %v7582_v51 = vld [vmem:[%s14657_s3 + $0x950] sm:$0xff] }
 0x145   : > { %v10143_v61 = vpack.c.bf16 %v7593_v52, %v7592_v1  ;;  %v7583_v1 = vld [vmem:[%s14657_s3 + $0x958] sm:$0xff]  ;;  %v7492_v52 = vld [vmem:[%s14657_s3 + $0x680] sm:$0xff] }
 0x146   : > { %1223 = vmatmul.mubr.f32.vlgmr.msra.gmra.mrb[4].mxu1 %v11561_v20  ;;  %v7572_v20 = vld [vmem:[%s14657_s3 + $0x900] sm:$0xff] }
 0x147   : > { %9978 = vmatpush3.bf16.msra.mxu1 %v9977_v2  ;;  %10098 = vmatpush3.bf16.msra.mxu0 %v10097_v4  ;;  %v10137_v37 = vpack.c.bf16 %v7573_v29, %v7572_v20  ;;  %v7438_v2 = vld [vmem:[%s14657_s3 + $0x4d0] sm:$0xff]  ;;  %v7439_v4 = vld [vmem:[%s14657_s3 + $0x4d8] sm:$0xff]  ;;  %v7425_v20 = vld [vmem:[%s14657_s3 + $0x468] sm:$0xff] }
 0x148   : > { %9980 = vmatprep.subr.bf16.mxu1 %v9979_v8  ;;  %10100 = vmatprep.subr.bf16.mxu0 %v10099_v9  ;;  %v9993_v8 = vpack.c.bf16 %v7421_v59, %v7420_v58  ;;  %v9995_v13 = vpack.c.bf16 %v7439_v4, %v7438_v2  ;;  %v7601_v58 = vld [vmem:[%s14657_s3 + $0x9e8] sm:$0xff]  ;;  %v7584_v4 = vld [vmem:[%s14657_s3 + $0x960] sm:$0xff] }
 0x149   : > { %1430 = vmatprep.mubr.f32.mxu1 %v11630_v56  ;;  %v7574_v56 = vld [vmem:[%s14657_s3 + $0x910] sm:$0xff] }
 0x14a   : > { %v10141_v57 = vpack.c.bf16 %v7575_v45, %v7574_v56  ;;  %v7427_v56 = vld [vmem:[%s14657_s3 + $0x478] sm:$0xff] }
 0x14b   : > { %9982 = vmatpush3.bf16.msra.mxu1 %v9981_v6  ;;  %10102 = vmatpush3.bf16.msra.mxu0 %v10101_v19  ;;  %v7441_v6 = vld [vmem:[%s14657_s3 + $0x4e8] sm:$0xff]  ;;  %v7596_v19 = vld [vmem:[%s14657_s3 + $0x9c0] sm:$0xff] }
 0x14c   : > { %9984 = vmatprep.subr.bf16.mxu1 %v9983_v27  ;;  %10136 = vmatprep.subr.bf16.mxu0 %v10135_v28  ;;  %v7424_v28 = vld [vmem:[%s14657_s3 + $0x460] sm:$0xff]  ;;  %v9999_v29 = vpack.c.bf16 %v7441_v6, %v7440_v18  ;;  %v10151_v30 = vpack.c.bf16 %v7597_v21, %v7596_v19  ;;  %v7586_v6 = vld [vmem:[%s14657_s3 + $0x970] sm:$0xff]  ;;  %v7587_v19 = vld [vmem:[%s14657_s3 + $0x978] sm:$0xff] }
 0x14d   : > { %v10001_v41 = vpack.c.bf16 %v7425_v20, %v7424_v28  ;;  %v7496_v21 = vld [vmem:[%s14657_s3 + $0x6a0] sm:$0xff]  ;;  %v7653_v28 = vld [vmem:[%s14657_s3 + $0xb88] sm:$0xff] }
 0x14e   : > { %1743 = vmatmul.mubr.f32.vlgmr.msra.gmra.mrb[54].mxu0 %v11701_v32  ;;  %v7576_v32 = vld [vmem:[%s14657_s3 + $0x920] sm:$0xff] }
 0x14f   : > { %9986 = vmatpush3.bf16.msra.mxu1 %v9985_v36  ;;  %10138 = vmatpush3.bf16.msra.mxu0 %v10137_v37  ;;  %v10145_v9 = vpack.c.bf16 %v7577_v63, %v7576_v32  ;;  %v7443_v36 = vld [vmem:[%s14657_s3 + $0x4f8] sm:$0xff]  ;;  %v7598_v37 = vld [vmem:[%s14657_s3 + $0x9d0] sm:$0xff]  ;;  %v7477_v32 = vld [vmem:[%s14657_s3 + $0x608] sm:$0xff] }
 0x150   : > { %9988 = vmatprep.subr.bf16.mxu1 %v9987_v43  ;;  %10140 = vmatprep.subr.bf16.mxu0 %v10139_v44  ;;  %v10153_v43 = vpack.c.bf16 %v7581_v35, %v7580_v34  ;;  %v7426_v44 = vld [vmem:[%s14657_s3 + $0x470] sm:$0xff]  ;;  %v10003_v45 = vpack.c.bf16 %v7443_v36, %v7442_v24  ;;  %v10155_v47 = vpack.c.bf16 %v7599_v40, %v7598_v37  ;;  %v7481_v34 = vld [vmem:[%s14657_s3 + $0x628] sm:$0xff]  ;;  %v12202_v35 = vpop.f32.mrb[32].mxu0 }
 0x151   : > { %1950 = vmatprep.mubr.f32.mxu0 %v11768_v7  ;;  %v7578_v7 = vld [vmem:[%s14657_s3 + $0x930] sm:$0xff]  ;;  %v10005_v59 = vpack.c.bf16 %v7427_v56, %v7426_v44  ;;  %v7637_v37 = vld [vmem:[%s14657_s3 + $0xb08] sm:$0xff]  ;;  %v7655_v56 = vld [vmem:[%s14657_s3 + $0xb98] sm:$0xff] }
 0x152   : > { %v10149_v27 = vpack.c.bf16 %v7579_v17, %v7578_v7  ;;  %v7479_v7 = vld [vmem:[%s14657_s3 + $0x618] sm:$0xff]  ;;  %v7498_v40 = vld [vmem:[%s14657_s3 + $0x6b0] sm:$0xff] }
 0x153   : > { %9990 = vmatpush3.bf16.msra.mxu1 %v9989_v54  ;;  %10142 = vmatpush3.bf16.msra.mxu0 %v10141_v57  ;;  %v7493_v54 = vld [vmem:[%s14657_s3 + $0x688] sm:$0xff]  ;;  %v7600_v57 = vld [vmem:[%s14657_s3 + $0x9e0] sm:$0xff]  ;;  %v7654_v44 = vld [vmem:[%s14657_s3 + $0xb90] sm:$0xff] }
 0x154   : > { %9992 = vmatprep.subr.bf16.mxu1 %v9991_v60  ;;  %10144 = vmatprep.subr.bf16.mxu0 %v10143_v61  ;;  %v10157_v60 = vpack.c.bf16 %v7583_v1, %v7582_v51  ;;  %v7476_v61 = vld [vmem:[%s14657_s3 + $0x600] sm:$0xff]  ;;  %v10039_v63 = vpack.c.bf16 %v7493_v54, %v7492_v52  ;;  %v10159_v2 = vpack.c.bf16 %v7601_v58, %v7600_v57  ;;  %v7482_v51 = vld [vmem:[%s14657_s3 + $0x630] sm:$0xff]  ;;  %v7483_v1 = vld [vmem:[%s14657_s3 + $0x638] sm:$0xff] }
 0x155   : > { %v10041_v12 = vpack.c.bf16 %v7477_v32, %v7476_v61  ;;  %v10203_v57 = vpack.c.bf16 %v7655_v56, %v7654_v44  ;;  %v7639_v58 = vld [vmem:[%s14657_s3 + $0xb18] sm:$0xff]  ;;  %v7501_v61 = vld [vmem:[%s14657_s3 + $0x6c8] sm:$0xff]  ;;  %v7656_v32 = vld [vmem:[%s14657_s3 + $0xba0] sm:$0xff] }
 0x156   : > { %v7645_v44 = vld [vmem:[%s14657_s3 + $0xb48] sm:$0xff]  ;;  %v7506_v56 = vld [vmem:[%s14657_s3 + $0x6f0] sm:$0xff] }
 0x157   : > { %9994 = vmatpush3.bf16.msra.mxu1 %v9993_v8  ;;  %10146 = vmatpush3.bf16.msra.mxu0 %v10145_v9  ;;  %v7495_v8 = vld [vmem:[%s14657_s3 + $0x698] sm:$0xff]  ;;  %v7602_v9 = vld [vmem:[%s14657_s3 + $0x9f0] sm:$0xff] }
 0x158   : > { %9996 = vmatprep.subr.bf16.mxu1 %v9995_v13  ;;  %10148 = vmatprep.subr.bf16.mxu0 %v10147_v14  ;;  %v10161_v13 = vpack.c.bf16 %v7585_v5, %v7584_v4  ;;  %v7478_v14 = vld [vmem:[%s14657_s3 + $0x610] sm:$0xff]  ;;  %v10043_v17 = vpack.c.bf16 %v7495_v8, %v7494_v38  ;;  %v10163_v18 = vpack.c.bf16 %v7603_v11, %v7602_v9  ;;  %v7484_v5 = vld [vmem:[%s14657_s3 + $0x640] sm:$0xff]  ;;  %v7485_v38 = vld [vmem:[%s14657_s3 + $0x648] sm:$0xff] }
 0x159   : > { %v10045_v20 = vpack.c.bf16 %v7479_v7, %v7478_v14  ;;  %v7641_v11 = vld [vmem:[%s14657_s3 + $0xb28] sm:$0xff]  ;;  %v7658_v14 = vld [vmem:[%s14657_s3 + $0xbb0] sm:$0xff]  ;;  %v7659_v7 = vld [vmem:[%s14657_s3 + $0xbb8] sm:$0xff] }
 0x15b   : > { %9998 = vmatpush3.bf16.msra.mxu1 %v9997_v25  ;;  %10150 = vmatpush3.bf16.msra.mxu0 %v10149_v27  ;;  %v7497_v25 = vld [vmem:[%s14657_s3 + $0x6a8] sm:$0xff]  ;;  %v7652_v27 = vld [vmem:[%s14657_s3 + $0xb80] sm:$0xff] }
 0x15c   : > { %10000 = vmatprep.subr.bf16.mxu1 %v9999_v29  ;;  %10152 = vmatprep.subr.bf16.mxu0 %v10151_v30  ;;  %v10165_v29 = vpack.c.bf16 %v7587_v19, %v7586_v6  ;;  %v7480_v30 = vld [vmem:[%s14657_s3 + $0x620] sm:$0xff]  ;;  %v10047_v24 = vpack.c.bf16 %v7497_v25, %v7496_v21  ;;  %v10199_v36 = vpack.c.bf16 %v7653_v28, %v7652_v27  ;;  %v7486_v6 = vld [vmem:[%s14657_s3 + $0x650] sm:$0xff]  ;;  %v7487_v19 = vld [vmem:[%s14657_s3 + $0x658] sm:$0xff] }
 0x15d   : > { %v10211_v25 = vpack.c.bf16 %v7659_v7, %v7658_v14  ;;  %v7643_v27 = vld [vmem:[%s14657_s3 + $0xb38] sm:$0xff]  ;;  %v7504_v28 = vld [vmem:[%s14657_s3 + $0x6e0] sm:$0xff]  ;;  %v7649_v14 = vld [vmem:[%s14657_s3 + $0xb68] sm:$0xff] }
 0x15e   : > { %v7558_v7 = vld [vmem:[%s14657_s3 + $0x890] sm:$0xff] }
 0x15f   : > { %10002 = vmatpush3.bf16.msra.mxu1 %v10001_v41  ;;  %10154 = vmatpush3.bf16.msra.mxu0 %v10153_v43  ;;  %v12213_v41 = vpop.f32.mrb[33].mxu0  ;;  %v7499_v43 = vld [vmem:[%s14657_s3 + $0x6b8] sm:$0xff] }
 0x160   : > { %10004 = vmatprep.subr.bf16.mxu1 %v10003_v45  ;;  %10156 = vmatprep.subr.bf16.mxu0 %v10155_v47  ;;  %v10049_v45 = vpack.c.bf16 %v7481_v34, %v7480_v30  ;;  %v12231_v52 = vpop.f32.mrb[34].mxu0  ;;  %v10051_v54 = vpack.c.bf16 %v7499_v43, %v7498_v40  ;;  %v7661_v30 = vld [vmem:[%s14657_s3 + $0xbc8] sm:$0xff]  ;;  %v10061_v34 = vpack.c.bf16 %v7487_v19, %v7486_v6  ;;  %v7644_v43 = vld [vmem:[%s14657_s3 + $0xb40] sm:$0xff]  ;;  %v7667_v6 = vld [vmem:[%s14657_s3 + $0xbf8] sm:$0xff] }
 0x163   : > { %10006 = vmatpush3.bf16.msra.mxu1 %v10005_v59  ;;  %10158 = vmatpush3.bf16.msra.mxu0 %v10157_v60  ;;  %v7500_v59 = vld [vmem:[%s14657_s3 + $0x6c0] sm:$0xff]  ;;  %v12242_v60 = vpop.f32.mrb[35].mxu0 }
 0x164   : > { %10040 = vmatprep.subr.bf16.mxu1 %v10039_v63  ;;  %10160 = vmatprep.subr.bf16.mxu0 %v10159_v2  ;;  %v7657_v63 = vld [vmem:[%s14657_s3 + $0xba8] sm:$0xff]  ;;  %v10053_v2 = vpack.c.bf16 %v7483_v1, %v7482_v51  ;;  %v10055_v8 = vpack.c.bf16 %v7501_v61, %v7500_v59  ;;  %v7663_v51 = vld [vmem:[%s14657_s3 + $0xbd8] sm:$0xff]  ;;  %v7646_v61 = vld [vmem:[%s14657_s3 + $0xb50] sm:$0xff] }
 0x165   : > { %v10207_v9 = vpack.c.bf16 %v7657_v63, %v7656_v32  ;;  %v7647_v32 = vld [vmem:[%s14657_s3 + $0xb58] sm:$0xff]  ;;  %v7556_v63 = vld [vmem:[%s14657_s3 + $0x880] sm:$0xff] }
 0x166   : > { %1431 = vmatmul.mubr.f32.vlgmr.msra.gmra.mrb[6].mxu1 %v11619_v50  ;;  %v7636_v50 = vld [vmem:[%s14657_s3 + $0xb00] sm:$0xff] }
 0x167   : > { %10042 = vmatpush3.bf16.msra.mxu1 %v10041_v12  ;;  %10162 = vmatpush3.bf16.msra.mxu0 %v10161_v13  ;;  %v10201_v47 = vpack.c.bf16 %v7637_v37, %v7636_v50  ;;  %v7502_v12 = vld [vmem:[%s14657_s3 + $0x6d0] sm:$0xff]  ;;  %v7503_v13 = vld [vmem:[%s14657_s3 + $0x6d8] sm:$0xff]  ;;  %v7489_v50 = vld [vmem:[%s14657_s3 + $0x668] sm:$0xff] }
 0x168   : > { %10044 = vmatprep.subr.bf16.mxu1 %v10043_v17  ;;  %10164 = vmatprep.subr.bf16.mxu0 %v10163_v18  ;;  %v10057_v17 = vpack.c.bf16 %v7485_v38, %v7484_v5  ;;  %v10059_v21 = vpack.c.bf16 %v7503_v13, %v7502_v12  ;;  %v7665_v5 = vld [vmem:[%s14657_s3 + $0xbe8] sm:$0xff]  ;;  %v7648_v13 = vld [vmem:[%s14657_s3 + $0xb60] sm:$0xff] }
 0x169   : > { %1638 = vmatprep.mubr.f32.mxu1 %v11684_v23  ;;  %v7638_v23 = vld [vmem:[%s14657_s3 + $0xb10] sm:$0xff] }
 0x16a   : > { %v10205_v4 = vpack.c.bf16 %v7639_v58, %v7638_v23  ;;  %v7491_v23 = vld [vmem:[%s14657_s3 + $0x678] sm:$0xff] }
 0x16b   : > { %10046 = vmatpush3.bf16.msra.mxu1 %v10045_v20  ;;  %10166 = vmatpush3.bf16.msra.mxu0 %v10165_v29  ;;  %v7505_v20 = vld [vmem:[%s14657_s3 + $0x6e8] sm:$0xff]  ;;  %v7660_v29 = vld [vmem:[%s14657_s3 + $0xbc0] sm:$0xff] }
 0x16c   : > { %10048 = vmatprep.subr.bf16.mxu1 %v10047_v24  ;;  %10200 = vmatprep.subr.bf16.mxu0 %v10199_v36  ;;  %v7488_v36 = vld [vmem:[%s14657_s3 + $0x660] sm:$0xff]  ;;  %v10063_v37 = vpack.c.bf16 %v7505_v20, %v7504_v28  ;;  %v10215_v40 = vpack.c.bf16 %v7661_v30, %v7660_v29  ;;  %v7650_v20 = vld [vmem:[%s14657_s3 + $0xb70] sm:$0xff]  ;;  %v7651_v29 = vld [vmem:[%s14657_s3 + $0xb78] sm:$0xff] }
 0x16d   : > { %v10065_v1 = vpack.c.bf16 %v7489_v50, %v7488_v36  ;;  %v7560_v30 = vld [vmem:[%s14657_s3 + $0x8a0] sm:$0xff]  ;;  %v7717_v36 = vld [vmem:[%s14657_s3 + $0xd88] sm:$0xff] }
 0x16e   : > { %1951 = vmatmul.mubr.f32.vlgmr.msra.gmra.mrb[56].mxu0 %v11757_v62  ;;  %v7640_v62 = vld [vmem:[%s14657_s3 + $0xb20] sm:$0xff] }
 0x16f   : > { %10050 = vmatpush3.bf16.msra.mxu1 %v10049_v45  ;;  %10202 = vmatpush3.bf16.msra.mxu0 %v10201_v47  ;;  %v10209_v18 = vpack.c.bf16 %v7641_v11, %v7640_v62  ;;  %v7507_v45 = vld [vmem:[%s14657_s3 + $0x6f8] sm:$0xff]  ;;  %v7662_v47 = vld [vmem:[%s14657_s3 + $0xbd0] sm:$0xff]  ;;  %v7541_v62 = vld [vmem:[%s14657_s3 + $0x808] sm:$0xff] }
 0x170   : > { %10052 = vmatprep.subr.bf16.mxu1 %v10051_v54  ;;  %10204 = vmatprep.subr.bf16.mxu0 %v10203_v57  ;;  %v10217_v54 = vpack.c.bf16 %v7645_v44, %v7644_v43  ;;  %v7490_v57 = vld [vmem:[%s14657_s3 + $0x670] sm:$0xff]  ;;  %v10067_v58 = vpack.c.bf16 %v7507_v45, %v7506_v56  ;;  %v10219_v59 = vpack.c.bf16 %v7663_v51, %v7662_v47  ;;  %v7545_v43 = vld [vmem:[%s14657_s3 + $0x828] sm:$0xff]  ;;  %v12406_v44 = vpop.f32.mrb[36].mxu0 }
 0x171   : > { %2158 = vmatprep.mubr.f32.mxu0 %v11826_v39  ;;  %v7642_v39 = vld [vmem:[%s14657_s3 + $0xb30] sm:$0xff]  ;;  %v10069_v38 = vpack.c.bf16 %v7491_v23, %v7490_v57  ;;  %v7701_v47 = vld [vmem:[%s14657_s3 + $0xd08] sm:$0xff]  ;;  %v7719_v23 = vld [vmem:[%s14657_s3 + $0xd98] sm:$0xff] }
 0x172   : > { %v10213_v24 = vpack.c.bf16 %v7643_v27, %v7642_v39  ;;  %v7543_v39 = vld [vmem:[%s14657_s3 + $0x818] sm:$0xff]  ;;  %v7562_v51 = vld [vmem:[%s14657_s3 + $0x8b0] sm:$0xff] }
 0x173   : > { %10054 = vmatpush3.bf16.msra.mxu1 %v10053_v2  ;;  %10206 = vmatpush3.bf16.msra.mxu0 %v10205_v4  ;;  %v7557_v2 = vld [vmem:[%s14657_s3 + $0x888] sm:$0xff]  ;;  %v7664_v4 = vld [vmem:[%s14657_s3 + $0xbe0] sm:$0xff]  ;;  %v7718_v57 = vld [vmem:[%s14657_s3 + $0xd90] sm:$0xff] }
 0x174   : > { %10056 = vmatprep.subr.bf16.mxu1 %v10055_v8  ;;  %10208 = vmatprep.subr.bf16.mxu0 %v10207_v9  ;;  %v10221_v8 = vpack.c.bf16 %v7647_v32, %v7646_v61  ;;  %v7540_v9 = vld [vmem:[%s14657_s3 + $0x800] sm:$0xff]  ;;  %v10103_v11 = vpack.c.bf16 %v7557_v2, %v7556_v63  ;;  %v10223_v12 = vpack.c.bf16 %v7665_v5, %v7664_v4  ;;  %v7546_v61 = vld [vmem:[%s14657_s3 + $0x830] sm:$0xff]  ;;  %v7547_v32 = vld [vmem:[%s14657_s3 + $0x838] sm:$0xff] }
 0x175   : > { %v10105_v19 = vpack.c.bf16 %v7541_v62, %v7540_v9  ;;  %v10267_v4 = vpack.c.bf16 %v7719_v23, %v7718_v57  ;;  %v7703_v5 = vld [vmem:[%s14657_s3 + $0xd18] sm:$0xff]  ;;  %v7565_v9 = vld [vmem:[%s14657_s3 + $0x8c8] sm:$0xff]  ;;  %v7720_v62 = vld [vmem:[%s14657_s3 + $0xda0] sm:$0xff] }
 0x177   : > { %10058 = vmatpush3.bf16.msra.mxu1 %v10057_v17  ;;  %10210 = vmatpush3.bf16.msra.mxu0 %v10209_v18  ;;  %v7559_v17 = vld [vmem:[%s14657_s3 + $0x898] sm:$0xff]  ;;  %v7666_v18 = vld [vmem:[%s14657_s3 + $0xbf0] sm:$0xff] }
 0x178   : > { %10060 = vmatprep.subr.bf16.mxu1 %v10059_v21  ;;  %10212 = vmatprep.subr.bf16.mxu0 %v10211_v25  ;;  %v10225_v21 = vpack.c.bf16 %v7649_v14, %v7648_v13  ;;  %v7542_v25 = vld [vmem:[%s14657_s3 + $0x810] sm:$0xff]  ;;  %v10107_v27 = vpack.c.bf16 %v7559_v17, %v7558_v7  ;;  %v10227_v28 = vpack.c.bf16 %v7667_v6, %v7666_v18  ;;  %v7548_v14 = vld [vmem:[%s14657_s3 + $0x840] sm:$0xff]  ;;  %v7549_v7 = vld [vmem:[%s14657_s3 + $0x848] sm:$0xff] }
 0x179   : > { %v10109_v50 = vpack.c.bf16 %v7543_v39, %v7542_v25  ;;  %v7567_v39 = vld [vmem:[%s14657_s3 + $0x8d8] sm:$0xff] }
 0x17b   : > { %10062 = vmatpush3.bf16.msra.mxu1 %v10061_v34  ;;  %10214 = vmatpush3.bf16.msra.mxu0 %v10213_v24  ;;  %v7561_v34 = vld [vmem:[%s14657_s3 + $0x8a8] sm:$0xff]  ;;  %v7716_v24 = vld [vmem:[%s14657_s3 + $0xd80] sm:$0xff] }
 0x17c   : > { %10064 = vmatprep.subr.bf16.mxu1 %v10063_v37  ;;  %10216 = vmatprep.subr.bf16.mxu0 %v10215_v40  ;;  %v10229_v37 = vpack.c.bf16 %v7651_v29, %v7650_v20  ;;  %v7544_v40 = vld [vmem:[%s14657_s3 + $0x820] sm:$0xff]  ;;  %v10111_v56 = vpack.c.bf16 %v7561_v34, %v7560_v30  ;;  %v10263_v45 = vpack.c.bf16 %v7717_v36, %v7716_v24  ;;  %v7550_v34 = vld [vmem:[%s14657_s3 + $0x850] sm:$0xff]  ;;  %v7551_v24 = vld [vmem:[%s14657_s3 + $0x858] sm:$0xff] }
 0x17d   : > { %v10121_v29 = vpack.c.bf16 %v7549_v7, %v7548_v14  ;;  %v10125_v57 = vpack.c.bf16 %v7551_v24, %v7550_v34  ;;  %v7554_v7 = vld [vmem:[%s14657_s3 + $0x870] sm:$0xff]  ;;  %v7604_v24 = vld [vmem:[%s14657_s3 + $0xa00] sm:$0xff] }
 0x17f   : > { %10066 = vmatpush3.bf16.msra.mxu1 %v10065_v1  ;;  %10218 = vmatpush3.bf16.msra.mxu0 %v10217_v54  ;;  %v12417_v1 = vpop.f32.mrb[37].mxu0  ;;  %v7563_v54 = vld [vmem:[%s14657_s3 + $0x8b8] sm:$0xff] }
 0x180   : > { %10068 = vmatprep.subr.bf16.mxu1 %v10067_v58  ;;  %10220 = vmatprep.subr.bf16.mxu0 %v10219_v59  ;;  %v10113_v58 = vpack.c.bf16 %v7545_v43, %v7544_v40  ;;  %v12435_v63 = vpop.f32.mrb[38].mxu0  ;;  %v10115_v2 = vpack.c.bf16 %v7563_v54, %v7562_v51  ;;  %v7707_v40 = vld [vmem:[%s14657_s3 + $0xd38] sm:$0xff]  ;;  %v7568_v43 = vld [vmem:[%s14657_s3 + $0x8e0] sm:$0xff] }
 0x183   : > { %10070 = vmatpush3.bf16.msra.mxu1 %v10069_v38  ;;  %10222 = vmatpush3.bf16.msra.mxu0 %v10221_v8  ;;  %v7564_v38 = vld [vmem:[%s14657_s3 + $0x8c0] sm:$0xff]  ;;  %v12446_v8 = vpop.f32.mrb[39].mxu0 }
 0x184   : > { %10104 = vmatprep.subr.bf16.mxu1 %v10103_v11  ;;  %10224 = vmatprep.subr.bf16.mxu0 %v10223_v12  ;;  %v7721_v11 = vld [vmem:[%s14657_s3 + $0xda8] sm:$0xff]  ;;  %v10117_v12 = vpack.c.bf16 %v7547_v32, %v7546_v61  ;;  %v12464_v17 = vpop.f32.mrb[40].mxu0  ;;  %v10119_v18 = vpack.c.bf16 %v7565_v9, %v7564_v38  ;;  %v7571_v9 = vld [vmem:[%s14657_s3 + $0x8f8] sm:$0xff] }
 0x185   : > { %v10271_v6 = vpack.c.bf16 %v7721_v11, %v7720_v62  ;;  %v12475_v25 = vpop.f32.mrb[41].mxu0  ;;  %v7726_v62 = vld [vmem:[%s14657_s3 + $0xdd0] sm:$0xff]  ;;  %v7727_v11 = vld [vmem:[%s14657_s3 + $0xdd8] sm:$0xff] }
 0x186   : > { %1639 = vmatmul.mubr.f32.vlgmr.msra.gmra.mrb[8].mxu1 %v11673_v16  ;;  %v7700_v16 = vld [vmem:[%s14657_s3 + $0xd00] sm:$0xff]  ;;  %v12487_v20 = vpop.f32.mrb[42].mxu0 }
 0x187   : > { %10106 = vmatpush3.bf16.msra.mxu1 %v10105_v19  ;;  %10226 = vmatpush3.bf16.msra.mxu0 %v10225_v21  ;;  %v10265_v59 = vpack.c.bf16 %v7701_v47, %v7700_v16  ;;  %v7705_v19 = vld [vmem:[%s14657_s3 + $0xd28] sm:$0xff]  ;;  %v7566_v21 = vld [vmem:[%s14657_s3 + $0x8d0] sm:$0xff]  ;;  %v12495_v36 = vpop.f32.mrb[43].mxu0  ;;  %v7724_v16 = vld [vmem:[%s14657_s3 + $0xdc0] sm:$0xff] }
 0x188   : > { %10108 = vmatprep.subr.bf16.mxu1 %v10107_v27  ;;  %10228 = vmatprep.subr.bf16.mxu0 %v10227_v28  ;;  %v7722_v27 = vld [vmem:[%s14657_s3 + $0xdb0] sm:$0xff]  ;;  %v7723_v28 = vld [vmem:[%s14657_s3 + $0xdb8] sm:$0xff]  ;;  %v7725_v47 = vld [vmem:[%s14657_s3 + $0xdc8] sm:$0xff] }
 0x189   : > { %1846 = vmatprep.mubr.f32.mxu1 %v11740_v53  ;;  %v7702_v53 = vld [vmem:[%s14657_s3 + $0xd10] sm:$0xff] }
 0x18a   : > { %v10269_v13 = vpack.c.bf16 %v7703_v5, %v7702_v53  ;;  %v7709_v53 = vld [vmem:[%s14657_s3 + $0xd48] sm:$0xff]  ;;  %v7570_v5 = vld [vmem:[%s14657_s3 + $0x8f0] sm:$0xff] }
 0x18b   : > { %10110 = vmatpush3.bf16.msra.mxu1 %v10109_v50  ;;  %10230 = vmatpush3.bf16.msra.mxu0 %v10229_v37  ;;  %v10123_v50 = vpack.c.bf16 %v7567_v39, %v7566_v21  ;;  %v7706_v37 = vld [vmem:[%s14657_s3 + $0xd30] sm:$0xff]  ;;  %v7711_v21 = vld [vmem:[%s14657_s3 + $0xd58] sm:$0xff]  ;;  %v7620_v39 = vld [vmem:[%s14657_s3 + $0xa80] sm:$0xff] }
 0x18c   : > { %10112 = vmatprep.subr.bf16.mxu1 %v10111_v56  ;;  %10264 = vmatprep.subr.bf16.mxu0 %v10263_v45  ;;  %v12506_v56 = vpop.f32.mrb[44].mxu0  ;;  %v7569_v45 = vld [vmem:[%s14657_s3 + $0x8e8] sm:$0xff]  ;;  %v10277_v23 = vpack.c.bf16 %v7707_v40, %v7706_v37  ;;  %v7712_v40 = vld [vmem:[%s14657_s3 + $0xd60] sm:$0xff] }
 0x18d   : > { %v12517_v51 = vpop.f32.mrb[45].mxu0  ;;  %v10127_v32 = vpack.c.bf16 %v7569_v45, %v7568_v43  ;;  %v7713_v43 = vld [vmem:[%s14657_s3 + $0xd68] sm:$0xff]  ;;  %v7622_v45 = vld [vmem:[%s14657_s3 + $0xa90] sm:$0xff] }
 0x18e   : > { %2159 = vmatmul.mubr.f32.vlgmr.msra.gmra.mrb[58].mxu0 %v11815_v33  ;;  %v7704_v33 = vld [vmem:[%s14657_s3 + $0xd20] sm:$0xff]  ;;  %v12519_v54 = vpop.f32.mrb[46].mxu0 }
 0x18f   : > { %10114 = vmatpush3.bf16.msra.mxu1 %v10113_v58  ;;  %10266 = vmatpush3.bf16.msra.mxu0 %v10265_v59  ;;  %v10273_v30 = vpack.c.bf16 %v7705_v19, %v7704_v33  ;;  %v7552_v58 = vld [vmem:[%s14657_s3 + $0x860] sm:$0xff]  ;;  %v7553_v59 = vld [vmem:[%s14657_s3 + $0x868] sm:$0xff]  ;;  %v12527_v61 = vpop.f32.mrb[47].mxu0  ;;  %v10283_v33 = vpack.c.bf16 %v7727_v11, %v7726_v62  ;;  %v7710_v19 = vld [vmem:[%s14657_s3 + $0xd50] sm:$0xff] }
 0x190   : > { %10116 = vmatprep.subr.bf16.mxu1 %v10115_v2  ;;  %10268 = vmatprep.subr.bf16.mxu0 %v10267_v4  ;;  %v10279_v2 = vpack.c.bf16 %v7725_v47, %v7724_v16  ;;  %v7708_v4 = vld [vmem:[%s14657_s3 + $0xd40] sm:$0xff]  ;;  %v12538_v38 = vpop.f32.mrb[48].mxu0  ;;  %v10285_v34 = vpack.c.bf16 %v7711_v21, %v7710_v19  ;;  %v7623_v16 = vld [vmem:[%s14657_s3 + $0xa98] sm:$0xff]  ;;  %v7730_v47 = vld [vmem:[%s14657_s3 + $0xdf0] sm:$0xff] }
 0x191   : > { %2366 = vmatprep.mubr.f32.mxu0 %v11884_v10  ;;  %v10275_v10 = vpack.c.bf16 %v7723_v28, %v7722_v27  ;;  %v10281_v14 = vpack.c.bf16 %v7709_v53, %v7708_v4  ;;  %v7621_v27 = vld [vmem:[%s14657_s3 + $0xa88] sm:$0xff]  ;;  %v7728_v28 = vld [vmem:[%s14657_s3 + $0xde0] sm:$0xff]  ;;  %v7714_v53 = vld [vmem:[%s14657_s3 + $0xd70] sm:$0xff] }
 0x192   : > { %v7625_v62 = vld [vmem:[%s14657_s3 + $0xaa8] sm:$0xff]  ;;  %v7780_v11 = vld [vmem:[%s14657_s3 + $0xf80] sm:$0xff] }
 0x193   : > { %10118 = vmatpush3.bf16.msra.mxu1 %v10117_v12  ;;  %10270 = vmatpush3.bf16.msra.mxu0 %v10269_v13  ;;  %v12549_v12 = vpop.f32.mrb[49].mxu0  ;;  %v10129_v13 = vpack.c.bf16 %v7553_v59, %v7552_v58  ;;  %v10289_v58 = vpack.c.bf16 %v7713_v43, %v7712_v40  ;;  %v7606_v59 = vld [vmem:[%s14657_s3 + $0xa10] sm:$0xff]  ;;  %v7765_v21 = vld [vmem:[%s14657_s3 + $0xf08] sm:$0xff]  ;;  %v7767_v40 = vld [vmem:[%s14657_s3 + $0xf18] sm:$0xff] }
 0x194   : > { %10120 = vmatprep.subr.bf16.mxu1 %v10119_v18  ;;  %10272 = vmatprep.subr.bf16.mxu0 %v10271_v6  ;;  %v7555_v18 = vld [vmem:[%s14657_s3 + $0x878] sm:$0xff]  ;;  %v10131_v6 = vpack.c.bf16 %v7571_v9, %v7570_v5  ;;  %v7624_v9 = vld [vmem:[%s14657_s3 + $0xaa0] sm:$0xff] }
 0x195   : > { %v7715_v5 = vld [vmem:[%s14657_s3 + $0xd78] sm:$0xff]  ;;  %v7628_v43 = vld [vmem:[%s14657_s3 + $0xac0] sm:$0xff] }
 0x197   : > { %10122 = vmatpush3.bf16.msra.mxu1 %v10121_v29  ;;  %10274 = vmatpush3.bf16.msra.mxu0 %v10273_v30  ;;  %v7729_v29 = vld [vmem:[%s14657_s3 + $0xde8] sm:$0xff]  ;;  %v10133_v30 = vpack.c.bf16 %v7555_v18, %v7554_v7  ;;  %v10293_v7 = vpack.c.bf16 %v7715_v5, %v7714_v53  ;;  %v7608_v18 = vld [vmem:[%s14657_s3 + $0xa20] sm:$0xff]  ;;  %v7630_v53 = vld [vmem:[%s14657_s3 + $0xad0] sm:$0xff] }
 0x198   : > { %10124 = vmatprep.subr.bf16.mxu1 %v10123_v50  ;;  %10276 = vmatprep.subr.bf16.mxu0 %v10275_v10  ;;  %v7605_v50 = vld [vmem:[%s14657_s3 + $0xa08] sm:$0xff]  ;;  %v10167_v10 = vpack.c.bf16 %v7621_v27, %v7620_v39  ;;  %v10287_v37 = vpack.c.bf16 %v7729_v29, %v7728_v28  ;;  %v7626_v39 = vld [vmem:[%s14657_s3 + $0xab0] sm:$0xff]  ;;  %v7627_v27 = vld [vmem:[%s14657_s3 + $0xab8] sm:$0xff] }
 0x199   : > { %v7782_v28 = vld [vmem:[%s14657_s3 + $0xf90] sm:$0xff]  ;;  %v7783_v29 = vld [vmem:[%s14657_s3 + $0xf98] sm:$0xff] }
 0x19a   : > { %v7631_v5 = vld [vmem:[%s14657_s3 + $0xad8] sm:$0xff] }
 0x19b   : > { %10126 = vmatpush3.bf16.msra.mxu1 %v10125_v57  ;;  %10278 = vmatpush3.bf16.msra.mxu0 %v10277_v23  ;;  %v7731_v57 = vld [vmem:[%s14657_s3 + $0xdf8] sm:$0xff]  ;;  %v10169_v23 = vpack.c.bf16 %v7605_v50, %v7604_v24  ;;  %v7610_v24 = vld [vmem:[%s14657_s3 + $0xa30] sm:$0xff] }
 0x19c   : > { %10128 = vmatprep.subr.bf16.mxu1 %v10127_v32  ;;  %10280 = vmatprep.subr.bf16.mxu0 %v10279_v2  ;;  %v7607_v32 = vld [vmem:[%s14657_s3 + $0xa18] sm:$0xff]  ;;  %v10171_v2 = vpack.c.bf16 %v7623_v16, %v7622_v45  ;;  %v10291_v4 = vpack.c.bf16 %v7731_v57, %v7730_v47  ;;  %v7629_v45 = vld [vmem:[%s14657_s3 + $0xac8] sm:$0xff]  ;;  %v7784_v16 = vld [vmem:[%s14657_s3 + $0xfa0] sm:$0xff] }
 0x19d   : > { %v7611_v50 = vld [vmem:[%s14657_s3 + $0xa38] sm:$0xff]  ;;  %v7785_v47 = vld [vmem:[%s14657_s3 + $0xfa8] sm:$0xff] }
 0x19e   : > { %v10181_v57 = vpack.c.bf16 %v7611_v50, %v7610_v24  ;;  %v7772_v50 = vld [vmem:[%s14657_s3 + $0xf40] sm:$0xff] }
 0x19f   : > { %10130 = vmatpush3.bf16.msra.mxu1 %v10129_v13  ;;  %10282 = vmatpush3.bf16.msra.mxu0 %v10281_v14  ;;  %v7781_v13 = vld [vmem:[%s14657_s3 + $0xf88] sm:$0xff]  ;;  %v10173_v14 = vpack.c.bf16 %v7607_v32, %v7606_v59  ;;  %v10183_v32 = vpack.c.bf16 %v7629_v45, %v7628_v43  ;;  %v7791_v43 = vld [vmem:[%s14657_s3 + $0xfd8] sm:$0xff] }
 0x1a0   : > { %10132 = vmatprep.subr.bf16.mxu1 %v10131_v6  ;;  %10284 = vmatprep.subr.bf16.mxu0 %v10283_v33  ;;  %v7609_v6 = vld [vmem:[%s14657_s3 + $0xa28] sm:$0xff]  ;;  %v10175_v33 = vpack.c.bf16 %v7625_v62, %v7624_v9  ;;  %v10327_v19 = vpack.c.bf16 %v7781_v13, %v7780_v11  ;;  %v7786_v9 = vld [vmem:[%s14657_s3 + $0xfb0] sm:$0xff]  ;;  %v7787_v62 = vld [vmem:[%s14657_s3 + $0xfb8] sm:$0xff] }
 0x1a1   : > { %v7613_v59 = vld [vmem:[%s14657_s3 + $0xa48] sm:$0xff] }
 0x1a3   : > { %10134 = vmatpush3.bf16.msra.mxu1 %v10133_v30  ;;  %10286 = vmatpush3.bf16.msra.mxu0 %v10285_v34  ;;  %v10177_v30 = vpack.c.bf16 %v7609_v6, %v7608_v18  ;;  %v10187_v18 = vpack.c.bf16 %v7631_v5, %v7630_v53  ;;  %v10339_v6 = vpack.c.bf16 %v7787_v62, %v7786_v9  ;;  %v7793_v53 = vld [vmem:[%s14657_s3 + $0xfe8] sm:$0xff]  ;;  %v7668_v62 = vld [vmem:[%s14657_s3 + $0xc00] sm:$0xff] }
 0x1a4   : > { %10168 = vmatprep.subr.bf16.mxu1 %v10167_v10  ;;  %10288 = vmatprep.subr.bf16.mxu0 %v10287_v37  ;;  %v10179_v10 = vpack.c.bf16 %v7627_v27, %v7626_v39  ;;  %v10331_v37 = vpack.c.bf16 %v7783_v29, %v7782_v28  ;;  %v7789_v39 = vld [vmem:[%s14657_s3 + $0xfc8] sm:$0xff]  ;;  %v7616_v29 = vld [vmem:[%s14657_s3 + $0xa60] sm:$0xff] }
 0x1a6   : > { %1847 = vmatmul.mubr.f32.vlgmr.msra.gmra.mrb[10].mxu1 %v11729_v46  ;;  %v7764_v46 = vld [vmem:[%s14657_s3 + $0xf00] sm:$0xff] }
 0x1a7   : > { %10170 = vmatpush3.bf16.msra.mxu1 %v10169_v23  ;;  %10290 = vmatpush3.bf16.msra.mxu0 %v10289_v58  ;;  %v10329_v34 = vpack.c.bf16 %v7765_v21, %v7764_v46  ;;  %v7612_v58 = vld [vmem:[%s14657_s3 + $0xa40] sm:$0xff]  ;;  %v7633_v46 = vld [vmem:[%s14657_s3 + $0xae8] sm:$0xff] }
 0x1a8   : > { %10172 = vmatprep.subr.bf16.mxu1 %v10171_v2  ;;  %10292 = vmatprep.subr.bf16.mxu0 %v10291_v4  ;;  %v10335_v2 = vpack.c.bf16 %v7785_v47, %v7784_v16  ;;  %v7769_v4 = vld [vmem:[%s14657_s3 + $0xf28] sm:$0xff]  ;;  %v10185_v11 = vpack.c.bf16 %v7613_v59, %v7612_v58  ;;  %v7788_v21 = vld [vmem:[%s14657_s3 + $0xfc0] sm:$0xff]  ;;  %v7618_v47 = vld [vmem:[%s14657_s3 + $0xa70] sm:$0xff] }
 0x1a9   : > { %2054 = vmatprep.mubr.f32.mxu1 %v11797_v22  ;;  %v7766_v22 = vld [vmem:[%s14657_s3 + $0xf10] sm:$0xff]  ;;  %v10343_v24 = vpack.c.bf16 %v7789_v39, %v7788_v21 }
 0x1aa   : > { %v10333_v23 = vpack.c.bf16 %v7767_v40, %v7766_v22  ;;  %v7635_v22 = vld [vmem:[%s14657_s3 + $0xaf8] sm:$0xff]  ;;  %v7790_v40 = vld [vmem:[%s14657_s3 + $0xfd0] sm:$0xff] }
 0x1ab   : > { %10174 = vmatpush3.bf16.msra.mxu1 %v10173_v14  ;;  %10294 = vmatpush3.bf16.msra.mxu0 %v10293_v7  ;;  %v7614_v14 = vld [vmem:[%s14657_s3 + $0xa50] sm:$0xff]  ;;  %v7615_v7 = vld [vmem:[%s14657_s3 + $0xa58] sm:$0xff]  ;;  %v10347_v58 = vpack.c.bf16 %v7791_v43, %v7790_v40  ;;  %v7672_v43 = vld [vmem:[%s14657_s3 + $0xc20] sm:$0xff] }
 0x1ac   : > { %10176 = vmatprep.subr.bf16.mxu1 %v10175_v33  ;;  %10328 = vmatprep.subr.bf16.mxu0 %v10327_v19  ;;  %v7771_v33 = vld [vmem:[%s14657_s3 + $0xf38] sm:$0xff]  ;;  %v7632_v19 = vld [vmem:[%s14657_s3 + $0xae0] sm:$0xff]  ;;  %v10189_v27 = vpack.c.bf16 %v7615_v7, %v7614_v14  ;;  %v7774_v59 = vld [vmem:[%s14657_s3 + $0xf50] sm:$0xff] }
 0x1ad   : > { %v7776_v7 = vld [vmem:[%s14657_s3 + $0xf60] sm:$0xff]  ;;  %v7670_v39 = vld [vmem:[%s14657_s3 + $0xc10] sm:$0xff] }
 0x1ae   : > { %2367 = vmatmul.mubr.f32.vlgmr.msra.gmra.mrb[60].mxu0 %v11873_v3  ;;  %v7768_v3 = vld [vmem:[%s14657_s3 + $0xf20] sm:$0xff] }
 0x1af   : > { %10178 = vmatpush3.bf16.msra.mxu1 %v10177_v30  ;;  %10330 = vmatpush3.bf16.msra.mxu0 %v10329_v34  ;;  %v10337_v13 = vpack.c.bf16 %v7769_v4, %v7768_v3  ;;  %v7617_v30 = vld [vmem:[%s14657_s3 + $0xa68] sm:$0xff]  ;;  %v10191_v34 = vpack.c.bf16 %v7633_v46, %v7632_v19  ;;  %v7792_v4 = vld [vmem:[%s14657_s3 + $0xfe0] sm:$0xff]  ;;  %v7795_v19 = vld [vmem:[%s14657_s3 + $0xff8] sm:$0xff] }
 0x1b0   : > { %10180 = vmatprep.subr.bf16.mxu1 %v10179_v10  ;;  %10332 = vmatprep.subr.bf16.mxu0 %v10331_v37  ;;  %v7773_v10 = vld [vmem:[%s14657_s3 + $0xf48] sm:$0xff]  ;;  %v7634_v37 = vld [vmem:[%s14657_s3 + $0xaf0] sm:$0xff]  ;;  %v10193_v45 = vpack.c.bf16 %v7617_v30, %v7616_v29  ;;  %v10351_v14 = vpack.c.bf16 %v7793_v53, %v7792_v4  ;;  %v7675_v53 = vld [vmem:[%s14657_s3 + $0xc38] sm:$0xff] }
 0x1b1   : > { %2574 = vmatprep.mubr.f32.mxu0 %v12038_v49  ;;  %v7770_v49 = vld [vmem:[%s14657_s3 + $0xf30] sm:$0xff]  ;;  %v10345_v16 = vpack.c.bf16 %v7773_v10, %v7772_v50  ;;  %v7685_v3 = vld [vmem:[%s14657_s3 + $0xc88] sm:$0xff]  ;;  %v7844_v10 = vld [vmem:[%s14657_s3 + $0x1180] sm:$0xff] }
 0x1b2   : > { %v10341_v28 = vpack.c.bf16 %v7771_v33, %v7770_v49  ;;  %v7687_v49 = vld [vmem:[%s14657_s3 + $0xc98] sm:$0xff]  ;;  %v7794_v33 = vld [vmem:[%s14657_s3 + $0xff0] sm:$0xff]  ;;  %v7689_v50 = vld [vmem:[%s14657_s3 + $0xca8] sm:$0xff] }
 0x1b3   : > { %10182 = vmatpush3.bf16.msra.mxu1 %v10181_v57  ;;  %10334 = vmatpush3.bf16.msra.mxu0 %v10333_v23  ;;  %v7619_v57 = vld [vmem:[%s14657_s3 + $0xa78] sm:$0xff]  ;;  %v10195_v23 = vpack.c.bf16 %v7635_v22, %v7634_v37  ;;  %v10355_v29 = vpack.c.bf16 %v7795_v19, %v7794_v33  ;;  %v7778_v30 = vld [vmem:[%s14657_s3 + $0xf70] sm:$0xff]  ;;  %v7845_v37 = vld [vmem:[%s14657_s3 + $0x1188] sm:$0xff] }
 0x1b4   : > { %10184 = vmatprep.subr.bf16.mxu1 %v10183_v32  ;;  %10336 = vmatprep.subr.bf16.mxu0 %v10335_v2  ;;  %v7775_v32 = vld [vmem:[%s14657_s3 + $0xf58] sm:$0xff]  ;;  %v7684_v2 = vld [vmem:[%s14657_s3 + $0xc80] sm:$0xff]  ;;  %v10197_v5 = vpack.c.bf16 %v7619_v57, %v7618_v47  ;;  %v10391_v47 = vpack.c.bf16 %v7845_v37, %v7844_v10  ;;  %v7829_v57 = vld [vmem:[%s14657_s3 + $0x1108] sm:$0xff] }
 0x1b5   : > { %v10349_v9 = vpack.c.bf16 %v7775_v32, %v7774_v59  ;;  %v7846_v59 = vld [vmem:[%s14657_s3 + $0x1190] sm:$0xff]  ;;  %v7847_v32 = vld [vmem:[%s14657_s3 + $0x1198] sm:$0xff]  ;;  %v7677_v33 = vld [vmem:[%s14657_s3 + $0xc48] sm:$0xff] }
 0x1b6   : > { %v7674_v4 = vld [vmem:[%s14657_s3 + $0xc30] sm:$0xff] }
 0x1b7   : > { %10186 = vmatpush3.bf16.msra.mxu1 %v10185_v11  ;;  %10338 = vmatpush3.bf16.msra.mxu0 %v10337_v13  ;;  %v7669_v11 = vld [vmem:[%s14657_s3 + $0xc08] sm:$0xff]  ;;  %v10231_v13 = vpack.c.bf16 %v7685_v3, %v7684_v2 }
 0x1b8   : > { %10188 = vmatprep.subr.bf16.mxu1 %v10187_v18  ;;  %10340 = vmatprep.subr.bf16.mxu0 %v10339_v6  ;;  %v7777_v18 = vld [vmem:[%s14657_s3 + $0xf68] sm:$0xff]  ;;  %v7686_v6 = vld [vmem:[%s14657_s3 + $0xc90] sm:$0xff]  ;;  %v10233_v46 = vpack.c.bf16 %v7669_v11, %v7668_v62  ;;  %v7831_v62 = vld [vmem:[%s14657_s3 + $0x1118] sm:$0xff] }
 0x1b9   : > { %v10353_v21 = vpack.c.bf16 %v7777_v18, %v7776_v7  ;;  %v7692_v11 = vld [vmem:[%s14657_s3 + $0xcc0] sm:$0xff]  ;;  %v7849_v7 = vld [vmem:[%s14657_s3 + $0x11a8] sm:$0xff]  ;;  %v10245_v18 = vpack.c.bf16 %v7675_v53, %v7674_v4  ;;  %v7699_v53 = vld [vmem:[%s14657_s3 + $0xcf8] sm:$0xff] }
 0x1bb   : > { %10190 = vmatpush3.bf16.msra.mxu1 %v10189_v27  ;;  %10342 = vmatpush3.bf16.msra.mxu0 %v10341_v28  ;;  %v7671_v27 = vld [vmem:[%s14657_s3 + $0xc18] sm:$0xff]  ;;  %v10235_v28 = vpack.c.bf16 %v7687_v49, %v7686_v6  ;;  %v7676_v49 = vld [vmem:[%s14657_s3 + $0xc40] sm:$0xff] }
 0x1bc   : > { %10192 = vmatprep.subr.bf16.mxu1 %v10191_v34  ;;  %10344 = vmatprep.subr.bf16.mxu0 %v10343_v24  ;;  %v7779_v34 = vld [vmem:[%s14657_s3 + $0xf78] sm:$0xff]  ;;  %v7688_v24 = vld [vmem:[%s14657_s3 + $0xca0] sm:$0xff]  ;;  %v10237_v22 = vpack.c.bf16 %v7671_v27, %v7670_v39  ;;  %v7694_v39 = vld [vmem:[%s14657_s3 + $0xcd0] sm:$0xff] }
 0x1bd   : > { %v10357_v40 = vpack.c.bf16 %v7779_v34, %v7778_v30  ;;  %v7695_v27 = vld [vmem:[%s14657_s3 + $0xcd8] sm:$0xff]  ;;  %v10249_v30 = vpack.c.bf16 %v7677_v33, %v7676_v49  ;;  %v7838_v49 = vld [vmem:[%s14657_s3 + $0x1150] sm:$0xff] }
 0x1be   : > { %v10251_v10 = vpack.c.bf16 %v7695_v27, %v7694_v39  ;;  %v7839_v33 = vld [vmem:[%s14657_s3 + $0x1158] sm:$0xff] }
 0x1bf   : > { %10194 = vmatpush3.bf16.msra.mxu1 %v10193_v45  ;;  %10346 = vmatpush3.bf16.msra.mxu0 %v10345_v16  ;;  %v7673_v45 = vld [vmem:[%s14657_s3 + $0xc28] sm:$0xff]  ;;  %v10239_v16 = vpack.c.bf16 %v7689_v50, %v7688_v24  ;;  %v7678_v24 = vld [vmem:[%s14657_s3 + $0xc50] sm:$0xff]  ;;  %v7679_v50 = vld [vmem:[%s14657_s3 + $0xc58] sm:$0xff]  ;;  %v10413_v27 = vpack.c.bf16 %v7839_v33, %v7838_v49 }
 0x1c0   : > { %10196 = vmatprep.subr.bf16.mxu1 %v10195_v23  ;;  %10348 = vmatprep.subr.bf16.mxu0 %v10347_v58  ;;  %v7690_v23 = vld [vmem:[%s14657_s3 + $0xcb0] sm:$0xff]  ;;  %v7691_v58 = vld [vmem:[%s14657_s3 + $0xcb8] sm:$0xff]  ;;  %v10241_v2 = vpack.c.bf16 %v7673_v45, %v7672_v43  ;;  %v7697_v43 = vld [vmem:[%s14657_s3 + $0xce8] sm:$0xff] }
 0x1c1   : > { %v7852_v45 = vld [vmem:[%s14657_s3 + $0x11c0] sm:$0xff]  ;;  %v7910_v49 = vld [vmem:[%s14657_s3 + $0x1390] sm:$0xff]  ;;  %v7911_v33 = vld [vmem:[%s14657_s3 + $0x1398] sm:$0xff] }
 0x1c3   : > { %10198 = vmatpush3.bf16.msra.mxu1 %v10197_v5  ;;  %10350 = vmatpush3.bf16.msra.mxu0 %v10349_v9  ;;  %v10243_v5 = vpack.c.bf16 %v7691_v58, %v7690_v23  ;;  %v10395_v9 = vpack.c.bf16 %v7847_v32, %v7846_v59  ;;  %v7681_v23 = vld [vmem:[%s14657_s3 + $0xc68] sm:$0xff]  ;;  %v7836_v32 = vld [vmem:[%s14657_s3 + $0x1140] sm:$0xff] }
 0x1c4   : > { %10232 = vmatprep.subr.bf16.mxu1 %v10231_v13  ;;  %10352 = vmatprep.subr.bf16.mxu0 %v10351_v14  ;;  %v7693_v13 = vld [vmem:[%s14657_s3 + $0xcc8] sm:$0xff]  ;;  %v7848_v14 = vld [vmem:[%s14657_s3 + $0x11a0] sm:$0xff] }
 0x1c5   : > { %v10247_v19 = vpack.c.bf16 %v7693_v13, %v7692_v11 }
 0x1c6   : > { %2055 = vmatmul.mubr.f32.vlgmr.msra.gmra.mrb[12].mxu1 %v11786_v15  ;;  %v7828_v15 = vld [vmem:[%s14657_s3 + $0x1100] sm:$0xff] }
 0x1c7   : > { %10234 = vmatpush3.bf16.msra.mxu1 %v10233_v46  ;;  %10354 = vmatpush3.bf16.msra.mxu0 %v10353_v21  ;;  %v10393_v3 = vpack.c.bf16 %v7829_v57, %v7828_v15  ;;  %v10399_v46 = vpack.c.bf16 %v7849_v7, %v7848_v14  ;;  %v7833_v21 = vld [vmem:[%s14657_s3 + $0x1128] sm:$0xff]  ;;  %v7680_v57 = vld [vmem:[%s14657_s3 + $0xc60] sm:$0xff]  ;;  %v7682_v14 = vld [vmem:[%s14657_s3 + $0xc70] sm:$0xff] }
 0x1c8   : > { %10236 = vmatprep.subr.bf16.mxu1 %v10235_v28  ;;  %10356 = vmatprep.subr.bf16.mxu0 %v10355_v29  ;;  %v7850_v28 = vld [vmem:[%s14657_s3 + $0x11b0] sm:$0xff]  ;;  %v7851_v29 = vld [vmem:[%s14657_s3 + $0x11b8] sm:$0xff]  ;;  %v10257_v11 = vpack.c.bf16 %v7681_v23, %v7680_v57 }
 0x1c9   : > { %2262 = vmatprep.mubr.f32.mxu1 %v11855_v55  ;;  %v7830_v55 = vld [vmem:[%s14657_s3 + $0x1110] sm:$0xff]  ;;  %v10403_v37 = vpack.c.bf16 %v7851_v29, %v7850_v28  ;;  %v7683_v7 = vld [vmem:[%s14657_s3 + $0xc78] sm:$0xff]  ;;  %v7732_v28 = vld [vmem:[%s14657_s3 + $0xe00] sm:$0xff] }
 0x1ca   : > { %v10397_v6 = vpack.c.bf16 %v7831_v62, %v7830_v55  ;;  %v10261_v39 = vpack.c.bf16 %v7683_v7, %v7682_v14  ;;  %v7733_v29 = vld [vmem:[%s14657_s3 + $0xe08] sm:$0xff] }
 0x1cb   : > { %10238 = vmatpush3.bf16.msra.mxu1 %v10237_v22  ;;  %10358 = vmatpush3.bf16.msra.mxu0 %v10357_v40  ;;  %v7835_v22 = vld [vmem:[%s14657_s3 + $0x1138] sm:$0xff]  ;;  %v7696_v40 = vld [vmem:[%s14657_s3 + $0xce0] sm:$0xff]  ;;  %v7893_v7 = vld [vmem:[%s14657_s3 + $0x1308] sm:$0xff] }
 0x1cc   : > { %10240 = vmatprep.subr.bf16.mxu1 %v10239_v16  ;;  %10392 = vmatprep.subr.bf16.mxu0 %v10391_v47  ;;  %v7853_v16 = vld [vmem:[%s14657_s3 + $0x11c8] sm:$0xff]  ;;  %v10253_v47 = vpack.c.bf16 %v7679_v50, %v7678_v24  ;;  %v10255_v58 = vpack.c.bf16 %v7697_v43, %v7696_v40  ;;  %v7840_v24 = vld [vmem:[%s14657_s3 + $0x1160] sm:$0xff] }
 0x1cd   : > { %v10407_v59 = vpack.c.bf16 %v7853_v16, %v7852_v45  ;;  %v7841_v50 = vld [vmem:[%s14657_s3 + $0x1168] sm:$0xff]  ;;  %v10297_v45 = vpack.c.bf16 %v7733_v29, %v7732_v28  ;;  %v7895_v28 = vld [vmem:[%s14657_s3 + $0x1318] sm:$0xff]  ;;  %v7756_v29 = vld [vmem:[%s14657_s3 + $0xec0] sm:$0xff] }
 0x1ce   : > { %2575 = vmatmul.mubr.f32.vlgmr.msra.gmra.mrb[62].mxu0 %v12027_v42  ;;  %v7832_v42 = vld [vmem:[%s14657_s3 + $0x1120] sm:$0xff]  ;;  %v10417_v16 = vpack.c.bf16 %v7841_v50, %v7840_v24  ;;  %v7913_v24 = vld [vmem:[%s14657_s3 + $0x13a8] sm:$0xff] }
 0x1cf   : > { %10242 = vmatpush3.bf16.msra.mxu1 %v10241_v2  ;;  %10394 = vmatpush3.bf16.msra.mxu0 %v10393_v3  ;;  %v10401_v34 = vpack.c.bf16 %v7833_v21, %v7832_v42  ;;  %v7837_v2 = vld [vmem:[%s14657_s3 + $0x1148] sm:$0xff]  ;;  %v7698_v3 = vld [vmem:[%s14657_s3 + $0xcf0] sm:$0xff]  ;;  %v7856_v42 = vld [vmem:[%s14657_s3 + $0x11e0] sm:$0xff] }
 0x1d0   : > { %10244 = vmatprep.subr.bf16.mxu1 %v10243_v5  ;;  %10396 = vmatprep.subr.bf16.mxu0 %v10395_v9  ;;  %v7854_v5 = vld [vmem:[%s14657_s3 + $0x11d0] sm:$0xff]  ;;  %v7855_v9 = vld [vmem:[%s14657_s3 + $0x11d8] sm:$0xff]  ;;  %v10409_v13 = vpack.c.bf16 %v7837_v2, %v7836_v32  ;;  %v7857_v21 = vld [vmem:[%s14657_s3 + $0x11e8] sm:$0xff] }
 0x1d1   : > { %2782 = vmatprep.mubr.f32.mxu0 %v12242_v60  ;;  %v7834_v60 = vld [vmem:[%s14657_s3 + $0x1130] sm:$0xff]  ;;  %v7843_v32 = vld [vmem:[%s14657_s3 + $0x1178] sm:$0xff]  ;;  %v7752_v2 = vld [vmem:[%s14657_s3 + $0xea0] sm:$0xff] }
 0x1d2   : > { %v10405_v15 = vpack.c.bf16 %v7835_v22, %v7834_v60  ;;  %v7858_v60 = vld [vmem:[%s14657_s3 + $0x11f0] sm:$0xff]  ;;  %v7859_v22 = vld [vmem:[%s14657_s3 + $0x11f8] sm:$0xff] }
 0x1d3   : > { %10246 = vmatpush3.bf16.msra.mxu1 %v10245_v18  ;;  %10398 = vmatpush3.bf16.msra.mxu0 %v10397_v6  ;;  %v10259_v18 = vpack.c.bf16 %v7699_v53, %v7698_v3  ;;  %v10411_v6 = vpack.c.bf16 %v7855_v9, %v7854_v5  ;;  %v7753_v3 = vld [vmem:[%s14657_s3 + $0xea8] sm:$0xff] }
 0x1d4   : > { %10248 = vmatprep.subr.bf16.mxu1 %v10247_v19  ;;  %10400 = vmatprep.subr.bf16.mxu0 %v10399_v46  ;;  %v7748_v19 = vld [vmem:[%s14657_s3 + $0xe80] sm:$0xff]  ;;  %v7749_v46 = vld [vmem:[%s14657_s3 + $0xe88] sm:$0xff] }
 0x1d5   : > { %v7909_v53 = vld [vmem:[%s14657_s3 + $0x1388] sm:$0xff] }
 0x1d7   : > { %10250 = vmatpush3.bf16.msra.mxu1 %v10249_v30  ;;  %10402 = vmatpush3.bf16.msra.mxu0 %v10401_v34  ;;  %v10295_v30 = vpack.c.bf16 %v7749_v46, %v7748_v19  ;;  %v10415_v34 = vpack.c.bf16 %v7857_v21, %v7856_v42  ;;  %v7738_v42 = vld [vmem:[%s14657_s3 + $0xe30] sm:$0xff]  ;;  %v7739_v21 = vld [vmem:[%s14657_s3 + $0xe38] sm:$0xff] }
 0x1d8   : > { %10252 = vmatprep.subr.bf16.mxu1 %v10251_v10  ;;  %10404 = vmatprep.subr.bf16.mxu0 %v10403_v37  ;;  %v7750_v10 = vld [vmem:[%s14657_s3 + $0xe90] sm:$0xff]  ;;  %v7751_v37 = vld [vmem:[%s14657_s3 + $0xe98] sm:$0xff]  ;;  %v10309_v50 = vpack.c.bf16 %v7739_v21, %v7738_v42 }
 0x1d9   : > { %v8337_v4 = vpop.f32.mrb[0].mxu1  ;;  %v10299_v23 = vpack.c.bf16 %v7751_v37, %v7750_v10  ;;  %v7740_v37 = vld [vmem:[%s14657_s3 + $0xe40] sm:$0xff]  ;;  %v7918_v42 = vld [vmem:[%s14657_s3 + $0x13d0] sm:$0xff]  ;;  %v7919_v21 = vld [vmem:[%s14657_s3 + $0x13d8] sm:$0xff] }
 0x1da   : > { %v8338_v55 = vpop.f32.mrb[1].mxu1 }
 0x1db   : > { %v12943_v62 = vadd.f32 %v8338_v55, %v8337_v4  ;;  %10254 = vmatpush3.bf16.msra.mxu1 %v10253_v47  ;;  %10406 = vmatpush3.bf16.msra.mxu0 %v10405_v15  ;;  %v7734_v47 = vld [vmem:[%s14657_s3 + $0xe10] sm:$0xff]  ;;  %v7735_v15 = vld [vmem:[%s14657_s3 + $0xe18] sm:$0xff]  ;;  %v7908_v4 = vld [vmem:[%s14657_s3 + $0x1380] sm:$0xff] }
 0x1dc   : > { %10256 = vmatprep.subr.bf16.mxu1 %v10255_v58  ;;  %10408 = vmatprep.subr.bf16.mxu0 %v10407_v59  ;;  %v10419_v58 = vpack.c.bf16 %v7859_v22, %v7858_v60  ;;  %v7842_v59 = vld [vmem:[%s14657_s3 + $0x1170] sm:$0xff]  ;;  %v10301_v5 = vpack.c.bf16 %v7735_v15, %v7734_v47  ;;  %v7736_v55 = vld [vmem:[%s14657_s3 + $0xe20] sm:$0xff]  ;;  %v10455_v14 = vpack.c.bf16 %v7909_v53, %v7908_v4  ;;  %v7741_v60 = vld [vmem:[%s14657_s3 + $0xe48] sm:$0xff] }
 0x1dd   : > { %v10421_v9 = vpack.c.bf16 %v7843_v32, %v7842_v59  ;;  %v7914_v47 = vld [vmem:[%s14657_s3 + $0x13b0] sm:$0xff]  ;;  %v7915_v15 = vld [vmem:[%s14657_s3 + $0x13b8] sm:$0xff]  ;;  %v7760_v53 = vld [vmem:[%s14657_s3 + $0xee0] sm:$0xff] }
 0x1de   : > { %v7742_v59 = vld [vmem:[%s14657_s3 + $0xe50] sm:$0xff]  ;;  %v7743_v32 = vld [vmem:[%s14657_s3 + $0xe58] sm:$0xff] }
 0x1df   : > { %10258 = vmatpush3.bf16.msra.mxu1 %v10257_v11  ;;  %10410 = vmatpush3.bf16.msra.mxu0 %v10409_v13  ;;  %v7737_v11 = vld [vmem:[%s14657_s3 + $0xe28] sm:$0xff]  ;;  %v10303_v13 = vpack.c.bf16 %v7753_v3, %v7752_v2  ;;  %v10467_v3 = vpack.c.bf16 %v7915_v15, %v7914_v47  ;;  %v7899_v4 = vld [vmem:[%s14657_s3 + $0x1338] sm:$0xff] }
 0x1e0   : > { %10260 = vmatprep.subr.bf16.mxu1 %v10259_v18  ;;  %10412 = vmatprep.subr.bf16.mxu0 %v10411_v6  ;;  %v7754_v18 = vld [vmem:[%s14657_s3 + $0xeb0] sm:$0xff]  ;;  %v7755_v6 = vld [vmem:[%s14657_s3 + $0xeb8] sm:$0xff]  ;;  %v10305_v19 = vpack.c.bf16 %v7737_v11, %v7736_v55  ;;  %v7917_v55 = vld [vmem:[%s14657_s3 + $0x13c8] sm:$0xff]  ;;  %v10317_v11 = vpack.c.bf16 %v7743_v32, %v7742_v59 }
 0x1e1   : > { %v8442_v40 = vpop.f32.mrb[50].mxu0  ;;  %v7814_v59 = vld [vmem:[%s14657_s3 + $0x1090] sm:$0xff]  ;;  %v7815_v32 = vld [vmem:[%s14657_s3 + $0x1098] sm:$0xff] }
 0x1e2   : > { %v8443_v43 = vpop.f32.mrb[51].mxu0 }
 0x1e3   : > { %10262 = vmatpush3.bf16.msra.mxu1 %v10261_v39  ;;  %10414 = vmatpush3.bf16.msra.mxu0 %v10413_v27  ;;  %v12999_v57 = vadd.f32 %v8443_v43, %v8442_v40  ;;  %v10307_v39 = vpack.c.bf16 %v7755_v6, %v7754_v18  ;;  %v10459_v27 = vpack.c.bf16 %v7911_v33, %v7910_v49  ;;  %v7897_v43 = vld [vmem:[%s14657_s3 + $0x1328] sm:$0xff]  ;;  %v7900_v6 = vld [vmem:[%s14657_s3 + $0x1340] sm:$0xff]  ;;  %v7762_v33 = vld [vmem:[%s14657_s3 + $0xef0] sm:$0xff] }
 0x1e4   : > { %10296 = vmatprep.subr.bf16.mxu1 %v10295_v30  ;;  %10416 = vmatprep.subr.bf16.mxu0 %v10415_v34  ;;  %v7757_v30 = vld [vmem:[%s14657_s3 + $0xec8] sm:$0xff]  ;;  %v7912_v34 = vld [vmem:[%s14657_s3 + $0x13a0] sm:$0xff] }
 0x1e5   : > { %v10311_v22 = vpack.c.bf16 %v7757_v30, %v7756_v29  ;;  %v10463_v40 = vpack.c.bf16 %v7913_v24, %v7912_v34  ;;  %v7901_v49 = vld [vmem:[%s14657_s3 + $0x1348] sm:$0xff]  ;;  %v7746_v29 = vld [vmem:[%s14657_s3 + $0xe70] sm:$0xff]  ;;  %v7747_v30 = vld [vmem:[%s14657_s3 + $0xe78] sm:$0xff]  ;;  %v10475_v24 = vpack.c.bf16 %v7919_v21, %v7918_v42 }
 0x1e6   : > { %2263 = vmatmul.mubr.f32.vlgmr.msra.gmra.mrb[14].mxu1 %v11844_v48  ;;  %v7892_v48 = vld [vmem:[%s14657_s3 + $0x1300] sm:$0xff]  ;;  %v7801_v21 = vld [vmem:[%s14657_s3 + $0x1028] sm:$0xff] }
 0x1e7   : > { %10298 = vmatpush3.bf16.msra.mxu1 %v10297_v45  ;;  %10418 = vmatpush3.bf16.msra.mxu0 %v10417_v16  ;;  %v10457_v46 = vpack.c.bf16 %v7893_v7, %v7892_v48  ;;  %v7758_v45 = vld [vmem:[%s14657_s3 + $0xed0] sm:$0xff]  ;;  %v7759_v16 = vld [vmem:[%s14657_s3 + $0xed8] sm:$0xff]  ;;  %v7745_v48 = vld [vmem:[%s14657_s3 + $0xe68] sm:$0xff] }
 0x1e8   : > { %10300 = vmatprep.subr.bf16.mxu1 %v10299_v23  ;;  %10420 = vmatprep.subr.bf16.mxu0 %v10419_v58  ;;  %v10313_v23 = vpack.c.bf16 %v7741_v60, %v7740_v37  ;;  %v10315_v2 = vpack.c.bf16 %v7759_v16, %v7758_v45  ;;  %v7812_v37 = vld [vmem:[%s14657_s3 + $0x1080] sm:$0xff]  ;;  %v7797_v16 = vld [vmem:[%s14657_s3 + $0x1008] sm:$0xff] }
 0x1e9   : > { %2470 = vmatprep.mubr.f32.mxu1 %v12009_v31  ;;  %v7894_v31 = vld [vmem:[%s14657_s3 + $0x1310] sm:$0xff]  ;;  %v7800_v42 = vld [vmem:[%s14657_s3 + $0x1020] sm:$0xff] }
 0x1ea   : > { %v10461_v10 = vpack.c.bf16 %v7895_v28, %v7894_v31  ;;  %v10473_v28 = vpack.c.bf16 %v7901_v49, %v7900_v6  ;;  %v7817_v6 = vld [vmem:[%s14657_s3 + $0x10a8] sm:$0xff]  ;;  %v7972_v49 = vld [vmem:[%s14657_s3 + $0x1580] sm:$0xff] }
 0x1eb   : > { %10302 = vmatpush3.bf16.msra.mxu1 %v10301_v5  ;;  %10422 = vmatpush3.bf16.msra.mxu0 %v10421_v9  ;;  %v7761_v5 = vld [vmem:[%s14657_s3 + $0xee8] sm:$0xff]  ;;  %v7916_v9 = vld [vmem:[%s14657_s3 + $0x13c0] sm:$0xff] }
 0x1ec   : > { %10304 = vmatprep.subr.bf16.mxu1 %v10303_v13  ;;  %10456 = vmatprep.subr.bf16.mxu0 %v10455_v14  ;;  %v7744_v14 = vld [vmem:[%s14657_s3 + $0xe60] sm:$0xff]  ;;  %v10319_v7 = vpack.c.bf16 %v7761_v5, %v7760_v53  ;;  %v10471_v18 = vpack.c.bf16 %v7917_v55, %v7916_v9  ;;  %v7798_v9 = vld [vmem:[%s14657_s3 + $0x1010] sm:$0xff]  ;;  %v7799_v55 = vld [vmem:[%s14657_s3 + $0x1018] sm:$0xff] }
 0x1ed   : > { %v10321_v31 = vpack.c.bf16 %v7745_v48, %v7744_v14  ;;  %v7906_v48 = vld [vmem:[%s14657_s3 + $0x1370] sm:$0xff] }
 0x1ee   : > { %2783 = vmatmul.mubr.f32.vlgmr.msra.gmra.mrb[64].mxu0 %v12231_v52  ;;  %v7896_v52 = vld [vmem:[%s14657_s3 + $0x1320] sm:$0xff] }
 0x1ef   : > { %10306 = vmatpush3.bf16.msra.mxu1 %v10305_v19  ;;  %10458 = vmatpush3.bf16.msra.mxu0 %v10457_v46  ;;  %v10465_v58 = vpack.c.bf16 %v7897_v43, %v7896_v52  ;;  %v7763_v46 = vld [vmem:[%s14657_s3 + $0xef8] sm:$0xff]  ;;  %v7921_v52 = vld [vmem:[%s14657_s3 + $0x13e8] sm:$0xff]  ;;  %v10325_v43 = vpack.c.bf16 %v7747_v30, %v7746_v29  ;;  %v7974_v30 = vld [vmem:[%s14657_s3 + $0x1590] sm:$0xff] }
 0x1f0   : > { %10308 = vmatprep.subr.bf16.mxu1 %v10307_v39  ;;  %10460 = vmatprep.subr.bf16.mxu0 %v10459_v27  ;;  %v10323_v34 = vpack.c.bf16 %v7763_v46, %v7762_v33  ;;  %v7973_v33 = vld [vmem:[%s14657_s3 + $0x1588] sm:$0xff]  ;;  %v7819_v29 = vld [vmem:[%s14657_s3 + $0x10b8] sm:$0xff] }
 0x1f1   : > { %2990 = vmatprep.mubr.f32.mxu0 %v12446_v8  ;;  %v7898_v8 = vld [vmem:[%s14657_s3 + $0x1330] sm:$0xff] }
 0x1f2   : > { %v10469_v13 = vpack.c.bf16 %v7899_v4, %v7898_v8 }
 0x1f3   : > { %10310 = vmatpush3.bf16.msra.mxu1 %v10309_v50  ;;  %10462 = vmatpush3.bf16.msra.mxu0 %v10461_v10  ;;  %v7902_v50 = vld [vmem:[%s14657_s3 + $0x1350] sm:$0xff]  ;;  %v7903_v10 = vld [vmem:[%s14657_s3 + $0x1358] sm:$0xff] }
 0x1f4   : > { %10312 = vmatprep.subr.bf16.mxu1 %v10311_v22  ;;  %10464 = vmatprep.subr.bf16.mxu0 %v10463_v40  ;;  %v7813_v22 = vld [vmem:[%s14657_s3 + $0x1088] sm:$0xff]  ;;  %v7920_v40 = vld [vmem:[%s14657_s3 + $0x13e0] sm:$0xff]  ;;  %v10477_v45 = vpack.c.bf16 %v7903_v10, %v7902_v50  ;;  %v7802_v10 = vld [vmem:[%s14657_s3 + $0x1030] sm:$0xff] }
 0x1f5   : > { %v10359_v47 = vpack.c.bf16 %v7813_v22, %v7812_v37  ;;  %v10479_v15 = vpack.c.bf16 %v7921_v52, %v7920_v40  ;;  %v7803_v37 = vld [vmem:[%s14657_s3 + $0x1038] sm:$0xff] }
 0x1f6   : > { %v7959_v52 = vld [vmem:[%s14657_s3 + $0x1518] sm:$0xff] }
 0x1f7   : > { %10314 = vmatpush3.bf16.msra.mxu1 %v10313_v23  ;;  %10466 = vmatpush3.bf16.msra.mxu0 %v10465_v58  ;;  %v7904_v23 = vld [vmem:[%s14657_s3 + $0x1360] sm:$0xff]  ;;  %v7905_v58 = vld [vmem:[%s14657_s3 + $0x1368] sm:$0xff] }
 0x1f8   : > { %10316 = vmatprep.subr.bf16.mxu1 %v10315_v2  ;;  %10468 = vmatprep.subr.bf16.mxu0 %v10467_v3  ;;  %v7922_v2 = vld [vmem:[%s14657_s3 + $0x13f0] sm:$0xff]  ;;  %v7923_v3 = vld [vmem:[%s14657_s3 + $0x13f8] sm:$0xff]  ;;  %v10481_v5 = vpack.c.bf16 %v7905_v58, %v7904_v23  ;;  %v7804_v23 = vld [vmem:[%s14657_s3 + $0x1040] sm:$0xff] }
 0x1f9   : > { %v8372_v19 = vpop.f32.mrb[2].mxu1  ;;  %v10483_v14 = vpack.c.bf16 %v7923_v3, %v7922_v2  ;;  %v7805_v58 = vld [vmem:[%s14657_s3 + $0x1048] sm:$0xff]  ;;  %v7822_v3 = vld [vmem:[%s14657_s3 + $0x10d0] sm:$0xff] }
 0x1fa   : > { %v8373_v39 = vpop.f32.mrb[3].mxu1  ;;  %v7961_v2 = vld [vmem:[%s14657_s3 + $0x1528] sm:$0xff] }
 0x1fb   : > { %v8374_v27 = vadd.f32 %v8373_v39, %v8372_v19  ;;  %10318 = vmatpush3.bf16.msra.mxu1 %v10317_v11  ;;  %10470 = vmatpush3.bf16.msra.mxu0 %v10469_v13  ;;  %v10363_v13 = vpack.c.bf16 %v7815_v32, %v7814_v59  ;;  %v10365_v19 = vpack.c.bf16 %v7799_v55, %v7798_v9  ;;  %v7806_v55 = vld [vmem:[%s14657_s3 + $0x1050] sm:$0xff] }
 0x1fc   : > { %10320 = vmatprep.subr.bf16.mxu1 %v10319_v7  ;;  %10472 = vmatprep.subr.bf16.mxu0 %v10471_v18  ;;  %v7907_v7 = vld [vmem:[%s14657_s3 + $0x1378] sm:$0xff]  ;;  %v7816_v18 = vld [vmem:[%s14657_s3 + $0x10a0] sm:$0xff] }
 0x1fd   : > { %v13159_v60 = vadd.f32 %v8374_v27, %v12943_v62  ;;  %v7796_v62 = vld [vmem:[%s14657_s3 + $0x1000] sm:$0xff]  ;;  %v10485_v46 = vpack.c.bf16 %v7907_v7, %v7906_v48  ;;  %v10367_v39 = vpack.c.bf16 %v7817_v6, %v7816_v18  ;;  %v10519_v27 = vpack.c.bf16 %v7973_v33, %v7972_v49  ;;  %v7963_v7 = vld [vmem:[%s14657_s3 + $0x1538] sm:$0xff]  ;;  %v7825_v6 = vld [vmem:[%s14657_s3 + $0x10e8] sm:$0xff] }
 0x1fe   : > { %v10361_v53 = vpack.c.bf16 %v7797_v16, %v7796_v62  ;;  %v7976_v62 = vld [vmem:[%s14657_s3 + $0x15a0] sm:$0xff]  ;;  %v7977_v16 = vld [vmem:[%s14657_s3 + $0x15a8] sm:$0xff] }
 0x1ff   : > { %10322 = vmatpush3.bf16.msra.mxu1 %v10321_v31  ;;  %10474 = vmatpush3.bf16.msra.mxu0 %v10473_v28  ;;  %v7957_v31 = vld [vmem:[%s14657_s3 + $0x1508] sm:$0xff]  ;;  %v7818_v28 = vld [vmem:[%s14657_s3 + $0x10b0] sm:$0xff]  ;;  %v10527_v32 = vpack.c.bf16 %v7977_v16, %v7976_v62  ;;  %v7824_v18 = vld [vmem:[%s14657_s3 + $0x10e0] sm:$0xff] }
 0x200   : > { %10324 = vmatprep.subr.bf16.mxu1 %v10323_v34  ;;  %10476 = vmatprep.subr.bf16.mxu0 %v10475_v24  ;;  %v7975_v34 = vld [vmem:[%s14657_s3 + $0x1598] sm:$0xff]  ;;  %v10369_v24 = vpack.c.bf16 %v7801_v21, %v7800_v42  ;;  %v10371_v22 = vpack.c.bf16 %v7819_v29, %v7818_v28  ;;  %v7980_v49 = vld [vmem:[%s14657_s3 + $0x15c0] sm:$0xff]  ;;  %v7981_v33 = vld [vmem:[%s14657_s3 + $0x15c8] sm:$0xff] }
 0x201   : > { %v8512_v8 = vpop.f32.mrb[52].mxu0  ;;  %v10523_v40 = vpack.c.bf16 %v7975_v34, %v7974_v30  ;;  %v7808_v42 = vld [vmem:[%s14657_s3 + $0x1060] sm:$0xff]  ;;  %v7809_v21 = vld [vmem:[%s14657_s3 + $0x1068] sm:$0xff]  ;;  %v7826_v28 = vld [vmem:[%s14657_s3 + $0x10f0] sm:$0xff] }
 0x202   : > { %v8513_v4 = vpop.f32.mrb[53].mxu0  ;;  %v7827_v30 = vld [vmem:[%s14657_s3 + $0x10f8] sm:$0xff]  ;;  %v7982_v34 = vld [vmem:[%s14657_s3 + $0x15d0] sm:$0xff]  ;;  %v7876_v16 = vld [vmem:[%s14657_s3 + $0x1280] sm:$0xff] }
 0x203   : > { %10326 = vmatpush3.bf16.msra.mxu1 %v10325_v43  ;;  %10478 = vmatpush3.bf16.msra.mxu0 %v10477_v45  ;;  %v13200_v11 = vadd.f32 %v8513_v4, %v8512_v8  ;;  %v7820_v43 = vld [vmem:[%s14657_s3 + $0x10c0] sm:$0xff]  ;;  %v7821_v45 = vld [vmem:[%s14657_s3 + $0x10c8] sm:$0xff]  ;;  %v7823_v8 = vld [vmem:[%s14657_s3 + $0x10d8] sm:$0xff] }
 0x204   : > { %10360 = vmatprep.subr.bf16.mxu1 %v10359_v47  ;;  %10480 = vmatprep.subr.bf16.mxu0 %v10479_v15  ;;  %v10373_v47 = vpack.c.bf16 %v7803_v37, %v7802_v10  ;;  %v10375_v59 = vpack.c.bf16 %v7821_v45, %v7820_v43  ;;  %v7978_v4 = vld [vmem:[%s14657_s3 + $0x15b0] sm:$0xff]  ;;  %v10385_v37 = vpack.c.bf16 %v7809_v21, %v7808_v42  ;;  %v7967_v62 = vld [vmem:[%s14657_s3 + $0x1558] sm:$0xff]  ;;  %v7880_v42 = vld [vmem:[%s14657_s3 + $0x12a0] sm:$0xff] }
 0x205   : > { %v7966_v45 = vld [vmem:[%s14657_s3 + $0x1550] sm:$0xff]  ;;  %v7881_v21 = vld [vmem:[%s14657_s3 + $0x12a8] sm:$0xff] }
 0x206   : > { %2471 = vmatmul.mubr.f32.vlgmr.msra.gmra.mrb[16].mxu1 %v11998_v26  ;;  %v7956_v26 = vld [vmem:[%s14657_s3 + $0x1500] sm:$0xff] }
 0x207   : > { %10362 = vmatpush3.bf16.msra.mxu1 %v10361_v53  ;;  %10482 = vmatpush3.bf16.msra.mxu0 %v10481_v5  ;;  %v10521_v50 = vpack.c.bf16 %v7957_v31, %v7956_v26  ;;  %v7979_v53 = vld [vmem:[%s14657_s3 + $0x15b8] sm:$0xff]  ;;  %v10377_v5 = vpack.c.bf16 %v7805_v58, %v7804_v23  ;;  %v7964_v26 = vld [vmem:[%s14657_s3 + $0x1540] sm:$0xff]  ;;  %v7965_v31 = vld [vmem:[%s14657_s3 + $0x1548] sm:$0xff] }
 0x208   : > { %10364 = vmatprep.subr.bf16.mxu1 %v10363_v13  ;;  %10484 = vmatprep.subr.bf16.mxu0 %v10483_v14  ;;  %v7807_v13 = vld [vmem:[%s14657_s3 + $0x1058] sm:$0xff]  ;;  %v10379_v14 = vpack.c.bf16 %v7823_v8, %v7822_v3  ;;  %v10531_v48 = vpack.c.bf16 %v7979_v53, %v7978_v4  ;;  %v7984_v23 = vld [vmem:[%s14657_s3 + $0x15e0] sm:$0xff]  ;;  %v7985_v58 = vld [vmem:[%s14657_s3 + $0x15e8] sm:$0xff] }
 0x209   : > { %2678 = vmatprep.mubr.f32.mxu1 %v12213_v41  ;;  %v7958_v41 = vld [vmem:[%s14657_s3 + $0x1510] sm:$0xff]  ;;  %v7860_v3 = vld [vmem:[%s14657_s3 + $0x1200] sm:$0xff]  ;;  %v7861_v8 = vld [vmem:[%s14657_s3 + $0x1208] sm:$0xff] }
 0x20a   : > { %v10525_v15 = vpack.c.bf16 %v7959_v52, %v7958_v41  ;;  %v7811_v41 = vld [vmem:[%s14657_s3 + $0x1078] sm:$0xff]  ;;  %v10387_v52 = vpack.c.bf16 %v7827_v30, %v7826_v28  ;;  %v7969_v4 = vld [vmem:[%s14657_s3 + $0x1568] sm:$0xff]  ;;  %v7878_v53 = vld [vmem:[%s14657_s3 + $0x1290] sm:$0xff]  ;;  %v10431_v28 = vpack.c.bf16 %v7881_v21, %v7880_v42 }
 0x20b   : > { %10366 = vmatpush3.bf16.msra.mxu1 %v10365_v19  ;;  %10486 = vmatpush3.bf16.msra.mxu0 %v10485_v46  ;;  %v10381_v19 = vpack.c.bf16 %v7807_v13, %v7806_v55  ;;  %v7986_v55 = vld [vmem:[%s14657_s3 + $0x15f0] sm:$0xff]  ;;  %v7987_v13 = vld [vmem:[%s14657_s3 + $0x15f8] sm:$0xff] }
 0x20c   : > { %10368 = vmatprep.subr.bf16.mxu1 %v10367_v39  ;;  %10520 = vmatprep.subr.bf16.mxu0 %v10519_v27  ;;  %v10383_v39 = vpack.c.bf16 %v7825_v6, %v7824_v18  ;;  %v10535_v27 = vpack.c.bf16 %v7981_v33, %v7980_v49  ;;  %v7862_v6 = vld [vmem:[%s14657_s3 + $0x1210] sm:$0xff]  ;;  %v7863_v49 = vld [vmem:[%s14657_s3 + $0x1218] sm:$0xff] }
 0x20d   : > { %v7970_v33 = vld [vmem:[%s14657_s3 + $0x1570] sm:$0xff] }
 0x20e   : > { %2991 = vmatmul.mubr.f32.vlgmr.msra.gmra.mrb[66].mxu0 %v12435_v63  ;;  %v7960_v63 = vld [vmem:[%s14657_s3 + $0x1520] sm:$0xff] }
 0x20f   : > { %10370 = vmatpush3.bf16.msra.mxu1 %v10369_v24  ;;  %10522 = vmatpush3.bf16.msra.mxu0 %v10521_v50  ;;  %v10529_v9 = vpack.c.bf16 %v7961_v2, %v7960_v63  ;;  %v7983_v24 = vld [vmem:[%s14657_s3 + $0x15d8] sm:$0xff]  ;;  %v10541_v63 = vpack.c.bf16 %v7967_v62, %v7966_v45  ;;  %v10543_v2 = vpack.c.bf16 %v7985_v58, %v7984_v23  ;;  %v8040_v23 = vld [vmem:[%s14657_s3 + $0x17a0] sm:$0xff]  ;;  %v8041_v58 = vld [vmem:[%s14657_s3 + $0x17a8] sm:$0xff] }
 0x210   : > { %10372 = vmatprep.subr.bf16.mxu1 %v10371_v22  ;;  %10524 = vmatprep.subr.bf16.mxu0 %v10523_v40  ;;  %v10537_v22 = vpack.c.bf16 %v7965_v31, %v7964_v26  ;;  %v7810_v40 = vld [vmem:[%s14657_s3 + $0x1070] sm:$0xff]  ;;  %v10539_v43 = vpack.c.bf16 %v7983_v24, %v7982_v34  ;;  %v10429_v26 = vpack.c.bf16 %v7863_v49, %v7862_v6  ;;  %v8020_v34 = vld [vmem:[%s14657_s3 + $0x1700] sm:$0xff]  ;;  %v8027_v6 = vld [vmem:[%s14657_s3 + $0x1738] sm:$0xff] }
 0x211   : > { %3198 = vmatprep.mubr.f32.mxu0 %v12495_v36  ;;  %v7962_v36 = vld [vmem:[%s14657_s3 + $0x1530] sm:$0xff]  ;;  %v7888_v49 = vld [vmem:[%s14657_s3 + $0x12e0] sm:$0xff] }
 0x212   : > { %v10533_v46 = vpack.c.bf16 %v7963_v7, %v7962_v36  ;;  %v7882_v24 = vld [vmem:[%s14657_s3 + $0x12b0] sm:$0xff] }
 0x213   : > { %10374 = vmatpush3.bf16.msra.mxu1 %v10373_v47  ;;  %10526 = vmatpush3.bf16.msra.mxu0 %v10525_v15  ;;  %v7877_v15 = vld [vmem:[%s14657_s3 + $0x1288] sm:$0xff] }
 0x214   : > { %10376 = vmatprep.subr.bf16.mxu1 %v10375_v59  ;;  %10528 = vmatprep.subr.bf16.mxu0 %v10527_v32  ;;  %v10389_v32 = vpack.c.bf16 %v7811_v41, %v7810_v40  ;;  %v7866_v41 = vld [vmem:[%s14657_s3 + $0x1230] sm:$0xff] }
 0x217   : > { %10378 = vmatpush3.bf16.msra.mxu1 %v10377_v5  ;;  %10530 = vmatpush3.bf16.msra.mxu0 %v10529_v9  ;;  %v7879_v5 = vld [vmem:[%s14657_s3 + $0x1298] sm:$0xff] }
 0x218   : > { %10380 = vmatprep.subr.bf16.mxu1 %v10379_v14  ;;  %10532 = vmatprep.subr.bf16.mxu0 %v10531_v48  ;;  %v10425_v48 = vpack.c.bf16 %v7861_v8, %v7860_v3  ;;  %v10427_v18 = vpack.c.bf16 %v7879_v5, %v7878_v53  ;;  %v7869_v3 = vld [vmem:[%s14657_s3 + $0x1248] sm:$0xff]  ;;  %v8024_v8 = vld [vmem:[%s14657_s3 + $0x1720] sm:$0xff]  ;;  %v8042_v53 = vld [vmem:[%s14657_s3 + $0x17b0] sm:$0xff] }
 0x219   : > { %v8407_v29 = vpop.f32.mrb[4].mxu1  ;;  %v8043_v5 = vld [vmem:[%s14657_s3 + $0x17b8] sm:$0xff] }
 0x21a   : > { %v8408_v50 = vpop.f32.mrb[5].mxu1 }
 0x21b   : > { %v8409_v10 = vadd.f32 %v8408_v50, %v8407_v29  ;;  %10382 = vmatpush3.bf16.msra.mxu1 %v10381_v19  ;;  %10534 = vmatpush3.bf16.msra.mxu0 %v10533_v46  ;;  %v10547_v19 = vpack.c.bf16 %v7987_v13, %v7986_v55  ;;  %v7971_v46 = vld [vmem:[%s14657_s3 + $0x1578] sm:$0xff]  ;;  %v7865_v29 = vld [vmem:[%s14657_s3 + $0x1228] sm:$0xff] }
 0x21c   : > { %10384 = vmatprep.subr.bf16.mxu1 %v10383_v39  ;;  %10536 = vmatprep.subr.bf16.mxu0 %v10535_v27  ;;  %v8036_v39 = vld [vmem:[%s14657_s3 + $0x1780] sm:$0xff]  ;;  %v8037_v27 = vld [vmem:[%s14657_s3 + $0x1788] sm:$0xff]  ;;  %v10549_v31 = vpack.c.bf16 %v7971_v46, %v7970_v33  ;;  %v7883_v50 = vld [vmem:[%s14657_s3 + $0x12b8] sm:$0xff] }
 0x21d   : > { %v1228_v47 = vadd.f32 %v8409_v10, %v13159_v60  ;;  %v10423_v60 = vpack.c.bf16 %v7877_v15, %v7876_v16  ;;  %v10583_v30 = vpack.c.bf16 %v8037_v27, %v8036_v39  ;;  %v8038_v10 = vld [vmem:[%s14657_s3 + $0x1790] sm:$0xff]  ;;  %v10435_v45 = vpack.c.bf16 %v7883_v50, %v7882_v24  ;;  %v8023_v16 = vld [vmem:[%s14657_s3 + $0x1718] sm:$0xff]  ;;  %v7885_v15 = vld [vmem:[%s14657_s3 + $0x12c8] sm:$0xff] }
 0x21e   : > { %v7889_v33 = vld [vmem:[%s14657_s3 + $0x12e8] sm:$0xff]  ;;  %v7872_v27 = vld [vmem:[%s14657_s3 + $0x1260] sm:$0xff]  ;;  %v8046_v24 = vld [vmem:[%s14657_s3 + $0x17d0] sm:$0xff] }
 0x21f   : > { %v13370_v59 = vadd.f32 %v12999_v57, %v1228_v47  ;;  %10386 = vmatpush3.bf16.msra.mxu1 %v10385_v37  ;;  %10538 = vmatpush3.bf16.msra.mxu0 %v10537_v22  ;;  %v7968_v57 = vld [vmem:[%s14657_s3 + $0x1560] sm:$0xff]  ;;  %v8039_v37 = vld [vmem:[%s14657_s3 + $0x1798] sm:$0xff]  ;;  %v8045_v46 = vld [vmem:[%s14657_s3 + $0x17c8] sm:$0xff]  ;;  %v10447_v39 = vpack.c.bf16 %v7889_v33, %v7888_v49 }
 0x220   : > { %10388 = vmatprep.subr.bf16.mxu1 %v10387_v52  ;;  %10540 = vmatprep.subr.bf16.mxu0 %v10539_v43  ;;  %v10545_v7 = vpack.c.bf16 %v7969_v4, %v7968_v57  ;;  %v7867_v52 = vld [vmem:[%s14657_s3 + $0x1238] sm:$0xff]  ;;  %v8022_v43 = vld [vmem:[%s14657_s3 + $0x1710] sm:$0xff]  ;;  %v10587_v62 = vpack.c.bf16 %v8039_v37, %v8038_v10  ;;  %v7884_v47 = vld [vmem:[%s14657_s3 + $0x12c0] sm:$0xff] }
 0x221   : > { %v8582_v9 = vpop.f32.mrb[54].mxu0  ;;  %v7886_v57 = vld [vmem:[%s14657_s3 + $0x12d0] sm:$0xff]  ;;  %v7887_v4 = vld [vmem:[%s14657_s3 + $0x12d8] sm:$0xff] }
 0x222   : > { %v8583_v14 = vpop.f32.mrb[55].mxu0  ;;  %v10443_v13 = vpack.c.bf16 %v7887_v4, %v7886_v57  ;;  %v8047_v50 = vld [vmem:[%s14657_s3 + $0x17d8] sm:$0xff] }
 0x223   : > { %10390 = vmatpush3.bf16.msra.mxu1 %v10389_v32  ;;  %10542 = vmatpush3.bf16.msra.mxu0 %v10541_v63  ;;  %v13396_v36 = vadd.f32 %v8583_v14, %v8582_v9  ;;  %v10437_v32 = vpack.c.bf16 %v7867_v52, %v7866_v41  ;;  %v10589_v63 = vpack.c.bf16 %v8023_v16, %v8022_v43  ;;  %v7870_v14 = vld [vmem:[%s14657_s3 + $0x1250] sm:$0xff]  ;;  %v7875_v52 = vld [vmem:[%s14657_s3 + $0x1278] sm:$0xff] }
 0x224   : > { %10424 = vmatprep.subr.bf16.mxu1 %v10423_v60  ;;  %10544 = vmatprep.subr.bf16.mxu0 %v10543_v2  ;;  %v10439_v60 = vpack.c.bf16 %v7885_v15, %v7884_v47  ;;  %v7868_v2 = vld [vmem:[%s14657_s3 + $0x1240] sm:$0xff]  ;;  %v7874_v41 = vld [vmem:[%s14657_s3 + $0x1270] sm:$0xff]  ;;  %v8031_v16 = vld [vmem:[%s14657_s3 + $0x1758] sm:$0xff] }
 0x225   : > { %v10441_v9 = vpack.c.bf16 %v7869_v3, %v7868_v2  ;;  %v8030_v43 = vld [vmem:[%s14657_s3 + $0x1750] sm:$0xff]  ;;  %v7940_v47 = vld [vmem:[%s14657_s3 + $0x1480] sm:$0xff]  ;;  %v7941_v15 = vld [vmem:[%s14657_s3 + $0x1488] sm:$0xff] }
 0x226   : > { %2679 = vmatmul.mubr.f32.vlgmr.msra.gmra.mrb[18].mxu1 %v12202_v35  ;;  %v7864_v35 = vld [vmem:[%s14657_s3 + $0x1220] sm:$0xff]  ;;  %v7925_v3 = vld [vmem:[%s14657_s3 + $0x1408] sm:$0xff]  ;;  %v7943_v57 = vld [vmem:[%s14657_s3 + $0x1498] sm:$0xff] }
 0x227   : > { %10426 = vmatpush3.bf16.msra.mxu1 %v10425_v48  ;;  %2886 = vmatprep.mubr.f32.mxu1 %v12417_v1  ;;  %v8021_v1 = vld [vmem:[%s14657_s3 + $0x1708] sm:$0xff]  ;;  %v10433_v22 = vpack.c.bf16 %v7865_v29, %v7864_v35  ;;  %v7871_v48 = vld [vmem:[%s14657_s3 + $0x1258] sm:$0xff]  ;;  %v7924_v2 = vld [vmem:[%s14657_s3 + $0x1400] sm:$0xff] }
 0x228   : > { %10546 = vmatpush3.bf16.msra.mxu0 %v10545_v7  ;;  %10428 = vmatprep.subr.bf16.mxu1 %v10427_v18  ;;  %v10585_v40 = vpack.c.bf16 %v8021_v1, %v8020_v34  ;;  %v8026_v7 = vld [vmem:[%s14657_s3 + $0x1730] sm:$0xff]  ;;  %v10595_v18 = vpack.c.bf16 %v8043_v5, %v8042_v53  ;;  %v10445_v42 = vpack.c.bf16 %v7871_v48, %v7870_v14  ;;  %v8029_v29 = vld [vmem:[%s14657_s3 + $0x1748] sm:$0xff]  ;;  %v7891_v34 = vld [vmem:[%s14657_s3 + $0x12f8] sm:$0xff] }
 0x229   : > { %10548 = vmatprep.subr.bf16.mxu0 %v10547_v19  ;;  %v8044_v19 = vld [vmem:[%s14657_s3 + $0x17c0] sm:$0xff]  ;;  %v10597_v21 = vpack.c.bf16 %v8027_v6, %v8026_v7  ;;  %v8050_v53 = vld [vmem:[%s14657_s3 + $0x17f0] sm:$0xff]  ;;  %v8051_v5 = vld [vmem:[%s14657_s3 + $0x17f8] sm:$0xff] }
 0x22a   : > { %v10599_v35 = vpack.c.bf16 %v8045_v46, %v8044_v19  ;;  %v7926_v7 = vld [vmem:[%s14657_s3 + $0x1410] sm:$0xff]  ;;  %v10611_v49 = vpack.c.bf16 %v8051_v5, %v8050_v53  ;;  %v8035_v33 = vld [vmem:[%s14657_s3 + $0x1778] sm:$0xff]  ;;  %v7944_v19 = vld [vmem:[%s14657_s3 + $0x14a0] sm:$0xff] }
 0x22b   : > { %10430 = vmatpush3.bf16.msra.mxu1 %v10429_v26  ;;  %v7873_v26 = vld [vmem:[%s14657_s3 + $0x1268] sm:$0xff]  ;;  %v8034_v6 = vld [vmem:[%s14657_s3 + $0x1770] sm:$0xff] }
 0x22c   : > { %10550 = vmatpush3.bf16.msra.mxu0 %v10549_v31  ;;  %10432 = vmatprep.subr.bf16.mxu1 %v10431_v28  ;;  %v8028_v31 = vld [vmem:[%s14657_s3 + $0x1740] sm:$0xff]  ;;  %v10449_v37 = vpack.c.bf16 %v7873_v26, %v7872_v27  ;;  %v7945_v46 = vld [vmem:[%s14657_s3 + $0x14a8] sm:$0xff] }
 0x22d   : > { %10584 = vmatprep.subr.bf16.mxu0 %v10583_v30  ;;  %v7890_v30 = vld [vmem:[%s14657_s3 + $0x12f0] sm:$0xff]  ;;  %v7928_v27 = vld [vmem:[%s14657_s3 + $0x1420] sm:$0xff]  ;;  %v7929_v26 = vld [vmem:[%s14657_s3 + $0x1428] sm:$0xff] }
 0x22f   : > { %3199 = vmatmul.mubr.f32.vlgmr.msra.gmra.mrb[68].mxu0 %v12487_v20  ;;  %10434 = vmatpush3.bf16.msra.mxu1 %v10433_v22  ;;  %v10591_v20 = vpack.c.bf16 %v8041_v58, %v8040_v23  ;;  %v10601_v22 = vpack.c.bf16 %v8029_v29, %v8028_v31  ;;  %v8048_v23 = vld [vmem:[%s14657_s3 + $0x17e0] sm:$0xff]  ;;  %v10497_v31 = vpack.c.bf16 %v7929_v26, %v7928_v27  ;;  %v7931_v29 = vld [vmem:[%s14657_s3 + $0x1438] sm:$0xff] }
 0x230   : > { %10586 = vmatpush3.bf16.msra.mxu0 %v10585_v40  ;;  %3406 = vmatprep.mubr.f32.mxu0 %v12527_v61  ;;  %v8025_v61 = vld [vmem:[%s14657_s3 + $0x1728] sm:$0xff]  ;;  %v10451_v40 = vpack.c.bf16 %v7891_v34, %v7890_v30  ;;  %v7948_v30 = vld [vmem:[%s14657_s3 + $0x14c0] sm:$0xff] }
 0x231   : > { %10436 = vmatprep.subr.bf16.mxu1 %v10435_v45  ;;  %10588 = vmatprep.subr.bf16.mxu0 %v10587_v62  ;;  %v10593_v55 = vpack.c.bf16 %v8025_v61, %v8024_v8  ;;  %v10603_v62 = vpack.c.bf16 %v8047_v50, %v8046_v24  ;;  %v8032_v8 = vld [vmem:[%s14657_s3 + $0x1760] sm:$0xff]  ;;  %v7942_v61 = vld [vmem:[%s14657_s3 + $0x1490] sm:$0xff]  ;;  %v7949_v34 = vld [vmem:[%s14657_s3 + $0x14c8] sm:$0xff] }
 0x232   : > { %v10491_v48 = vpack.c.bf16 %v7943_v57, %v7942_v61  ;;  %v10503_v24 = vpack.c.bf16 %v7949_v34, %v7948_v30  ;;  %v7932_v50 = vld [vmem:[%s14657_s3 + $0x1440] sm:$0xff]  ;;  %v8005_v57 = vld [vmem:[%s14657_s3 + $0x1688] sm:$0xff] }
 0x233   : > { %10438 = vmatpush3.bf16.msra.mxu1 %v10437_v32  ;;  %v10453_v32 = vpack.c.bf16 %v7875_v52, %v7874_v41  ;;  %v7934_v41 = vld [vmem:[%s14657_s3 + $0x1450] sm:$0xff]  ;;  %v7935_v52 = vld [vmem:[%s14657_s3 + $0x1458] sm:$0xff]  ;;  %v8004_v61 = vld [vmem:[%s14657_s3 + $0x1680] sm:$0xff] }
 0x234   : > { %10590 = vmatpush3.bf16.msra.mxu0 %v10589_v63  ;;  %10440 = vmatprep.subr.bf16.mxu1 %v10439_v60  ;;  %v10605_v63 = vpack.c.bf16 %v8031_v16, %v8030_v43  ;;  %v10487_v60 = vpack.c.bf16 %v7941_v15, %v7940_v47  ;;  %v7952_v43 = vld [vmem:[%s14657_s3 + $0x14e0] sm:$0xff]  ;;  %v7937_v15 = vld [vmem:[%s14657_s3 + $0x1468] sm:$0xff]  ;;  %v10551_v5 = vpack.c.bf16 %v8005_v57, %v8004_v61 }
 0x235   : > { %10592 = vmatprep.subr.bf16.mxu0 %v10591_v20  ;;  %v8033_v20 = vld [vmem:[%s14657_s3 + $0x1768] sm:$0xff]  ;;  %v7936_v47 = vld [vmem:[%s14657_s3 + $0x1460] sm:$0xff] }
 0x236   : > { %v10609_v14 = vpack.c.bf16 %v8033_v20, %v8032_v8  ;;  %v7938_v8 = vld [vmem:[%s14657_s3 + $0x1470] sm:$0xff]  ;;  %v7992_v26 = vld [vmem:[%s14657_s3 + $0x1620] sm:$0xff]  ;;  %v8013_v30 = vld [vmem:[%s14657_s3 + $0x16c8] sm:$0xff] }
 0x237   : > { %10442 = vmatpush3.bf16.msra.mxu1 %v10441_v9  ;;  %v8068_v61 = vld [vmem:[%s14657_s3 + $0x1880] sm:$0xff]  ;;  %v8069_v57 = vld [vmem:[%s14657_s3 + $0x1888] sm:$0xff] }
 0x238   : > { %10594 = vmatpush3.bf16.msra.mxu0 %v10593_v55  ;;  %10444 = vmatprep.subr.bf16.mxu1 %v10443_v13  ;;  %v10489_v55 = vpack.c.bf16 %v7925_v3, %v7924_v2  ;;  %v10513_v2 = vpack.c.bf16 %v7937_v15, %v7936_v47  ;;  %v8001_v47 = vld [vmem:[%s14657_s3 + $0x1668] sm:$0xff] }
 0x239   : > { %v8477_v28 = vpop.f32.mrb[6].mxu1  ;;  %10596 = vmatprep.subr.bf16.mxu0 %v10595_v18  ;;  %v7927_v18 = vld [vmem:[%s14657_s3 + $0x1418] sm:$0xff] }
 0x23a   : > { %v8478_v1 = vpop.f32.mrb[7].mxu1 }
 0x23b   : > { %v8479_v10 = vadd.f32 %v8478_v1, %v8477_v28  ;;  %10446 = vmatpush3.bf16.msra.mxu1 %v10445_v42  ;;  %v10493_v42 = vpack.c.bf16 %v7927_v18, %v7926_v7 }
 0x23c   : > { %10598 = vmatpush3.bf16.msra.mxu0 %v10597_v21  ;;  %10448 = vmatprep.subr.bf16.mxu1 %v10447_v39  ;;  %v10613_v21 = vpack.c.bf16 %v8035_v33, %v8034_v6  ;;  %v10495_v39 = vpack.c.bf16 %v7945_v46, %v7944_v19  ;;  %v3517_v6 = vld [vmem:[%s14695_s1] sm:$0xff]  ;;  %v7990_v33 = vld [vmem:[%s14657_s3 + $0x1610] sm:$0xff]  ;;  %v7991_v19 = vld [vmem:[%s14657_s3 + $0x1618] sm:$0xff]  ;;  %v11049_v46 = vmov 0  }
 0x23d   : > { %v1436_v45 = vadd.f32 %v8479_v10, %v13370_v59  ;;  %10600 = vmatprep.subr.bf16.mxu0 %v10599_v35  ;;  %v8049_v59 = vld [vmem:[%s14657_s3 + $0x17e8] sm:$0xff]  ;;  %v7930_v35 = vld [vmem:[%s14657_s3 + $0x1430] sm:$0xff]  ;;  %10982 = vset.pattern.permute.xlu0 %v11049_v46 }
 0x23e   : > { %v10501_v1 = vpack.c.bf16 %v7931_v29, %v7930_v35  ;;  %v7933_v10 = vld [vmem:[%s14657_s3 + $0x1448] sm:$0xff]  ;;  %3520 = vperm.xlu0 %10982, %v3517_v6   ;;  %10983 = vset.pattern.permute.xlu1 %v11049_v46  ;;  %v7995_v35 = vld [vmem:[%s14657_s3 + $0x1638] sm:$0xff]  ;;  %v8012_v29 = vld [vmem:[%s14657_s3 + $0x16c0] sm:$0xff] }
 0x23f   : > { %v13572_v58 = vadd.f32 %v13200_v11, %v1436_v45  ;;  %10450 = vmatpush3.bf16.msra.mxu1 %v10449_v37  ;;  %v10607_v11 = vpack.c.bf16 %v8049_v59, %v8048_v23  ;;  %v7950_v37 = vld [vmem:[%s14657_s3 + $0x14d0] sm:$0xff]  ;;  %v7953_v45 = vld [vmem:[%s14657_s3 + $0x14e8] sm:$0xff]  ;;  %v8072_v46 = vld [vmem:[%s14657_s3 + $0x18a0] sm:$0xff] }
 0x240   : > { %10602 = vmatpush3.bf16.msra.mxu0 %v10601_v22  ;;  %10452 = vmatprep.subr.bf16.mxu1 %v10451_v40  ;;  %v10505_v22 = vpack.c.bf16 %v7933_v10, %v7932_v50  ;;  %v10511_v16 = vpack.c.bf16 %v7953_v45, %v7952_v43  ;;  %v7954_v59 = vld [vmem:[%s14657_s3 + $0x14f0] sm:$0xff]  ;;  %v7997_v50 = vld [vmem:[%s14657_s3 + $0x1648] sm:$0xff] }
 0x241   : > { %10604 = vmatprep.subr.bf16.mxu0 %v10603_v62  ;;  %v8652_v4 = vpop.f32.mrb[56].mxu0  ;;  %v10509_v62 = vpack.c.bf16 %v7935_v52, %v7934_v41  ;;  %v8014_v10 = vld [vmem:[%s14657_s3 + $0x16d0] sm:$0xff]  ;;  %v7999_v41 = vld [vmem:[%s14657_s3 + $0x1658] sm:$0xff]  ;;  %v8016_v52 = vld [vmem:[%s14657_s3 + $0x16e0] sm:$0xff] }
 0x242   : > { %v8653_v9 = vpop.f32.mrb[57].mxu0  ;;  %v8017_v43 = vld [vmem:[%s14657_s3 + $0x16e8] sm:$0xff] }
 0x243   : > { %10454 = vmatpush3.bf16.msra.mxu1 %v10453_v32  ;;  %v13598_v13 = vadd.f32 %v8653_v9, %v8652_v4  ;;  %v7955_v32 = vld [vmem:[%s14657_s3 + $0x14f8] sm:$0xff]  ;;  %v7988_v9 = vld [vmem:[%s14657_s3 + $0x1600] sm:$0xff] }
 0x244   : > { %10606 = vmatpush3.bf16.msra.mxu0 %v10605_v63  ;;  %10488 = vmatprep.subr.bf16.mxu1 %v10487_v60  ;;  %v10515_v3 = vpack.c.bf16 %v7955_v32, %v7954_v59  ;;  %v8019_v59 = vld [vmem:[%s14657_s3 + $0x16f8] sm:$0xff] }
 0x245   : > { %10608 = vmatprep.subr.bf16.mxu0 %v10607_v11  ;;  %v7939_v11 = vld [vmem:[%s14657_s3 + $0x1478] sm:$0xff] }
 0x246   : > { %2887 = vmatmul.mubr.f32.vlgmr.msra.gmra.mrb[20].mxu1 %v12406_v44  ;;  %v7946_v44 = vld [vmem:[%s14657_s3 + $0x14b0] sm:$0xff]  ;;  %v10517_v53 = vpack.c.bf16 %v7939_v11, %v7938_v8  ;;  %v8003_v11 = vld [vmem:[%s14657_s3 + $0x1678] sm:$0xff] }
 0x247   : > { %10490 = vmatpush3.bf16.msra.mxu1 %v10489_v55  ;;  %3094 = vmatprep.mubr.f32.mxu1 %v12475_v25  ;;  %v7947_v25 = vld [vmem:[%s14657_s3 + $0x14b8] sm:$0xff]  ;;  %v8006_v55 = vld [vmem:[%s14657_s3 + $0x1690] sm:$0xff] }
 0x248   : > { %10610 = vmatpush3.bf16.msra.mxu0 %v10609_v14  ;;  %10492 = vmatprep.subr.bf16.mxu1 %v10491_v48  ;;  %v10499_v28 = vpack.c.bf16 %v7947_v25, %v7946_v44  ;;  %v7993_v44 = vld [vmem:[%s14657_s3 + $0x1628] sm:$0xff]  ;;  %v8010_v25 = vld [vmem:[%s14657_s3 + $0x16b0] sm:$0xff] }
 0x249   : > { %10612 = vmatprep.subr.bf16.mxu0 %v10611_v49  ;;  %v8002_v8 = vld [vmem:[%s14657_s3 + $0x1670] sm:$0xff] }
 0x24b   : > { %10494 = vmatpush3.bf16.msra.mxu1 %v10493_v42  ;;  %v8008_v42 = vld [vmem:[%s14657_s3 + $0x16a0] sm:$0xff] }
 0x24c   : > { %10614 = vmatpush3.bf16.msra.mxu0 %v10613_v21  ;;  %10496 = vmatprep.subr.bf16.mxu1 %v10495_v39  ;;  %v8009_v21 = vld [vmem:[%s14657_s3 + $0x16a8] sm:$0xff]  ;;  %v10557_v39 = vpack.c.bf16 %v7991_v19, %v7990_v33  ;;  %v8054_v33 = vld [vmem:[%s14657_s3 + $0x1810] sm:$0xff]  ;;  %v8055_v19 = vld [vmem:[%s14657_s3 + $0x1818] sm:$0xff] }
 0x24d   : > { %v10559_v27 = vpack.c.bf16 %v8009_v21, %v8008_v42  ;;  %v8073_v42 = vld [vmem:[%s14657_s3 + $0x18a8] sm:$0xff]  ;;  %v10621_v21 = vpack.c.bf16 %v8055_v19, %v8054_v33 }
 0x24f   : > { %3407 = vmatmul.mubr.f32.vlgmr.msra.gmra.mrb[70].mxu0 %v12519_v54  ;;  %10498 = vmatpush3.bf16.msra.mxu1 %v10497_v31  ;;  %v7951_v54 = vld [vmem:[%s14657_s3 + $0x14d8] sm:$0xff] }
 0x250   : > { %10500 = vmatprep.subr.bf16.mxu1 %v10499_v28  ;;  %v10507_v40 = vpack.c.bf16 %v7951_v54, %v7950_v37  ;;  %v7994_v28 = vld [vmem:[%s14657_s3 + $0x1630] sm:$0xff]  ;;  %v8015_v37 = vld [vmem:[%s14657_s3 + $0x16d8] sm:$0xff] }
 0x251   : > { %v10565_v34 = vpack.c.bf16 %v7995_v35, %v7994_v28  ;;  %v8077_v28 = vld [vmem:[%s14657_s3 + $0x18c8] sm:$0xff] }
 0x253   : > { %10502 = vmatpush3.bf16.msra.mxu1 %v10501_v1  ;;  %v10567_v1 = vpack.c.bf16 %v8013_v30, %v8012_v29  ;;  %v8060_v30 = vld [vmem:[%s14657_s3 + $0x1840] sm:$0xff] }
 0x254   : > { %10504 = vmatprep.subr.bf16.mxu1 %v10503_v24  ;;  %v7996_v24 = vld [vmem:[%s14657_s3 + $0x1640] sm:$0xff] }
 0x255   : > { %v10569_v54 = vpack.c.bf16 %v7997_v50, %v7996_v24  ;;  %v8079_v24 = vld [vmem:[%s14657_s3 + $0x18d8] sm:$0xff] }
 0x257   : > { %10506 = vmatpush3.bf16.msra.mxu1 %v10505_v22  ;;  %v10571_v22 = vpack.c.bf16 %v8015_v37, %v8014_v10  ;;  %v8062_v37 = vld [vmem:[%s14657_s3 + $0x1850] sm:$0xff] }
 0x258   : > { %10508 = vmatprep.subr.bf16.mxu1 %v10507_v40  ;;  %v7998_v40 = vld [vmem:[%s14657_s3 + $0x1650] sm:$0xff] }
 0x259   : > { %v8547_v23 = vpop.f32.mrb[8].mxu1  ;;  %v10573_v45 = vpack.c.bf16 %v7999_v41, %v7998_v40  ;;  %v8081_v40 = vld [vmem:[%s14657_s3 + $0x18e8] sm:$0xff] }
 0x25a   : > { %v8548_v63 = vpop.f32.mrb[9].mxu1 }
 0x25b   : > { %v8549_v60 = vadd.f32 %v8548_v63, %v8547_v23  ;;  %10510 = vmatpush3.bf16.msra.mxu1 %v10509_v62  ;;  %v10575_v62 = vpack.c.bf16 %v8017_v43, %v8016_v52  ;;  %v8018_v23 = vld [vmem:[%s14657_s3 + $0x16f0] sm:$0xff]  ;;  %v8064_v43 = vld [vmem:[%s14657_s3 + $0x1860] sm:$0xff] }
 0x25c   : > { %10512 = vmatprep.subr.bf16.mxu1 %v10511_v16  ;;  %v8000_v16 = vld [vmem:[%s14657_s3 + $0x1660] sm:$0xff] }
 0x25d   : > { %v1644_v20 = vadd.f32 %v8549_v60, %v13572_v58  ;;  %v7989_v58 = vld [vmem:[%s14657_s3 + $0x1608] sm:$0xff]  ;;  %v10577_v60 = vpack.c.bf16 %v8001_v47, %v8000_v16  ;;  %v8082_v16 = vld [vmem:[%s14657_s3 + $0x18f0] sm:$0xff]  ;;  %v8083_v47 = vld [vmem:[%s14657_s3 + $0x18f8] sm:$0xff] }
 0x25e   : > { %v10553_v7 = vpack.c.bf16 %v7989_v58, %v7988_v9  ;;  %v10581_v9 = vpack.c.bf16 %v8003_v11, %v8002_v8  ;;  %v10615_v58 = vpack.c.bf16 %v8069_v57, %v8068_v61 }
 0x25f   : > { %v13695_v4 = vadd.f32 %v13396_v36, %v1644_v20  ;;  %10514 = vmatpush3.bf16.msra.mxu1 %v10513_v2  ;;  %v8007_v36 = vld [vmem:[%s14657_s3 + $0x1698] sm:$0xff]  ;;  %v4579_v2 = vld [vmem:[%s14659_s5] sm:$0xff] }
 0x260   : > { %10516 = vmatprep.subr.bf16.mxu1 %v10515_v3  ;;  %v10555_v49 = vpack.c.bf16 %v8007_v36, %v8006_v55  ;;  %v10579_v3 = vpack.c.bf16 %v8019_v59, %v8018_v23  ;;  %4583 = vperm.xlu0 %10982, %v4579_v2   ;;  %v8053_v55 = vld [vmem:[%s14657_s3 + $0x1808] sm:$0xff]  ;;  %v8070_v36 = vld [vmem:[%s14657_s3 + $0x1890] sm:$0xff] }
 0x261   : > { %v8722_v14 = vpop.f32.mrb[58].mxu0 }
 0x262   : > { %v8723_v48 = vpop.f32.mrb[59].mxu0 }
 0x263   : > { %10518 = vmatpush3.bf16.msra.mxu1 %v10517_v53  ;;  %v13709_v18 = vadd.f32 %v8723_v48, %v8722_v14  ;;  %v5597_v53 = vld [vmem:[%s14662_s8 + $0x8] sm:$0xff] }
 0x264   : > { %10552 = vmatprep.subr.bf16.mxu1 %v10551_v5  ;;  %5605 = vperm.xlu0 %10982, %v5597_v53  }
 0x266   : > { %3095 = vmatmul.mubr.f32.vlgmr.msra.gmra.mrb[22].mxu1 %v12464_v17  ;;  %v8011_v17 = vld [vmem:[%s14657_s3 + $0x16b8] sm:$0xff] }
 0x267   : > { %10554 = vmatpush3.bf16.msra.mxu1 %v10553_v7  ;;  %3302 = vmatprep.mubr.f32.mxu1 %v12517_v51  ;;  %v10561_v51 = vpack.c.bf16 %v7993_v44, %v7992_v26  ;;  %v10563_v31 = vpack.c.bf16 %v8011_v17, %v8010_v25  ;;  %v8057_v26 = vld [vmem:[%s14657_s3 + $0x1828] sm:$0xff]  ;;  %v8074_v44 = vld [vmem:[%s14657_s3 + $0x18b0] sm:$0xff] }
 0x268   : > { %10556 = vmatprep.subr.bf16.mxu1 %v10555_v49  ;;  %v8058_v17 = vld [vmem:[%s14657_s3 + $0x1830] sm:$0xff] }
 0x26b   : > { %10558 = vmatpush3.bf16.msra.mxu1 %v10557_v39  ;;  %v10623_v39 = vpack.c.bf16 %v8073_v42, %v8072_v46 }
 0x26c   : > { %10560 = vmatprep.subr.bf16.mxu1 %v10559_v27  ;;  %v8056_v27 = vld [vmem:[%s14657_s3 + $0x1820] sm:$0xff] }
 0x26f   : > { %10562 = vmatpush3.bf16.msra.mxu1 %v10561_v51  ;;  %v8059_v51 = vld [vmem:[%s14657_s3 + $0x1838] sm:$0xff] }
 0x270   : > { %10564 = vmatprep.subr.bf16.mxu1 %v10563_v31  ;;  %v8076_v31 = vld [vmem:[%s14657_s3 + $0x18c0] sm:$0xff]  ;;  %v10629_v35 = vpack.c.bf16 %v8059_v51, %v8058_v17 }
 0x271   : > { %v10631_v29 = vpack.c.bf16 %v8077_v28, %v8076_v31 }
 0x273   : > { %10566 = vmatpush3.bf16.msra.mxu1 %v10565_v34  ;;  %v8061_v34 = vld [vmem:[%s14657_s3 + $0x1848] sm:$0xff] }
 0x274   : > { %10568 = vmatprep.subr.bf16.mxu1 %v10567_v1  ;;  %v8078_v1 = vld [vmem:[%s14657_s3 + $0x18d0] sm:$0xff]  ;;  %v10633_v50 = vpack.c.bf16 %v8061_v34, %v8060_v30 }
 0x275   : > { %v10635_v10 = vpack.c.bf16 %v8079_v24, %v8078_v1 }
 0x277   : > { %10570 = vmatpush3.bf16.msra.mxu1 %v10569_v54  ;;  %v8063_v54 = vld [vmem:[%s14657_s3 + $0x1858] sm:$0xff] }
 0x278   : > { %10572 = vmatprep.subr.bf16.mxu1 %v10571_v22  ;;  %v8080_v22 = vld [vmem:[%s14657_s3 + $0x18e0] sm:$0xff]  ;;  %v10637_v41 = vpack.c.bf16 %v8063_v54, %v8062_v37 }
 0x279   : > { %v8617_v15 = vpop.f32.mrb[10].mxu1  ;;  %v10639_v52 = vpack.c.bf16 %v8081_v40, %v8080_v22 }
 0x27a   : > { %v8618_v32 = vpop.f32.mrb[11].mxu1 }
 0x27b   : > { %v8619_v63 = vadd.f32 %v8618_v32, %v8617_v15  ;;  %10574 = vmatpush3.bf16.msra.mxu1 %v10573_v45  ;;  %v8065_v45 = vld [vmem:[%s14657_s3 + $0x1868] sm:$0xff]  ;;  %v10643_v32 = vpack.c.bf16 %v8083_v47, %v8082_v16  ;;  %v8102_v16 = vld [vmem:[%s14660_s6 + $0x40] sm:$0xff] }
 0x27c   : > { %10576 = vmatprep.subr.bf16.mxu1 %v10575_v62  ;;  %v10641_v59 = vpack.c.bf16 %v8065_v45, %v8064_v43  ;;  %v8103_v47 = vld [vmem:[%s14660_s6 + $0x48] sm:$0xff] }
 0x27d   : > { %v1852_v20 = vadd.f32 %v8619_v63, %v13695_v4  ;;  %v8052_v4 = vld [vmem:[%s14657_s3 + $0x1800] sm:$0xff]  ;;  %v8066_v63 = vld [vmem:[%s14657_s3 + $0x1870] sm:$0xff] }
 0x27e   : > { %v10617_v7 = vpack.c.bf16 %v8053_v55, %v8052_v4 }
 0x27f   : > { %v13808_v5 = vadd.f32 %v13598_v13, %v1852_v20  ;;  %10578 = vmatpush3.bf16.msra.mxu1 %v10577_v60  ;;  %v8071_v13 = vld [vmem:[%s14657_s3 + $0x1898] sm:$0xff] }
 0x280   : > { %10580 = vmatprep.subr.bf16.mxu1 %v10579_v3  ;;  %v10619_v49 = vpack.c.bf16 %v8071_v13, %v8070_v36  ;;  %v8067_v60 = vld [vmem:[%s14657_s3 + $0x1878] sm:$0xff] }
 0x281   : > { %v8792_v14 = vpop.f32.mrb[60].mxu0  ;;  %v10645_v8 = vpack.c.bf16 %v8067_v60, %v8066_v63  ;;  %v3528_v60 = vld [vmem:[%s14658_s4 + $0x8] sm:$0xff] }
 0x282   : > { %v8793_v48 = vpop.f32.mrb[61].mxu0 }
 0x283   : > { %10582 = vmatpush3.bf16.msra.mxu1 %v10581_v9  ;;  %v13822_v6 = vadd.f32 %v8793_v48, %v8792_v14 }
 0x284   : > { %10616 = vmatprep.subr.bf16.mxu1 %v10615_v58 }
 0x286   : > { %3303 = vmatmul.mubr.f32.vlgmr.msra.gmra.mrb[24].mxu1 %v12506_v56  ;;  %v8075_v56 = vld [vmem:[%s14657_s3 + $0x18b8] sm:$0xff] }
 0x287   : > { %10618 = vmatpush3.bf16.msra.mxu1 %v10617_v7  ;;  %3510 = vmatprep.mubr.f32.mxu1 %v12549_v12  ;;  %v10625_v12 = vpack.c.bf16 %v8057_v26, %v8056_v27  ;;  %v10627_v25 = vpack.c.bf16 %v8075_v56, %v8074_v44 }
 0x288   : > { %10620 = vmatprep.subr.bf16.mxu1 %v10619_v49 }
 0x28b   : > { %10622 = vmatpush3.bf16.msra.mxu1 %v10621_v21 }
 0x28c   : > { %10624 = vmatprep.subr.bf16.mxu1 %v10623_v39 }
 0x28f   : > { %10626 = vmatpush3.bf16.msra.mxu1 %v10625_v12 }
 0x290   : > { %10628 = vmatprep.subr.bf16.mxu1 %v10627_v25 }
 0x293   : > { %10630 = vmatpush3.bf16.msra.mxu1 %v10629_v35 }
 0x294   : > { %10632 = vmatprep.subr.bf16.mxu1 %v10631_v29 }
 0x297   : > { %10634 = vmatpush3.bf16.msra.mxu1 %v10633_v50 }
 0x298   : > { %10636 = vmatprep.subr.bf16.mxu1 %v10635_v10 }
 0x299   : > { %v8687_v62 = vpop.f32.mrb[12].mxu1 }
 0x29a   : > { %v8688_v15 = vpop.f32.mrb[13].mxu1 }
 0x29b   : > { %v8689_v23 = vadd.f32 %v8688_v15, %v8687_v62  ;;  %10638 = vmatpush3.bf16.msra.mxu1 %v10637_v41 }
 0x29c   : > { %10640 = vmatprep.subr.bf16.mxu1 %v10639_v52 }
 0x29d   : > { %v2060_v2 = vadd.f32 %v8689_v23, %v13808_v5  ;;  %v8104_v23 = vld [vmem:[%s14660_s6 + $0x50] sm:$0xff] }
 0x29f   : > { %v2164_v3 = vadd.f32 %v13709_v18, %v2060_v2  ;;  %10642 = vmatpush3.bf16.msra.mxu1 %v10641_v59  ;;  %v8105_v59 = vld [vmem:[%s14660_s6 + $0x58] sm:$0xff]  ;;  %v3529_v2 = vld [vmem:[%s14658_s4 + $0x10] sm:$0xff] }
 0x2a0   : > { %10644 = vmatprep.subr.bf16.mxu1 %v10643_v32  ;;  %v10647_v32 = vpack.c.bf16 %v8103_v47, %v8102_v16  ;;  %v8118_v16 = vld [vmem:[%s14660_s6 + $0xa0] sm:$0xff]  ;;  %v8119_v47 = vld [vmem:[%s14660_s6 + $0xa8] sm:$0xff] }
 0x2a1   : > { %v8862_v11 = vpop.f32.mrb[62].mxu0 }
 0x2a2   : > { %v8863_v20 = vpop.f32.mrb[63].mxu0 }
 0x2a3   : > { %10646 = vmatpush3.bf16.msra.mxu1 %v10645_v8  ;;  %v8864_v61 = vadd.f32 %v8863_v20, %v8862_v11  ;;  %v8106_v8 = vld [vmem:[%s14660_s6 + $0x60] sm:$0xff]  ;;  %v8107_v11 = vld [vmem:[%s14660_s6 + $0x68] sm:$0xff]  ;;  %v3530_v20 = vld [vmem:[%s14658_s4 + $0x18] sm:$0xff] }
 0x2a6   : > { %3511 = vmatmul.mubr.f32.vlgmr.msra.gmra.mrb[26].mxu1 %v12538_v38 }
 0x2b9   : > { %v8757_v57 = vpop.f32.mrb[14].mxu1 }
 0x2ba   : > { %v8758_v53 = vpop.f32.mrb[15].mxu1 }
 0x2bb   : > { %v8759_v9 = vadd.f32 %v8758_v53, %v8757_v57  ;;  %v10655_v57 = vpack.c.bf16 %v8107_v11, %v8106_v8  ;;  %v8108_v53 = vld [vmem:[%s14660_s6 + $0x70] sm:$0xff]  ;;  %v8124_v8 = vld [vmem:[%s14660_s6 + $0xc0] sm:$0xff]  ;;  %v8125_v11 = vld [vmem:[%s14660_s6 + $0xc8] sm:$0xff] }
 0x2bd   : > { %v2268_v58 = vadd.f32 %v8759_v9, %v2164_v3  ;;  %v3521_v45 = vpop.permute.xlu0 %3520  ;;  %v10651_v3 = vpack.c.bf16 %v8105_v59, %v8104_v23  ;;  %v8109_v9 = vld [vmem:[%s14660_s6 + $0x78] sm:$0xff]  ;;  %v10687_v23 = vpack.c.bf16 %v8119_v47, %v8118_v16  ;;  %v8166_v16 = vld [vmem:[%s14660_s6 + $0x1d0] sm:$0xff] }
 0x2be   : > { %v8167_v47 = vld [vmem:[%s14660_s6 + $0x1d8] sm:$0xff] }
 0x2bf   : > { %v2372_v4 = vadd.f32 %v13822_v6, %v2268_v58  ;;  %v3527_v6 = vld [vmem:[%s14658_s4] sm:$0xff]  ;;  %v3532_v58 = vld [vmem:[%s14658_s4 + $0x28] sm:$0xff] }
 0x2c0   : > { %9421 = vmatprep.mubr.msk.f32.mxu0 %vm3545_vm2, %v3527_v6 }
 0x2c1   : > { %v8932_v55 = vpop.f32.mrb[64].mxu0 }
 0x2c2   : > { %v8933_v36 = vpop.f32.mrb[65].mxu0 }
 0x2c3   : > { %v8934_v5 = vadd.f32 %v8933_v36, %v8932_v55  ;;  %v10659_v55 = vpack.c.bf16 %v8109_v9, %v8108_v53  ;;  %v3534_v36 = vld [vmem:[%s14658_s4 + $0x38] sm:$0xff]  ;;  %v8126_v53 = vld [vmem:[%s14660_s6 + $0xd0] sm:$0xff] }
 0x2c4   : > { %v8127_v9 = vld [vmem:[%s14660_s6 + $0xd8] sm:$0xff] }
 0x2d9   : > { %v8827_v13 = vpop.f32.mrb[16].mxu1 }
 0x2da   : > { %v8828_v18 = vpop.f32.mrb[17].mxu1 }
 0x2db   : > { %v8829_v14 = vadd.f32 %v8828_v18, %v8827_v13  ;;  %v3536_v13 = vld [vmem:[%s14658_s4 + $0x48] sm:$0xff]  ;;  %v3537_v18 = vld [vmem:[%s14658_s4 + $0x50] sm:$0xff] }
 0x2dd   : > { %v2476_v48 = vadd.f32 %v8829_v14, %v2372_v4  ;;  %v3533_v4 = vld [vmem:[%s14658_s4 + $0x30] sm:$0xff]  ;;  %v3538_v14 = vld [vmem:[%s14658_s4 + $0x58] sm:$0xff] }
 0x2df   : > { %v2580_v7 = vadd.f32 %v8864_v61, %v2476_v48  ;;  %v3531_v61 = vld [vmem:[%s14658_s4 + $0x20] sm:$0xff] }
 0x2e0   : > { %v3539_v48 = vld [vmem:[%s14658_s4 + $0x60] sm:$0xff] }
 0x2e1   : > { %v9002_v49 = vpop.f32.mrb[66].mxu0 }
 0x2e2   : > { %v9003_v33 = vpop.f32.mrb[67].mxu0 }
 0x2e3   : > { %v9004_v19 = vadd.f32 %v9003_v33, %v9002_v49  ;;  %v3541_v49 = vld [vmem:[%s14658_s4 + $0x70] sm:$0xff]  ;;  %v3542_v33 = vld [vmem:[%s14658_s4 + $0x78] sm:$0xff] }
 0x2f9   : > { %v8897_v46 = vpop.f32.mrb[18].mxu1 }
 0x2fa   : > { %v8898_v42 = vpop.f32.mrb[19].mxu1 }
 0x2fb   : > { %v8899_v38 = vadd.f32 %v8898_v42, %v8897_v46  ;;  %v3544_v46 = vld [vmem:[%s14658_s4 + $0x88] sm:$0xff]  ;;  %v3755_v42 = vld [vmem:[%s14660_s6] sm:$0xff] }
 0x2fd   : > { %v2684_v21 = vadd.f32 %v8899_v38, %v2580_v7  ;;  %v3540_v7 = vld [vmem:[%s14658_s4 + $0x68] sm:$0xff] }
 0x2fe   : > { %v3756_v38 = vld [vmem:[%s14660_s6 + $0x8] sm:$0xff] }
 0x2ff   : > { %v2788_v39 = vadd.f32 %v8934_v5, %v2684_v21  ;;  %v3535_v5 = vld [vmem:[%s14658_s4 + $0x40] sm:$0xff]  ;;  %v10663_v21 = vpack.c.bf16 %v3756_v38, %v3755_v42  ;;  %v8139_v42 = vld [vmem:[%s14660_s6 + $0x128] sm:$0xff] }
 0x302   : > { %v9072_v27 = vpop.f32.mrb[68].mxu0 }
 0x303   : > { %v9073_v26 = vpop.f32.mrb[69].mxu0 }
 0x304   : > { %v9074_v44 = vadd.f32 %v9073_v26, %v9072_v27  ;;  %v3757_v26 = vld [vmem:[%s14660_s6 + $0x10] sm:$0xff] }
 0x319   : > { %v8967_v56 = vpop.f32.mrb[20].mxu1 }
 0x31a   : > { %v8968_v12 = vpop.f32.mrb[21].mxu1 }
 0x31b   : > { %v8969_v25 = vadd.f32 %v8968_v12, %v8967_v56 }
 0x31d   : > { %v2892_v17 = vadd.f32 %v8969_v25, %v2788_v39  ;;  %v3759_v25 = vld [vmem:[%s14660_s6 + $0x20] sm:$0xff] }
 0x31f   : > { %v2996_v51 = vadd.f32 %v9004_v19, %v2892_v17  ;;  %v3543_v19 = vld [vmem:[%s14658_s4 + $0x80] sm:$0xff]  ;;  %v3760_v17 = vld [vmem:[%s14660_s6 + $0x28] sm:$0xff] }
 0x322   : > { %v9142_v31 = vpop.f32.mrb[70].mxu0 }
 0x323   : > { %v9143_v28 = vpop.f32.mrb[71].mxu0 }
 0x324   : > { %v9144_v35 = vadd.f32 %v9143_v28, %v9142_v31  ;;  %v10671_v28 = vpack.c.bf16 %v3760_v17, %v3759_v25  ;;  %v8148_v17 = vld [vmem:[%s14660_s6 + $0x160] sm:$0xff] }
 0x339   : > { %v9037_v29 = vpop.f32.mrb[22].mxu1 }
 0x33a   : > { %v9038_v30 = vpop.f32.mrb[23].mxu1 }
 0x33b   : > { %v9039_v34 = vadd.f32 %v9038_v30, %v9037_v29  ;;  %v3761_v29 = vld [vmem:[%s14660_s6 + $0x30] sm:$0xff]  ;;  %v3762_v30 = vld [vmem:[%s14660_s6 + $0x38] sm:$0xff] }
 0x33d   : > { %v3100_v1 = vadd.f32 %v9039_v34, %v2996_v51  ;;  %v4580_v51 = vld [vmem:[%s14659_s5 + $0x8] sm:$0xff]  ;;  %v5596_v34 = vld [vmem:[%s14662_s8] sm:$0xff] }
 0x33e   : > { %4588 = vperm.xlu1 %10983, %v4580_v51   ;;  %v8149_v51 = vld [vmem:[%s14660_s6 + $0x168] sm:$0xff] }
 0x33f   : > { %v3204_v24 = vadd.f32 %v9074_v44, %v3100_v1  ;;  %v3758_v44 = vld [vmem:[%s14660_s6 + $0x18] sm:$0xff] }
 0x340   : > { %v10667_v12 = vpack.c.bf16 %v3758_v44, %v3757_v26  ;;  %v8144_v26 = vld [vmem:[%s14660_s6 + $0x140] sm:$0xff]  ;;  %v8145_v44 = vld [vmem:[%s14660_s6 + $0x148] sm:$0xff] }
 0x342   : > { %5600 = vperm.xlu1 %10983, %v5596_v34   ;;  %v8155_v34 = vld [vmem:[%s14660_s6 + $0x188] sm:$0xff] }
 0x359   : > { %v9107_v50 = vpop.f32.mrb[24].mxu1 }
 0x35a   : > { %v9108_v10 = vpop.f32.mrb[25].mxu1 }
 0x35b   : > { %v9109_v37 = vadd.f32 %v9108_v10, %v9107_v50  ;;  %v8114_v10 = vld [vmem:[%s14660_s6 + $0x80] sm:$0xff] }
 0x35d   : > { %v3308_v54 = vadd.f32 %v9109_v37, %v3204_v24  ;;  %v10675_v24 = vpack.c.bf16 %v3762_v30, %v3761_v29  ;;  %v8115_v37 = vld [vmem:[%s14660_s6 + $0x88] sm:$0xff]  ;;  %v8154_v30 = vld [vmem:[%s14660_s6 + $0x180] sm:$0xff] }
 0x35f   : > { %v3412_v22 = vadd.f32 %v9144_v35, %v3308_v54 }
 0x379   : > { %v9177_v40 = vpop.f32.mrb[26].mxu1 }
 0x37a   : > { %v9178_v41 = vpop.f32.mrb[27].mxu1 }
 0x37b   : > { %v9179_v52 = vadd.f32 %v9178_v41, %v9177_v40  ;;  %v8116_v41 = vld [vmem:[%s14660_s6 + $0x90] sm:$0xff] }
 0x37d   : > { %v3516_v43 = vadd.f32 %v9179_v52, %v3412_v22  ;;  %v10679_v22 = vpack.c.bf16 %v8115_v37, %v8114_v10  ;;  %v8117_v52 = vld [vmem:[%s14660_s6 + $0x98] sm:$0xff]  ;;  %v8158_v37 = vld [vmem:[%s14660_s6 + $0x1a0] sm:$0xff] }
 0x37f   : > { %v3523_v62 = vadd.f32 %v3521_v45, %v3516_v43  ;;  %v10683_v45 = vpack.c.bf16 %v8117_v52, %v8116_v41  ;;  %v8161_v41 = vld [vmem:[%s14660_s6 + $0x1b8] sm:$0xff] }
 0x381   : > { %vm3524_vm3 = vcmp.ge.f32.partialorder %v3523_v62, 0.0  ;;  %v3525_v15 = vmul.f32 0.01, %v3523_v62 }
 0x383   : > { %v3526_v63 = vsel %vm3524_vm3, %v3523_v62, %v3525_v15 }
 0x384   : > { %9419 = vmatprep.subr.mxu0 %v3526_v63 }
 0x385   : > { %9420 = vmatpush3.msra.mxu0 %v3526_v63  ;;  %v8121_v63 = vld [vmem:[%s14660_s6 + $0xb8] sm:$0xff] }
 0x386   : > { %9422 = vmatmul.mubr.msk.f32.vlgmr.msra.gmra.mrb[72].mxu0 %vm3545_vm2, %v3528_v60  ;;  %10648 = vmatprep.subr.bf16.mxu0 %v10647_v32 }
 0x387   : > { %9424 = vmatprep.mubr.msk.f32.mxu0 %vm3545_vm2, %v3529_v2  ;;  %10650 = vmatpush3.bf16.msra.mxu0 %v10647_v32  ;;  %v8120_v32 = vld [vmem:[%s14660_s6 + $0xb0] sm:$0xff] }
 0x388   : > { %10652 = vmatprep.subr.bf16.mxu0 %v10651_v3  ;;  %v10691_v2 = vpack.c.bf16 %v8121_v63, %v8120_v32  ;;  %v8169_v32 = vld [vmem:[%s14660_s6 + $0x1e8] sm:$0xff] }
 0x38a   : > { %9425 = vmatmul.mubr.msk.f32.gmra.mrb[74].mxu0 %vm3545_vm2, %v3530_v20 }
 0x38b   : > { %9427 = vmatprep.mubr.msk.f32.mxu0 %vm3545_vm2, %v3531_v61  ;;  %10654 = vmatpush3.bf16.msra.mxu0 %v10651_v3  ;;  %v10695_v61 = vpack.c.bf16 %v8125_v11, %v8124_v8  ;;  %v8171_v8 = vld [vmem:[%s14660_s6 + $0x1f8] sm:$0xff] }
 0x38c   : > { %10656 = vmatprep.subr.bf16.mxu0 %v10655_v57 }
 0x38e   : > { %9428 = vmatmul.mubr.msk.f32.gmra.mrb[76].mxu0 %vm3545_vm2, %v3532_v58  ;;  %v10699_v58 = vpack.c.bf16 %v8127_v9, %v8126_v53  ;;  %v8176_v53 = vld [vmem:[%s14660_s6 + $0x210] sm:$0xff]  ;;  %v8177_v9 = vld [vmem:[%s14660_s6 + $0x218] sm:$0xff] }
 0x38f   : > { %9430 = vmatprep.mubr.msk.f32.mxu0 %vm3545_vm2, %v3533_v4  ;;  %10658 = vmatpush3.bf16.msra.mxu0 %v10655_v57  ;;  %v8128_v4 = vld [vmem:[%s14660_s6 + $0xe0] sm:$0xff] }
 0x390   : > { %10660 = vmatprep.subr.bf16.mxu0 %v10659_v55 }
 0x392   : > { %9431 = vmatmul.mubr.msk.f32.gmra.mrb[78].mxu0 %vm3545_vm2, %v3534_v36 }
 0x393   : > { %9433 = vmatprep.mubr.msk.f32.mxu0 %vm3545_vm2, %v3535_v5  ;;  %10662 = vmatpush3.bf16.msra.mxu0 %v10659_v55  ;;  %v8129_v55 = vld [vmem:[%s14660_s6 + $0xe8] sm:$0xff]  ;;  %v8130_v5 = vld [vmem:[%s14660_s6 + $0xf0] sm:$0xff] }
 0x394   : > { %10664 = vmatprep.subr.bf16.mxu0 %v10663_v21  ;;  %v10703_v36 = vpack.c.bf16 %v8129_v55, %v8128_v4  ;;  %v8178_v4 = vld [vmem:[%s14660_s6 + $0x220] sm:$0xff]  ;;  %v8179_v55 = vld [vmem:[%s14660_s6 + $0x228] sm:$0xff] }
 0x396   : > { %9434 = vmatmul.mubr.msk.f32.gmra.mrb[80].mxu0 %vm3545_vm2, %v3536_v13  ;;  %v8131_v13 = vld [vmem:[%s14660_s6 + $0xf8] sm:$0xff] }
 0x397   : > { %9436 = vmatprep.mubr.msk.f32.mxu0 %vm3545_vm2, %v3537_v18  ;;  %v10707_v18 = vpack.c.bf16 %v8131_v13, %v8130_v5  ;;  %v8180_v5 = vld [vmem:[%s14660_s6 + $0x230] sm:$0xff]  ;;  %v8181_v13 = vld [vmem:[%s14660_s6 + $0x238] sm:$0xff] }
 0x39a   : > { %9437 = vmatmul.mubr.msk.f32.gmra.mrb[82].mxu0 %vm3545_vm2, %v3538_v14  ;;  %v8134_v14 = vld [vmem:[%s14660_s6 + $0x100] sm:$0xff] }
 0x39b   : > { %9439 = vmatprep.mubr.msk.f32.mxu0 %vm3545_vm2, %v3539_v48  ;;  %v8135_v48 = vld [vmem:[%s14660_s6 + $0x108] sm:$0xff] }
 0x39e   : > { %9440 = vmatmul.mubr.msk.f32.gmra.mrb[84].mxu0 %vm3545_vm2, %v3540_v7  ;;  %v10711_v7 = vpack.c.bf16 %v8135_v48, %v8134_v14  ;;  %v4584_v48 = vpop.permute.xlu0 %4583 }
 0x39f   : > { %9442 = vmatprep.mubr.msk.f32.mxu0 %vm3545_vm2, %v3541_v49  ;;  %v8136_v49 = vld [vmem:[%s14660_s6 + $0x110] sm:$0xff] }
 0x3a2   : > { %9443 = vmatmul.mubr.msk.f32.gmra.mrb[86].mxu0 %vm3545_vm2, %v3542_v33  ;;  %v8137_v33 = vld [vmem:[%s14660_s6 + $0x118] sm:$0xff] }
 0x3a3   : > { %9445 = vmatprep.mubr.msk.f32.mxu0 %vm3545_vm2, %v3543_v19  ;;  %v10715_v19 = vpack.c.bf16 %v8137_v33, %v8136_v49 }
 0x3a6   : > { %9446 = vmatmul.mubr.msk.f32.gmra.mrb[88].mxu0 %vm3545_vm2, %v3544_v46  ;;  %v8138_v46 = vld [vmem:[%s14660_s6 + $0x120] sm:$0xff] }
 0x3a7   : > { %v10719_v38 = vpack.c.bf16 %v8139_v42, %v8138_v46  ;;  %v8203_v42 = vld [vmem:[%s14663_s9 + $0x18] sm:$0xff] }
 0x459   : > { %v9423_v39 = vpop.f32.mrb[72].mxu0 }
 0x45a   : > { %v3666_v27 = vpop.f32.mrb[73].mxu0 }
 0x45d   : > { %v9426_v6 = vpop.f32.mrb[74].mxu0 }
 0x45e   : > { %v3676_v56 = vpop.f32.mrb[75].mxu0 }
 0x45f   : > { %9464 = vmatprep.mubr.msk.f32.mxu0 %vm3772_vm4, %v3676_v56  ;;  %v8146_v56 = vld [vmem:[%s14660_s6 + $0x150] sm:$0xff] }
 0x460   : > { %9465 = vmatmul.mubr.msk.f32.vlgmr.msra.gmra.mrb[90].mxu0 %vm3772_vm4, %v9426_v6  ;;  %v10727_v6 = vpack.c.bf16 %v8145_v44, %v8144_v26  ;;  %v4600_v26 = vld [vmem:[%s14661_s7 + $0x8] sm:$0xff]  ;;  %v4601_v44 = vld [vmem:[%s14661_s7 + $0x10] sm:$0xff] }
 0x461   : > { %10666 = vmatpush3.bf16.msra.mxu0 %v10663_v21  ;;  %9483 = vmatprep.mubr.msk.f32.mxu0 %vm3772_vm4, %v3666_v27  ;;  %v9429_v31 = vpop.f32.mrb[76].mxu0  ;;  %v8140_v21 = vld [vmem:[%s14660_s6 + $0x130] sm:$0xff] }
 0x462   : > { %10668 = vmatprep.subr.bf16.mxu0 %v10667_v12  ;;  %v3686_v35 = vpop.f32.mrb[77].mxu0 }
 0x465   : > { %10670 = vmatpush3.bf16.msra.mxu0 %v10667_v12  ;;  %v14037_v1 = vpop.f32.mrb[78].mxu0  ;;  %v8147_v12 = vld [vmem:[%s14660_s6 + $0x158] sm:$0xff] }
 0x466   : > { %10672 = vmatprep.subr.bf16.mxu0 %v10671_v28  ;;  %v3696_v50 = vpop.f32.mrb[79].mxu0  ;;  %v10731_v25 = vpack.c.bf16 %v8147_v12, %v8146_v56  ;;  %v4603_v56 = vld [vmem:[%s14661_s7 + $0x20] sm:$0xff]  ;;  %v4604_v12 = vld [vmem:[%s14661_s7 + $0x28] sm:$0xff] }
 0x469   : > { %10674 = vmatpush3.bf16.msra.mxu0 %v10671_v28  ;;  %v14045_v54 = vpop.f32.mrb[80].mxu0  ;;  %v8150_v28 = vld [vmem:[%s14660_s6 + $0x170] sm:$0xff] }
 0x46a   : > { %10676 = vmatprep.subr.bf16.mxu0 %v10675_v24  ;;  %v3706_v40 = vpop.f32.mrb[81].mxu0 }
 0x46d   : > { %10678 = vmatpush3.bf16.msra.mxu0 %v10675_v24  ;;  %v14053_v43 = vpop.f32.mrb[82].mxu0  ;;  %v8156_v24 = vld [vmem:[%s14660_s6 + $0x190] sm:$0xff] }
 0x46e   : > { %10680 = vmatprep.subr.bf16.mxu0 %v10679_v22  ;;  %v14055_v62 = vpop.f32.mrb[83].mxu0 }
 0x470   : > { %9484 = vmatmul.mubr.msk.f32.vlgmr.msra.gmra.mrb[90].mxu0 %vm3772_vm4, %v9423_v39  ;;  %v8141_v39 = vld [vmem:[%s14660_s6 + $0x138] sm:$0xff] }
 0x471   : > { %10682 = vmatpush3.bf16.msra.mxu0 %v10679_v22  ;;  %9502 = vmatprep.mubr.msk.f32.mxu0 %vm3772_vm4, %v3686_v35  ;;  %v14065_v15 = vpop.f32.mrb[84].mxu0  ;;  %v10723_v27 = vpack.c.bf16 %v8141_v39, %v8140_v21  ;;  %v8151_v35 = vld [vmem:[%s14660_s6 + $0x178] sm:$0xff] }
 0x472   : > { %10684 = vmatprep.subr.bf16.mxu0 %v10683_v45  ;;  %v14067_v59 = vpop.f32.mrb[85].mxu0  ;;  %v10739_v29 = vpack.c.bf16 %v8151_v35, %v8150_v28  ;;  %v4609_v28 = vld [vmem:[%s14661_s7 + $0x50] sm:$0xff]  ;;  %v4610_v35 = vld [vmem:[%s14661_s7 + $0x58] sm:$0xff] }
 0x475   : > { %10686 = vmatpush3.bf16.msra.mxu0 %v10683_v45  ;;  %v14075_v60 = vpop.f32.mrb[86].mxu0  ;;  %v8165_v45 = vld [vmem:[%s14660_s6 + $0x1c8] sm:$0xff] }
 0x476   : > { %10688 = vmatprep.subr.bf16.mxu0 %v10687_v23  ;;  %v14077_v3 = vpop.f32.mrb[87].mxu0 }
 0x479   : > { %10690 = vmatpush3.bf16.msra.mxu0 %v10687_v23  ;;  %v14085_v20 = vpop.f32.mrb[88].mxu0  ;;  %v10763_v23 = vpack.c.bf16 %v8167_v47, %v8166_v16 }
 0x47a   : > { %10692 = vmatprep.subr.bf16.mxu0 %v10691_v2  ;;  %v14087_v57 = vpop.f32.mrb[89].mxu0 }
 0x47d   : > { %10694 = vmatpush3.bf16.msra.mxu0 %v10691_v2  ;;  %v8170_v2 = vld [vmem:[%s14660_s6 + $0x1f0] sm:$0xff] }
 0x47e   : > { %10696 = vmatprep.subr.bf16.mxu0 %v10695_v61  ;;  %v10771_v11 = vpack.c.bf16 %v8171_v8, %v8170_v2 }
 0x480   : > { %9503 = vmatmul.mubr.msk.f32.vlgmr.msra.gmra.mrb[90].mxu0 %vm3772_vm4, %v9429_v31  ;;  %v10735_v31 = vpack.c.bf16 %v8149_v51, %v8148_v17  ;;  %v4606_v17 = vld [vmem:[%s14661_s7 + $0x38] sm:$0xff]  ;;  %v4607_v51 = vld [vmem:[%s14661_s7 + $0x40] sm:$0xff] }
 0x481   : > { %10698 = vmatpush3.bf16.msra.mxu0 %v10695_v61  ;;  %9521 = vmatprep.mubr.msk.f32.mxu0 %vm3772_vm4, %v3696_v50  ;;  %v8157_v50 = vld [vmem:[%s14660_s6 + $0x198] sm:$0xff] }
 0x482   : > { %10700 = vmatprep.subr.bf16.mxu0 %v10699_v58  ;;  %v10747_v10 = vpack.c.bf16 %v8157_v50, %v8156_v24  ;;  %v4615_v24 = vld [vmem:[%s14661_s7 + $0x80] sm:$0xff]  ;;  %v4616_v50 = vld [vmem:[%s14661_s7 + $0x88] sm:$0xff] }
 0x485   : > { %10702 = vmatpush3.bf16.msra.mxu0 %v10699_v58  ;;  %v10779_v58 = vpack.c.bf16 %v8177_v9, %v8176_v53 }
 0x486   : > { %10704 = vmatprep.subr.bf16.mxu0 %v10703_v36 }
 0x489   : > { %10706 = vmatpush3.bf16.msra.mxu0 %v10703_v36  ;;  %v10783_v36 = vpack.c.bf16 %v8179_v55, %v8178_v4  ;;  %v8220_v55 = vld [vmem:[%s14663_s9 + $0x50] sm:$0xff] }
 0x48a   : > { %10708 = vmatprep.subr.bf16.mxu0 %v10707_v18 }
 0x48d   : > { %10710 = vmatpush3.bf16.msra.mxu0 %v10707_v18  ;;  %v10787_v18 = vpack.c.bf16 %v8181_v13, %v8180_v5 }
 0x48e   : > { %10712 = vmatprep.subr.bf16.mxu0 %v10711_v7 }
 0x490   : > { %9522 = vmatmul.mubr.msk.f32.vlgmr.msra.gmra.mrb[90].mxu0 %vm3772_vm4, %v14037_v1  ;;  %v10743_v1 = vpack.c.bf16 %v8155_v34, %v8154_v30  ;;  %v4612_v30 = vld [vmem:[%s14661_s7 + $0x68] sm:$0xff]  ;;  %v4613_v34 = vld [vmem:[%s14661_s7 + $0x70] sm:$0xff] }
 0x491   : > { %10714 = vmatpush3.bf16.msra.mxu0 %v10711_v7  ;;  %9540 = vmatprep.mubr.msk.f32.mxu0 %vm3772_vm4, %v3706_v40  ;;  %v8160_v40 = vld [vmem:[%s14660_s6 + $0x1b0] sm:$0xff] }
 0x492   : > { %10716 = vmatprep.subr.bf16.mxu0 %v10715_v19  ;;  %v10755_v52 = vpack.c.bf16 %v8161_v41, %v8160_v40  ;;  %v8208_v41 = vld [vmem:[%s14663_s9 + $0x20] sm:$0xff] }
 0x495   : > { %10718 = vmatpush3.bf16.msra.mxu0 %v10715_v19 }
 0x496   : > { %10720 = vmatprep.subr.bf16.mxu0 %v10719_v38 }
 0x499   : > { %10722 = vmatpush3.bf16.msra.mxu0 %v10719_v38 }
 0x49a   : > { %10724 = vmatprep.subr.bf16.mxu0 %v10723_v27 }
 0x49d   : > { %10726 = vmatpush3.bf16.msra.mxu0 %v10723_v27 }
 0x49e   : > { %10728 = vmatprep.subr.bf16.mxu0 %v10727_v6 }
 0x4a0   : > { %9541 = vmatmul.mubr.msk.f32.vlgmr.msra.gmra.mrb[90].mxu0 %vm3772_vm4, %v14045_v54  ;;  %v8159_v54 = vld [vmem:[%s14660_s6 + $0x1a8] sm:$0xff] }
 0x4a1   : > { %10730 = vmatpush3.bf16.msra.mxu0 %v10727_v6  ;;  %9559 = vmatprep.mubr.msk.f32.mxu0 %vm3772_vm4, %v14055_v62  ;;  %v10751_v22 = vpack.c.bf16 %v8159_v54, %v8158_v37  ;;  %v4602_v6 = vld [vmem:[%s14661_s7 + $0x18] sm:$0xff]  ;;  %v4828_v37 = vld [vmem:[%s14663_s9 + $0x8] sm:$0xff] }
 0x4a2   : > { %10732 = vmatprep.subr.bf16.mxu0 %v10731_v25 }
 0x4a5   : > { %10734 = vmatpush3.bf16.msra.mxu0 %v10731_v25  ;;  %v4605_v25 = vld [vmem:[%s14661_s7 + $0x30] sm:$0xff] }
 0x4a6   : > { %10736 = vmatprep.subr.bf16.mxu0 %v10735_v31 }
 0x4a9   : > { %10738 = vmatpush3.bf16.msra.mxu0 %v10735_v31  ;;  %v4608_v31 = vld [vmem:[%s14661_s7 + $0x48] sm:$0xff] }
 0x4aa   : > { %10740 = vmatprep.subr.bf16.mxu0 %v10739_v29 }
 0x4ad   : > { %10742 = vmatpush3.bf16.msra.mxu0 %v10739_v29  ;;  %v4611_v29 = vld [vmem:[%s14661_s7 + $0x60] sm:$0xff] }
 0x4ae   : > { %10744 = vmatprep.subr.bf16.mxu0 %v10743_v1 }
 0x4b0   : > { %9560 = vmatmul.mubr.msk.f32.vlgmr.msra.gmra.mrb[90].mxu0 %vm3772_vm4, %v14053_v43  ;;  %v8164_v43 = vld [vmem:[%s14660_s6 + $0x1c0] sm:$0xff] }
 0x4b1   : > { %10746 = vmatpush3.bf16.msra.mxu0 %v10743_v1  ;;  %9578 = vmatprep.mubr.msk.f32.mxu0 %vm3772_vm4, %v14067_v59  ;;  %v10759_v62 = vpack.c.bf16 %v8165_v45, %v8164_v43  ;;  %v8168_v59 = vld [vmem:[%s14660_s6 + $0x1e0] sm:$0xff]  ;;  %v4614_v1 = vld [vmem:[%s14661_s7 + $0x78] sm:$0xff] }
 0x4b2   : > { %10748 = vmatprep.subr.bf16.mxu0 %v10747_v10  ;;  %v10767_v63 = vpack.c.bf16 %v8169_v32, %v8168_v59  ;;  %v8213_v59 = vld [vmem:[%s14663_s9 + $0x38] sm:$0xff] }
 0x4b5   : > { %10750 = vmatpush3.bf16.msra.mxu0 %v10747_v10  ;;  %v4827_v10 = vld [vmem:[%s14663_s9] sm:$0xff] }
 0x4b6   : > { %10752 = vmatprep.subr.bf16.mxu0 %v10751_v22  ;;  %v10799_v54 = vpack.c.bf16 %v4828_v37, %v4827_v10  ;;  %v8250_v37 = vld [vmem:[%s14664_s10 + $0x40] sm:$0xff] }
 0x4b9   : > { %10754 = vmatpush3.bf16.msra.mxu0 %v10751_v22 }
 0x4ba   : > { %10756 = vmatprep.subr.bf16.mxu0 %v10755_v52 }
 0x4bd   : > { %10758 = vmatpush3.bf16.msra.mxu0 %v10755_v52  ;;  %v8209_v52 = vld [vmem:[%s14663_s9 + $0x28] sm:$0xff] }
 0x4be   : > { %10760 = vmatprep.subr.bf16.mxu0 %v10759_v62 }
 0x4c0   : > { %9579 = vmatmul.mubr.msk.f32.vlgmr.msra.gmra.mrb[90].mxu0 %vm3772_vm4, %v14065_v15  ;;  %v8174_v15 = vld [vmem:[%s14660_s6 + $0x200] sm:$0xff] }
 0x4c1   : > { %10762 = vmatpush3.bf16.msra.mxu0 %v10759_v62  ;;  %9597 = vmatprep.mubr.msk.f32.mxu0 %vm3772_vm4, %v14077_v3  ;;  %v8175_v3 = vld [vmem:[%s14660_s6 + $0x208] sm:$0xff]  ;;  %v10803_v62 = vpack.c.bf16 %v8209_v52, %v8208_v41  ;;  %v8255_v41 = vld [vmem:[%s14664_s10 + $0x58] sm:$0xff] }
 0x4c2   : > { %10764 = vmatprep.subr.bf16.mxu0 %v10763_v23  ;;  %v10775_v61 = vpack.c.bf16 %v8175_v3, %v8174_v15  ;;  %v8216_v15 = vld [vmem:[%s14663_s9 + $0x40] sm:$0xff]  ;;  %v8217_v3 = vld [vmem:[%s14663_s9 + $0x48] sm:$0xff] }
 0x4c3   : > { %v10811_v53 = vpack.c.bf16 %v8217_v3, %v8216_v15  ;;  %v8274_v15 = vld [vmem:[%s14664_s10 + $0xa0] sm:$0xff]  ;;  %v8275_v3 = vld [vmem:[%s14664_s10 + $0xa8] sm:$0xff] }
 0x4c5   : > { %10766 = vmatpush3.bf16.msra.mxu0 %v10763_v23  ;;  %v8212_v23 = vld [vmem:[%s14663_s9 + $0x30] sm:$0xff] }
 0x4c6   : > { %10768 = vmatprep.subr.bf16.mxu0 %v10767_v63 }
 0x4c9   : > { %10770 = vmatpush3.bf16.msra.mxu0 %v10767_v63  ;;  %v10807_v63 = vpack.c.bf16 %v8213_v59, %v8212_v23  ;;  %v8266_v59 = vld [vmem:[%s14664_s10 + $0x80] sm:$0xff] }
 0x4ca   : > { %10772 = vmatprep.subr.bf16.mxu0 %v10771_v11 }
 0x4cd   : > { %10774 = vmatpush3.bf16.msra.mxu0 %v10771_v11 }
 0x4ce   : > { %10776 = vmatprep.subr.bf16.mxu0 %v10775_v61 }
 0x4d0   : > { %9598 = vmatmul.mubr.msk.f32.vlgmr.msra.gmra.mrb[90].mxu0 %vm3772_vm4, %v14075_v60  ;;  %v4599_v60 = vld [vmem:[%s14661_s7] sm:$0xff] }
 0x4d1   : > { %10778 = vmatpush3.bf16.msra.mxu0 %v10775_v61  ;;  %9616 = vmatprep.mubr.msk.f32.mxu0 %vm3772_vm4, %v14087_v57  ;;  %v4589_v57 = vpop.permute.xlu1 %4588 }
 0x4d2   : > { %10780 = vmatprep.subr.bf16.mxu0 %v10779_v58  ;;  %9623 = vmatprep.mubr.msk.f32.mxu1 %vm4617_vm5, %v4599_v60 }
 0x4d5   : > { %10782 = vmatpush3.bf16.msra.mxu0 %v10779_v58 }
 0x4d6   : > { %10784 = vmatprep.subr.bf16.mxu0 %v10783_v36 }
 0x4d9   : > { %10786 = vmatpush3.bf16.msra.mxu0 %v10783_v36  ;;  %v8221_v36 = vld [vmem:[%s14663_s9 + $0x58] sm:$0xff] }
 0x4da   : > { %10788 = vmatprep.subr.bf16.mxu0 %v10787_v18  ;;  %v10815_v13 = vpack.c.bf16 %v8221_v36, %v8220_v55  ;;  %v8283_v55 = vld [vmem:[%s14664_s10 + $0xc8] sm:$0xff] }
 0x4dd   : > { %10790 = vmatpush3.bf16.msra.mxu0 %v10787_v18 }
 0x4e0   : > { %9617 = vmatmul.mubr.msk.f32.vlgmr.msra.gmra.mrb[90].mxu0 %vm3772_vm4, %v14085_v20  ;;  %v8202_v20 = vld [vmem:[%s14663_s9 + $0x10] sm:$0xff] }
 0x4e1   : > { %v10795_v27 = vpack.c.bf16 %v8203_v42, %v8202_v20  ;;  %v8233_v20 = vld [vmem:[%s14663_s9 + $0x88] sm:$0xff]  ;;  %9844 = vmatprep.mubr.msk.f32.mxu0 %vm11051_vm10, %v11048_v0 }
 0x5b3   : > { %v9618_v14 = vpop.f32.mrb[90].mxu0 }
 0x5b4   : > { %v4592_v7 = vadd.f32 %v9618_v14, %v4589_v57  ;;  %v4568_v49 = vpop.f32.mrb[91].mxu0  ;;  %v8224_v14 = vld [vmem:[%s14663_s9 + $0x60] sm:$0xff] }
 0x5b5   : > { %v4591_v33 = vadd.f32 %v4584_v48, %v4568_v49  ;;  %v8225_v48 = vld [vmem:[%s14663_s9 + $0x68] sm:$0xff]  ;;  %v8228_v49 = vld [vmem:[%s14663_s9 + $0x70] sm:$0xff] }
 0x5b6   : > { %vm4594_vm6 = vcmp.ge.f32.partialorder %v4592_v7, 0.0  ;;  %v4596_v19 = vmul.f32 0.01, %v4592_v7 }
 0x5b7   : > { %vm4593_vm7 = vcmp.ge.f32.partialorder %v4591_v33, 0.0  ;;  %v4595_v46 = vmul.f32 0.01, %v4591_v33 }
 0x5b8   : > { %v4598_v38 = vsel %vm4594_vm6, %v4592_v7, %v4596_v19  ;;  %v10819_v7 = vpack.c.bf16 %v8225_v48, %v8224_v14  ;;  %v8294_v48 = vld [vmem:[%s14664_s10 + $0xf0] sm:$0xff] }
 0x5b9   : > { %v4597_v21 = vsel %vm4593_vm7, %v4591_v33, %v4595_v46  ;;  %v8229_v33 = vld [vmem:[%s14663_s9 + $0x78] sm:$0xff]  ;;  %v8232_v46 = vld [vmem:[%s14663_s9 + $0x80] sm:$0xff] }
 0x5ba   : > { %v10791_v39 = vpack.c.bf16 %v4598_v38, %v4597_v21  ;;  %v10823_v19 = vpack.c.bf16 %v8229_v33, %v8228_v49  ;;  %v10827_v42 = vpack.c.bf16 %v8233_v20, %v8232_v46  ;;  %v5621_v38 = vld [vmem:[%s14664_s10] sm:$0xff]  ;;  %v5622_v21 = vld [vmem:[%s14664_s10 + $0x8] sm:$0xff]  ;;  %v11050_v20 = vmov 0.0|0.0  }
 0x5bb   : > { %v6987_v33 = vld [vmem:[%s14666_s12] sm:$0xff]  ;;  %10901 = vmatprep.subr.bf16.mxu0 %v11050_v20 }
 0x5bc   : > { %10792 = vmatprep.subr.bf16.mxu1 %v10791_v39 }
 0x5bd   : > { %10794 = vmatpush3.bf16.msra.mxu1 %v10791_v39  ;;  %v10831_v39 = vpack.c.bf16 %v5622_v21, %v5621_v38  ;;  %v6990_v38 = vld [vmem:[%s14666_s12 + $0x18] sm:$0xff] }
 0x5be   : > { %10796 = vmatprep.subr.bf16.mxu1 %v10795_v27 }
 0x5c0   : > { %9624 = vmatmul.mubr.msk.f32.vlgmr.msra.gmra.mrb[28].mxu1 %vm4617_vm5, %v4600_v26  ;;  %v8239_v26 = vld [vmem:[%s14664_s10 + $0x18] sm:$0xff] }
 0x5c1   : > { %9626 = vmatprep.mubr.msk.f32.mxu1 %vm4617_vm5, %v4601_v44  ;;  %10798 = vmatpush3.bf16.msra.mxu1 %v10795_v27  ;;  %v8238_v27 = vld [vmem:[%s14664_s10 + $0x10] sm:$0xff] }
 0x5c2   : > { %10800 = vmatprep.subr.bf16.mxu1 %v10799_v54  ;;  %v10835_v44 = vpack.c.bf16 %v8239_v26, %v8238_v27  ;;  %v7069_v27 = vld [vmem:[%s14668_s14 + $0x8] sm:$0xff] }
 0x5c4   : > { %9627 = vmatmul.mubr.msk.f32.gmra.mrb[30].mxu1 %vm4617_vm5, %v4602_v6  ;;  %v5606_v6 = vpop.permute.xlu0 %5605 }
 0x5c5   : > { %9629 = vmatprep.mubr.msk.f32.mxu1 %vm4617_vm5, %v4603_v56 }
 0x5c8   : > { %9630 = vmatmul.mubr.msk.f32.gmra.mrb[32].mxu1 %vm4617_vm5, %v4604_v12  ;;  %v5601_v12 = vpop.permute.xlu1 %5600 }
 0x5c9   : > { %9632 = vmatprep.mubr.msk.f32.mxu1 %vm4617_vm5, %v4605_v25 }
 0x5cc   : > { %9633 = vmatmul.mubr.msk.f32.gmra.mrb[34].mxu1 %vm4617_vm5, %v4606_v17 }
 0x5cd   : > { %9635 = vmatprep.mubr.msk.f32.mxu1 %vm4617_vm5, %v4607_v51 }
 0x5d0   : > { %9636 = vmatmul.mubr.msk.f32.gmra.mrb[36].mxu1 %vm4617_vm5, %v4608_v31 }
 0x5d1   : > { %9638 = vmatprep.mubr.msk.f32.mxu1 %vm4617_vm5, %v4609_v28  ;;  %v8242_v28 = vld [vmem:[%s14664_s10 + $0x20] sm:$0xff] }
 0x5d4   : > { %9639 = vmatmul.mubr.msk.f32.gmra.mrb[38].mxu1 %vm4617_vm5, %v4610_v35  ;;  %v8243_v35 = vld [vmem:[%s14664_s10 + $0x28] sm:$0xff] }
 0x5d5   : > { %9641 = vmatprep.mubr.msk.f32.mxu1 %vm4617_vm5, %v4611_v29 }
 0x5d8   : > { %9642 = vmatmul.mubr.msk.f32.gmra.mrb[40].mxu1 %vm4617_vm5, %v4612_v30 }
 0x5d9   : > { %9644 = vmatprep.mubr.msk.f32.mxu1 %vm4617_vm5, %v4613_v34 }
 0x5dc   : > { %9645 = vmatmul.mubr.msk.f32.gmra.mrb[42].mxu1 %vm4617_vm5, %v4614_v1  ;;  %v10839_v1 = vpack.c.bf16 %v8243_v35, %v8242_v28 }
 0x5dd   : > { %9647 = vmatprep.mubr.msk.f32.mxu1 %vm4617_vm5, %v4615_v24  ;;  %v8246_v24 = vld [vmem:[%s14664_s10 + $0x30] sm:$0xff] }
 0x5e0   : > { %9648 = vmatmul.mubr.msk.f32.gmra.mrb[44].mxu1 %vm4617_vm5, %v4616_v50  ;;  %v8247_v50 = vld [vmem:[%s14664_s10 + $0x38] sm:$0xff] }
 0x5e1   : > { %v10843_v10 = vpack.c.bf16 %v8247_v50, %v8246_v24 }
 0x693   : > { %v9625_v22 = vpop.f32.mrb[28].mxu1 }
 0x694   : > { %v4738_v40 = vpop.f32.mrb[29].mxu1 }
 0x697   : > { %v9628_v43 = vpop.f32.mrb[30].mxu1 }
 0x698   : > { %v4748_v45 = vpop.f32.mrb[31].mxu1 }
 0x699   : > { %9654 = vmatprep.mubr.msk.f32.mxu1 %vm4617_vm5, %v4748_v45  ;;  %v8259_v45 = vld [vmem:[%s14664_s10 + $0x68] sm:$0xff] }
 0x69a   : > { %9655 = vmatmul.mubr.msk.f32.vlgmr.msra.gmra.mrb[46].mxu1 %vm4617_vm5, %v9628_v43  ;;  %v8258_v43 = vld [vmem:[%s14664_s10 + $0x60] sm:$0xff] }
 0x69b   : > { %9661 = vmatprep.mubr.msk.f32.mxu1 %vm4617_vm5, %v4738_v40  ;;  %10802 = vmatpush3.bf16.msra.mxu1 %v10799_v54  ;;  %v9631_v16 = vpop.f32.mrb[32].mxu1  ;;  %v8251_v54 = vld [vmem:[%s14664_s10 + $0x48] sm:$0xff]  ;;  %v8254_v40 = vld [vmem:[%s14664_s10 + $0x50] sm:$0xff] }
 0x69c   : > { %10804 = vmatprep.subr.bf16.mxu1 %v10803_v62  ;;  %v4758_v47 = vpop.f32.mrb[33].mxu1  ;;  %v10851_v52 = vpack.c.bf16 %v8255_v41, %v8254_v40 }
 0x69f   : > { %v9634_v32 = vpop.f32.mrb[34].mxu1 }
 0x6a0   : > { %v4768_v2 = vpop.f32.mrb[35].mxu1 }
 0x6a2   : > { %9662 = vmatmul.mubr.msk.f32.vlgmr.msra.gmra.mrb[46].mxu1 %vm4617_vm5, %v9625_v22  ;;  %v10847_v22 = vpack.c.bf16 %v8251_v54, %v8250_v37 }
 0x6a3   : > { %10806 = vmatpush3.bf16.msra.mxu1 %v10803_v62  ;;  %9668 = vmatprep.mubr.msk.f32.mxu1 %vm4617_vm5, %v4758_v47  ;;  %v9637_v8 = vpop.f32.mrb[36].mxu1  ;;  %v10855_v62 = vpack.c.bf16 %v8259_v45, %v8258_v43  ;;  %v8263_v47 = vld [vmem:[%s14664_s10 + $0x78] sm:$0xff] }
 0x6a4   : > { %10808 = vmatprep.subr.bf16.mxu1 %v10807_v63  ;;  %v4778_v11 = vpop.f32.mrb[37].mxu1 }
 0x6a7   : > { %v9640_v61 = vpop.f32.mrb[38].mxu1 }
 0x6a8   : > { %v4788_v9 = vpop.f32.mrb[39].mxu1 }
 0x6aa   : > { %9669 = vmatmul.mubr.msk.f32.vlgmr.msra.gmra.mrb[46].mxu1 %vm4617_vm5, %v9631_v16  ;;  %v8262_v16 = vld [vmem:[%s14664_s10 + $0x70] sm:$0xff] }
 0x6ab   : > { %10810 = vmatpush3.bf16.msra.mxu1 %v10807_v63  ;;  %9675 = vmatprep.mubr.msk.f32.mxu1 %vm4617_vm5, %v4768_v2  ;;  %v9643_v58 = vpop.f32.mrb[40].mxu1  ;;  %v10859_v23 = vpack.c.bf16 %v8263_v47, %v8262_v16  ;;  %v8270_v2 = vld [vmem:[%s14664_s10 + $0x90] sm:$0xff] }
 0x6ac   : > { %10812 = vmatprep.subr.bf16.mxu1 %v10811_v53  ;;  %v4798_v4 = vpop.f32.mrb[41].mxu1 }
 0x6af   : > { %v9646_v5 = vpop.f32.mrb[42].mxu1 }
 0x6b0   : > { %v4808_v18 = vpop.f32.mrb[43].mxu1 }
 0x6b2   : > { %9676 = vmatmul.mubr.msk.f32.vlgmr.msra.gmra.mrb[46].mxu1 %vm4617_vm5, %v9634_v32  ;;  %v8267_v32 = vld [vmem:[%s14664_s10 + $0x88] sm:$0xff] }
 0x6b3   : > { %10814 = vmatpush3.bf16.msra.mxu1 %v10811_v53  ;;  %9682 = vmatprep.mubr.msk.f32.mxu1 %vm4617_vm5, %v4778_v11  ;;  %v9649_v60 = vpop.f32.mrb[44].mxu1  ;;  %v10863_v63 = vpack.c.bf16 %v8267_v32, %v8266_v59  ;;  %v8278_v53 = vld [vmem:[%s14664_s10 + $0xb0] sm:$0xff] }
 0x6b4   : > { %10816 = vmatprep.subr.bf16.mxu1 %v10815_v13  ;;  %v4818_v57 = vpop.f32.mrb[45].mxu1 }
 0x6ba   : > { %9683 = vmatmul.mubr.msk.f32.vlgmr.msra.gmra.mrb[46].mxu1 %vm4617_vm5, %v9637_v8  ;;  %v8271_v8 = vld [vmem:[%s14664_s10 + $0x98] sm:$0xff] }
 0x6bb   : > { %10818 = vmatpush3.bf16.msra.mxu1 %v10815_v13  ;;  %9689 = vmatprep.mubr.msk.f32.mxu1 %vm4617_vm5, %v4788_v9  ;;  %v10867_v11 = vpack.c.bf16 %v8271_v8, %v8270_v2  ;;  %v8279_v9 = vld [vmem:[%s14664_s10 + $0xb8] sm:$0xff] }
 0x6bc   : > { %10820 = vmatprep.subr.bf16.mxu1 %v10819_v7  ;;  %v8287_v13 = vld [vmem:[%s14664_s10 + $0xd8] sm:$0xff] }
 0x6c2   : > { %9690 = vmatmul.mubr.msk.f32.vlgmr.msra.gmra.mrb[46].mxu1 %vm4617_vm5, %v9640_v61  ;;  %v10871_v61 = vpack.c.bf16 %v8275_v3, %v8274_v15 }
 0x6c3   : > { %10822 = vmatpush3.bf16.msra.mxu1 %v10819_v7  ;;  %9696 = vmatprep.mubr.msk.f32.mxu1 %vm4617_vm5, %v4798_v4  ;;  %v8282_v4 = vld [vmem:[%s14664_s10 + $0xc0] sm:$0xff]  ;;  %v8295_v7 = vld [vmem:[%s14664_s10 + $0xf8] sm:$0xff] }
 0x6c4   : > { %10824 = vmatprep.subr.bf16.mxu1 %v10823_v19  ;;  %v10879_v36 = vpack.c.bf16 %v8283_v55, %v8282_v4  ;;  %v10891_v49 = vpack.c.bf16 %v8295_v7, %v8294_v48 }
 0x6ca   : > { %9697 = vmatmul.mubr.msk.f32.vlgmr.msra.gmra.mrb[46].mxu1 %vm4617_vm5, %v9643_v58  ;;  %v10875_v58 = vpack.c.bf16 %v8279_v9, %v8278_v53 }
 0x6cb   : > { %10826 = vmatpush3.bf16.msra.mxu1 %v10823_v19  ;;  %9703 = vmatprep.mubr.msk.f32.mxu1 %vm4617_vm5, %v4808_v18  ;;  %v6988_v19 = vld [vmem:[%s14666_s12 + $0x8] sm:$0xff] }
 0x6cc   : > { %10828 = vmatprep.subr.bf16.mxu1 %v10827_v42  ;;  %v10896_v46 = vpack.c.bf16 %v6988_v19, %v6987_v33 }
 0x6d2   : > { %9704 = vmatmul.mubr.msk.f32.vlgmr.msra.gmra.mrb[46].mxu1 %vm4617_vm5, %v9646_v5  ;;  %v8286_v5 = vld [vmem:[%s14664_s10 + $0xd0] sm:$0xff] }
 0x6d3   : > { %10830 = vmatpush3.bf16.msra.mxu1 %v10827_v42  ;;  %9710 = vmatprep.mubr.msk.f32.mxu1 %vm4617_vm5, %v4818_v57  ;;  %v10883_v18 = vpack.c.bf16 %v8287_v13, %v8286_v5  ;;  %v8291_v57 = vld [vmem:[%s14664_s10 + $0xe8] sm:$0xff]  ;;  %v6989_v42 = vld [vmem:[%s14666_s12 + $0x10] sm:$0xff] }
 0x6d4   : > { %10832 = vmatprep.subr.bf16.mxu1 %v10831_v39  ;;  %v10899_v21 = vpack.c.bf16 %v6990_v38, %v6989_v42 }
 0x6da   : > { %9711 = vmatmul.mubr.msk.f32.vlgmr.msra.gmra.mrb[46].mxu1 %vm4617_vm5, %v9649_v60  ;;  %v8290_v60 = vld [vmem:[%s14664_s10 + $0xe0] sm:$0xff] }
 0x6db   : > { %10834 = vmatpush3.bf16.msra.mxu1 %v10831_v39  ;;  %v10887_v14 = vpack.c.bf16 %v8291_v57, %v8290_v60  ;;  %v7068_v39 = vld [vmem:[%s14668_s14] sm:$0xff] }
 0x6dc   : > { %10836 = vmatprep.subr.bf16.mxu1 %v10835_v44  ;;  %v10902_v26 = vpack.c.bf16 %v7069_v27, %v7068_v39 }
 0x6de   : > { %10903 = vmatpush3.bf16.msra.mxu0 %v10902_v26 }
 0x6df   : > { %10904 = vmatprep.subr.bf16.mxu0 %v11050_v20 }
 0x7ad   : > { %v9712_v56 = vpop.f32.mrb[46].mxu1 }
 0x7ae   : > { %v5609_v25 = vadd.f32 %v9712_v56, %v5606_v6  ;;  %v5585_v17 = vpop.f32.mrb[47].mxu1 }
 0x7af   : > { %v5608_v51 = vadd.f32 %v5601_v12, %v5585_v17 }
 0x7b0   : > { %vm5611_vm8 = vcmp.ge.f32.partialorder %v5609_v25, 0.0  ;;  %v5613_v31 = vmul.f32 0.01, %v5609_v25 }
 0x7b1   : > { %vm5610_vm9 = vcmp.ge.f32.partialorder %v5608_v51, 0.0  ;;  %v5612_v29 = vmul.f32 0.01, %v5608_v51 }
 0x7b2   : > { %v14416_v30 = vsel %vm5611_vm8, %v5609_v25, %v5613_v31 }
 0x7b3   : > { %5617 = vst.msk [vmem:[%s590_s15 + $0x8] sm:$0xff] %vm4617_vm5, %v14416_v30  ;;  %v14420_v34 = vsel %vm5610_vm9, %v5608_v51, %v5612_v29 }
 0x7b4   : > { %5616 = vst.msk [vmem:[%s590_s15] sm:$0xff] %vm4617_vm5, %v14420_v34  ;;  %9717 = vmatprep.mubr.msk.f32.mxu1 %vm4617_vm5, %v14420_v34  ;;  %s575_s15 = scalar_lea.vmem [#allocation2], %s574_s30 }
 0x7b5   : > { %9718 = vmatmul.mubr.msk.f32.vlgmr.msra.gmra.mrb[48].mxu1 %vm4617_vm5, %v14416_v30  ;;  %s7178_s1 = sshll.u32 %s575_s15, 4  ;;  %s7179_s1 = int_to_ptr.vmem [resolvable:$true] %s7178_s1 }
 0x7b6   : > { %10838 = vmatpush3.bf16.msra.mxu1 %v10835_v44  ;;  %9724 = vmatprep.mubr.msk.f32.mxu1 %vm4617_vm5, %v14420_v34  ;;  %v5618_v44 = vlaneseq  ;;  %s10984_s20 = scalar_lea.vmem %s7179_s1, 16  ;;  %p10991_p0 = scmp.lt.s32.totalorder %s7179_s1, %s10989_s25 }
 0x7b7   : > { %10840 = vmatprep.subr.bf16.mxu1 %v10839_v1  ;;  %p10985_p11 = scmp.ne.s32.totalorder %s7179_s1, %s10984_s20  ;;  %p10992_p1 = scmp.lt.s32.totalorder %s10990_s26, %s10984_s20 }
 0x7b8   : > { %v5619_v6 = vshrl.u32 %v5618_v44, 7 }
 0x7b9   : > { %9725 = vmatmul.mubr.msk.f32.vlgmr.msra.gmra.mrb[50].mxu1 %vm4617_vm5, %v14416_v30  ;;  %p10986_p12 = pnand %p10985_p11, %p11186_p5  ;;  %p10993_p2 = por %p10992_p1, %p10991_p0 }
 0x7ba   : > { %10842 = vmatpush3.bf16.msra.mxu1 %v10839_v1  ;;  %9731 = vmatprep.mubr.msk.f32.mxu1 %vm4617_vm5, %v14420_v34  ;;  %vm5704_vm11 = vcmp.eq.s32.totalorder %v5619_v6, 0  ;;  %vm5788_vm12 = vcmp.eq.s32.totalorder %v5619_v6, 1  ;;  %vm5872_vm13 = vcmp.eq.s32.totalorder %v5619_v6, 2  ;;  %vm5956_vm14 = vcmp.eq.s32.totalorder %v5619_v6, 3 }
 0x7bb   : > { %10844 = vmatprep.subr.bf16.mxu1 %v10843_v10  ;;  %vm6040_vm15 = vcmp.eq.s32.totalorder %v5619_v6, 4  ;;  %vm6124_vm0 = vcmp.eq.s32.totalorder %v5619_v6, 5  ;;  %vm6208_vm1 = vcmp.eq.s32.totalorder %v5619_v6, 6  ;;  %vm6292_vm2 = vcmp.eq.s32.totalorder %v5619_v6, 7  ;;  %p10987_p13 = pneg %p10986_p12 }
 0x7bd   : > { %9732 = vmatmul.mubr.msk.f32.vlgmr.msra.gmra.mrb[52].mxu1 %vm4617_vm5, %v14416_v30  ;;  %p10994_p3 = pnand %p10993_p2, %p10987_p13 }
 0x7be   : > { %10846 = vmatpush3.bf16.msra.mxu1 %v10843_v10  ;;  %9738 = vmatprep.mubr.msk.f32.mxu1 %vm4617_vm5, %v14420_v34 }
 0x7bf   : > { %10848 = vmatprep.subr.bf16.mxu1 %v10847_v22 }
 0x7c1   : > { %9739 = vmatmul.mubr.msk.f32.vlgmr.msra.gmra.mrb[54].mxu1 %vm4617_vm5, %v14416_v30 }
 0x7c2   : > { %10850 = vmatpush3.bf16.msra.mxu1 %v10847_v22  ;;  %9745 = vmatprep.mubr.msk.f32.mxu1 %vm4617_vm5, %v14420_v34 }
 0x7c3   : > { %10852 = vmatprep.subr.bf16.mxu1 %v10851_v52 }
 0x7c5   : > { %9746 = vmatmul.mubr.msk.f32.vlgmr.msra.gmra.mrb[56].mxu1 %vm4617_vm5, %v14416_v30 }
 0x7c6   : > { %10854 = vmatpush3.bf16.msra.mxu1 %v10851_v52  ;;  %9752 = vmatprep.mubr.msk.f32.mxu1 %vm4617_vm5, %v14420_v34 }
 0x7c7   : > { %10856 = vmatprep.subr.bf16.mxu1 %v10855_v62 }
 0x7c9   : > { %9753 = vmatmul.mubr.msk.f32.vlgmr.msra.gmra.mrb[58].mxu1 %vm4617_vm5, %v14416_v30 }
 0x7ca   : > { %10858 = vmatpush3.bf16.msra.mxu1 %v10855_v62  ;;  %9759 = vmatprep.mubr.msk.f32.mxu1 %vm4617_vm5, %v14420_v34 }
 0x7cb   : > { %10860 = vmatprep.subr.bf16.mxu1 %v10859_v23 }
 0x7cd   : > { %9760 = vmatmul.mubr.msk.f32.vlgmr.msra.gmra.mrb[60].mxu1 %vm4617_vm5, %v14416_v30 }
 0x7ce   : > { %10862 = vmatpush3.bf16.msra.mxu1 %v10859_v23  ;;  %9766 = vmatprep.mubr.msk.f32.mxu1 %vm4617_vm5, %v14420_v34 }
 0x7cf   : > { %10864 = vmatprep.subr.bf16.mxu1 %v10863_v63 }
 0x7d1   : > { %9767 = vmatmul.mubr.msk.f32.vlgmr.msra.gmra.mrb[62].mxu1 %vm4617_vm5, %v14416_v30 }
 0x7d2   : > { %10866 = vmatpush3.bf16.msra.mxu1 %v10863_v63  ;;  %9773 = vmatprep.mubr.msk.f32.mxu1 %vm4617_vm5, %v14420_v34  ;;  %v5620_v63 = vadd.s32 8, %v5619_v6 }
 0x7d3   : > { %10868 = vmatprep.subr.bf16.mxu1 %v10867_v11 }
 0x7d4   : > { %vm6377_vm3 = vcmp.eq.s32.totalorder %v5620_v63, 8  ;;  %vm6461_vm4 = vcmp.eq.s32.totalorder %v5620_v63, 9  ;;  %vm6629_vm6 = vcmp.eq.s32.totalorder %v5620_v63, 11  ;;  %vm6713_vm7 = vcmp.eq.s32.totalorder %v5620_v63, 12 }
 0x7d5   : > { %9774 = vmatmul.mubr.msk.f32.vlgmr.msra.gmra.mrb[64].mxu1 %vm4617_vm5, %v14416_v30  ;;  %vm6797_vm8 = vcmp.eq.s32.totalorder %v5620_v63, 13  ;;  %vm6881_vm9 = vcmp.eq.s32.totalorder %v5620_v63, 14 }
 0x7d6   : > { %10870 = vmatpush3.bf16.msra.mxu1 %v10867_v11  ;;  %9780 = vmatprep.mubr.msk.f32.mxu1 %vm4617_vm5, %v14420_v34 }
 0x7d7   : > { %10872 = vmatprep.subr.bf16.mxu1 %v10871_v61 }
 0x7d9   : > { %9781 = vmatmul.mubr.msk.f32.vlgmr.msra.gmra.mrb[66].mxu1 %vm4617_vm5, %v14416_v30 }
 0x7da   : > { %10874 = vmatpush3.bf16.msra.mxu1 %v10871_v61  ;;  %9787 = vmatprep.mubr.msk.f32.mxu1 %vm4617_vm5, %v14420_v34 }
 0x7db   : > { %10876 = vmatprep.subr.bf16.mxu1 %v10875_v58 }
 0x7dd   : > { %9788 = vmatmul.mubr.msk.f32.vlgmr.msra.gmra.mrb[68].mxu1 %vm4617_vm5, %v14416_v30 }
 0x7de   : > { %10878 = vmatpush3.bf16.msra.mxu1 %v10875_v58  ;;  %9794 = vmatprep.mubr.msk.f32.mxu1 %vm4617_vm5, %v14420_v34 }
 0x7df   : > { %10880 = vmatprep.subr.bf16.mxu1 %v10879_v36 }
 0x7e1   : > { %9795 = vmatmul.mubr.msk.f32.vlgmr.msra.gmra.mrb[70].mxu1 %vm4617_vm5, %v14416_v30 }
 0x7e2   : > { %10882 = vmatpush3.bf16.msra.mxu1 %v10879_v36  ;;  %9801 = vmatprep.mubr.msk.f32.mxu1 %vm4617_vm5, %v14420_v34 }
 0x7e3   : > { %10884 = vmatprep.subr.bf16.mxu1 %v10883_v18 }
 0x7e5   : > { %9802 = vmatmul.mubr.msk.f32.vlgmr.msra.gmra.mrb[72].mxu1 %vm4617_vm5, %v14416_v30 }
 0x7e6   : > { %10886 = vmatpush3.bf16.msra.mxu1 %v10883_v18  ;;  %9808 = vmatprep.mubr.msk.f32.mxu1 %vm4617_vm5, %v14420_v34 }
 0x7e7   : > { %10888 = vmatprep.subr.bf16.mxu1 %v10887_v14 }
 0x7e9   : > { %9809 = vmatmul.mubr.msk.f32.vlgmr.msra.gmra.mrb[74].mxu1 %vm4617_vm5, %v14416_v30 }
 0x7ea   : > { %10890 = vmatpush3.bf16.msra.mxu1 %v10887_v14  ;;  %9815 = vmatprep.mubr.msk.f32.mxu1 %vm4617_vm5, %v14420_v34 }
 0x7eb   : > { %10892 = vmatprep.subr.bf16.mxu1 %v10891_v49 }
 0x7ed   : > { %9816 = vmatmul.mubr.msk.f32.vlgmr.msra.gmra.mrb[76].mxu1 %vm4617_vm5, %v14416_v30 }
 0x7ee   : > { %10894 = vmatpush3.bf16.msra.mxu1 %v10891_v49  ;;  %9822 = vmatprep.mubr.msk.f32.mxu1 %vm4617_vm5, %v14420_v34 }
 0x7ef   : > { %10895 = vmatprep.subr.bf16.mxu1 %v11050_v20 }
 0x7f1   : > { %9823 = vmatmul.mubr.msk.f32.vlgmr.msra.gmra.mrb[78].mxu1 %vm4617_vm5, %v14416_v30  ;;  %vm6545_vm5 = vcmp.eq.s32.totalorder %v5620_v63, 10 }
 0x7f2   : > { %10897 = vmatpush3.bf16.msra.mxu1 %v10896_v46  ;;  %9833 = vmatprep.mubr.msk.f32.mxu1 %vm11051_vm10, %v11048_v0  ;;  %vm6965_vm10 = vcmp.eq.s32.totalorder %v5620_v63, 15 }
 0x7f3   : > { %10898 = vmatprep.subr.bf16.mxu1 %v11050_v20 }
 0x7f6   : > { %10900 = vmatpush3.bf16.msra.mxu1 %v10899_v21 }
 0x888   : > { %v9719_v56 = vpop.f32.mrb[48].mxu1 }
 0x889   : > { %v5695_v12 = vpop.f32.mrb[49].mxu1 }
 0x88a   : > { %v5706_v17 = vsel %vm5704_vm11, %v5695_v12, 0.0  ;;  %vm6970_vm11 = vcmask 261120  }
 0x88c   : > { %v9726_v0 = vpop.f32.mrb[50].mxu1 }
 0x88d   : > { %v5779_v25 = vpop.f32.mrb[51].mxu1 }
 0x88e   : > { %v5790_v51 = vsel %vm5788_vm12, %v5779_v25, 0.0 }
 0x88f   : > { %v5792_v31 = vadd.f32 %v5790_v51, %v5706_v17 }
 0x890   : > { %v9733_v28 = vpop.f32.mrb[52].mxu1 }
 0x891   : > { %v5863_v35 = vpop.f32.mrb[53].mxu1 }
 0x892   : > { %v5874_v29 = vsel %vm5872_vm13, %v5863_v35, 0.0  ;;  %v6980_v35 = vld [vmem:[%s14665_s11] sm:$0x1]  ;;  %vm6985_vm13 = vcmask 253952  }
 0x893   : > { %v5876_v30 = vadd.f32 %v5874_v29, %v5792_v31 }
 0x894   : > { %v9740_v34 = vpop.f32.mrb[54].mxu1 }
 0x895   : > { %v5947_v1 = vpop.f32.mrb[55].mxu1 }
 0x896   : > { %v5958_v24 = vsel %vm5956_vm14, %v5947_v1, 0.0 }
 0x897   : > { %v5960_v50 = vadd.f32 %v5958_v24, %v5876_v30  ;;  %v7070_v24 = vld [vmem:[%s14668_s14 + $0x10] sm:$0xff] }
 0x898   : > { %v9747_v10 = vpop.f32.mrb[56].mxu1 }
 0x899   : > { %v6031_v37 = vpop.f32.mrb[57].mxu1 }
 0x89a   : > { %v6042_v54 = vsel %vm6040_vm15, %v6031_v37, 0.0  ;;  %v6991_v37 = vld [vmem:[%s14667_s13] sm:$0x1] }
 0x89b   : > { %v6044_v22 = vadd.f32 %v6042_v54, %v5960_v50  ;;  %v7071_v50 = vld [vmem:[%s14668_s14 + $0x18] sm:$0xff] }
 0x89c   : > { %v9754_v40 = vpop.f32.mrb[58].mxu1  ;;  %v10905_v10 = vpack.c.bf16 %v7071_v50, %v7070_v24 }
 0x89d   : > { %v6115_v41 = vpop.f32.mrb[59].mxu1 }
 0x89e   : > { %v6126_v52 = vsel %vm6124_vm0, %v6115_v41, 0.0  ;;  %10906 = vmatpush3.bf16.msra.mxu0 %v10905_v10 }
 0x89f   : > { %v6128_v43 = vadd.f32 %v6126_v52, %v6044_v22 }
 0x8a0   : > { %v9761_v45 = vpop.f32.mrb[60].mxu1 }
 0x8a1   : > { %v6199_v62 = vpop.f32.mrb[61].mxu1 }
 0x8a2   : > { %v6210_v16 = vsel %vm6208_vm1, %v6199_v62, 0.0 }
 0x8a3   : > { %v6212_v47 = vadd.f32 %v6210_v16, %v6128_v43 }
 0x8a4   : > { %v9768_v23 = vpop.f32.mrb[62].mxu1 }
 0x8a5   : > { %v6283_v59 = vpop.f32.mrb[63].mxu1 }
 0x8a6   : > { %v6294_v32 = vsel %vm6292_vm2, %v6283_v59, 0.0 }
 0x8a7   : > { %v6296_v2 = vadd.f32 %v6294_v32, %v6212_v47 }
 0x8a8   : > { %v9775_v8 = vpop.f32.mrb[64].mxu1 }
 0x8a9   : > { %v6367_v11 = vpop.f32.mrb[65].mxu1  ;;  %v6379_v3 = vsel %vm6377_vm3, %v9775_v8, 0.0  ;;  %v6971_v56 = vsel %vm6970_vm11, %v6296_v2, 0.0 }
 0x8ac   : > { %v9782_v15 = vpop.f32.mrb[66].mxu1 }
 0x8ad   : > { %v6463_v61 = vsel %vm6461_vm4, %v9782_v15, 0.0  ;;  %v6451_v53 = vpop.f32.mrb[67].mxu1 }
 0x8ae   : > { %v6465_v9 = vadd.f32 %v6463_v61, %v6379_v3 }
 0x8b0   : > { %v9789_v58 = vpop.f32.mrb[68].mxu1 }
 0x8b1   : > { %v6547_v4 = vsel %vm6545_vm5, %v9789_v58, 0.0  ;;  %v6535_v55 = vpop.f32.mrb[69].mxu1 }
 0x8b2   : > { %v6549_v36 = vadd.f32 %v6547_v4, %v6465_v9 }
 0x8b4   : > { %v9796_v5 = vpop.f32.mrb[70].mxu1 }
 0x8b5   : > { %v6631_v13 = vsel %vm6629_vm6, %v9796_v5, 0.0  ;;  %v6619_v18 = vpop.f32.mrb[71].mxu1 }
 0x8b6   : > { %v6633_v60 = vadd.f32 %v6631_v13, %v6549_v36 }
 0x8b8   : > { %v9803_v57 = vpop.f32.mrb[72].mxu1 }
 0x8b9   : > { %v6715_v14 = vsel %vm6713_vm7, %v9803_v57, 0.0  ;;  %v6703_v48 = vpop.f32.mrb[73].mxu1 }
 0x8ba   : > { %v6717_v7 = vadd.f32 %v6715_v14, %v6633_v60 }
 0x8bc   : > { %v9810_v49 = vpop.f32.mrb[74].mxu1 }
 0x8bd   : > { %v6799_v33 = vsel %vm6797_vm8, %v9810_v49, 0.0  ;;  %v6787_v19 = vpop.f32.mrb[75].mxu1 }
 0x8be   : > { %v6801_v46 = vadd.f32 %v6799_v33, %v6717_v7 }
 0x8c0   : > { %v9817_v20 = vpop.f32.mrb[76].mxu1 }
 0x8c1   : > { %v6883_v42 = vsel %vm6881_vm9, %v9817_v20, 0.0  ;;  %v6871_v38 = vpop.f32.mrb[77].mxu1 }
 0x8c2   : > { %v6885_v21 = vadd.f32 %v6883_v42, %v6801_v46 }
 0x8c4   : > { %v9824_v39 = vpop.f32.mrb[78].mxu1 }
 0x8c5   : > { %v6967_v27 = vsel %vm6965_vm10, %v9824_v39, 0.0  ;;  %v6955_v26 = vpop.f32.mrb[79].mxu1 }
 0x8c6   : > { %v6969_v6 = vadd.f32 %v6967_v27, %v6885_v21 }
 0x8c8   : > { %v6972_v12 = vsel %vm6970_vm11, %v6969_v6, 0.0 }
 0x8c9   : > { %v6973_v0 = vadd.f32 %v6972_v12, %v6971_v56 }
 0x8cb   : > { %v6974_v25 = vrot.slane %v6973_v0, 4 }
 0x8cd   : > { %v6975_v17 = vadd.f32 %v6974_v25, %v6973_v0 }
 0x8cf   : > { %v6976_v51 = vrot.slane %v6975_v17, 2 }
 0x8d1   : > { %v6977_v31 = vadd.f32 %v6976_v51, %v6975_v17 }
 0x8d3   : > { %v6978_v28 = vrot.slane %v6977_v31, 1 }
 0x8d5   : > { %v6979_v29 = vadd.f32 %v6978_v28, %v6977_v31 }
 0x8d7   : > { %v6981_v30 = vadd.f32 %v6980_v35, %v6979_v29 }
 0x8d9   : > { %vm6982_vm12 = vcmp.ge.f32.partialorder %v6981_v30, 0.0  ;;  %v6983_v34 = vmul.f32 0.01, %v6981_v30 }
 0x8db   : > { %v6984_v1 = vsel %vm6982_vm12, %v6981_v30, %v6983_v34 }
 0x8dc   : > { %9834 = vmatmul.mubr.msk.f32.vlgmr.msra.gmra.mrb[80].mxu1 %vm6970_vm11, %v6984_v1  ;;  %6986 = vst.msk [vmem:[%s575_s15] sm:$0x1] %vm6985_vm13, %v6984_v1 }
 0x9af   : > { %v7061_v54 = vpop.f32.mrb[80].mxu1 }
 0x9b0   : > { %v7062_v22 = vadd.f32 %v7061_v54, %v6991_v37  ;;  %v9835_v40 = vpop.f32.mrb[81].mxu1 }
 0x9b2   : > { %vm7065_vm14 = vcmp.ge.f32.partialorder %v7062_v22, 0.0  ;;  %v7066_v41 = vmul.f32 0.01, %v7062_v22 }
 0x9b4   : > { %v7067_v52 = vsel %vm7065_vm14, %v7062_v22, %v7066_v41 }
 0x9b5   : > { %9845 = vmatmul.mubr.msk.f32.vlgmr.msra.gmra.mrb[92].mxu0 %vm6970_vm11, %v7067_v52 }
 0x9b6   : > { %10997 = shalt.err (!%p10994_p3)
}
 0x9b7   : > { %s10998_s0 = scalar_lea.hbm %s14609_s18, 16  ;;  %s11002_s29 = scalar_lea.hbm %s14671_s17, 32 }
 0x9b8   : > { %p10999_p4 = scmp.ne.s32.totalorder %s14609_s18, %s10998_s0  ;;  %p11003_p9 = scmp.lt.u32.totalorder %s14609_s18, %s14671_s17 }
 0x9b9   : > { %p11004_p10 = scmp.lt.u32.totalorder %s11002_s29, %s10998_s0  ;;  %p11006_p12 = scmp.lt.u32.totalorder %s10998_s0, %s14609_s18 }
 0x9ba   : > { %p11000_p7 = pnand %p10999_p4, %p11186_p5 }
 0x9bb   : > { %p11005_p11 = por %p11004_p10, %p11003_p9 }
 0x9bc   : > { %p11001_p8 = pneg %p11000_p7 }
 0x9bd   : > { %p11007_p13 = por %p11006_p12, %p11005_p11 }
 0x9bf   : > { %p11008_p0 = pnand %p11007_p13, %p11001_p8 }
 0x9c1   : > { %11011 = shalt.err (!%p11008_p0)
}
 0x9c2   : > { %10939 = dma.vmem_to_hbm [thread:$0]  (%p11186_p5), %s7179_s1, 16, %s14609_s18, %s7160_s19   ;;  %v7147_v45 = vand.u32 127, %v5618_v44 }
 0x9c3   : > { %s14696_s25 = sld [smem:[#allocation14_spill]]  ;;  %s14697_s30 = sld [smem:[#allocation15_spill]] }
 0x9c4   : > { %vm7148_vm15 = vcmp.lt.s32.totalorder %v7147_v45, 16 }
 0x9c9   : > { %v7072_v43 = vld [vmem:[%s14696_s25] sm:$0x1]  ;;  %s593_s15 = scalar_lea.vmem %s14697_s30, %s11199_s24 }
 0xa88   : > { %v7142_v62 = vpop.f32.mrb[92].mxu0 }
 0xa89   : > { %v7143_v16 = vadd.f32 %v7142_v62, %v7072_v43  ;;  %v9846_v47 = vpop.f32.mrb[93].mxu0 }
 0xa8b   : > { %vm7149_vm0 = vcmp.ge.f32.partialorder %v7143_v16, 0.0  ;;  %v7150_v23 = vmul.f32 0.01, %v7143_v16 }
 0xa8d   : > { %v7151_v59 = vsel %vm7149_vm0, %v7143_v16, %v7150_v23 }
 0xa8e   : > { %v7152_v32 = vsel %vm7148_vm15, %v7151_v59, %v7143_v16 }
 0xa8f   : > { %7153 = vst.msk [vmem:[%s593_s15] sm:$0x1] %vm6985_vm13, %v7152_v32 }
 0xa90 PF: > { %s14698_s2 = sld [smem:[#allocation7_spill]]  ;;  %s14699_s1 = sld [smem:[#allocation5_spill]] }
 0xa96   : > { %p10945_p5 = scmp.ge.s32.totalorder %s14698_s2, 2  ;;  %s7201_s19 = sand.u32 1, %s14699_s1  }
 0xa97   : > { %s7202_s29 = scalar_lea.sflag [#allocation3], %s7201_s19 }
 0xa98   : > { %p10942_p1 = pnand %p10945_p5, %p11190_p6 }
 0xa9a   : > { %11029 = dma.done.wait (!%p10942_p1), %s7202_s29, 16  }
 0xa9b   : > { %11031 = vsyncadd (!%p10942_p1), %s7202_s29, 4294967280  ;;  %s14701_s30 = sld [smem:[#allocation8_spill]]  ;;  %s14702_s23 = sld [smem:[#allocation6_spill]] }
 0xa9c   : > { %s14703_s29 = sld [smem:[#allocation9_spill]]  ;;  %s14704_s27 = smov %s11038_s28 }
 0xaa1   : > { %p29_p2 = scmp.ge.s32.totalorder %s14701_s30, 4   ;;  %s14705_s28 = smov %s14702_s23 }
 0xaa3   :  { %31 = sbr.rel (!%p29_p2) target bundleno = 9 (0x9), region = 198 }
 0xaaa   :  { %7212 = vsyncpa [#allocation3], 1 }
 0xaab   :  { %7214 = vsyncpa [#allocation3 + $0x1], 1 }

</bundles_post_ra>
